<compile_context>
chip_gen: v5e
topology: v5e:2x2
jax: 0.10.0
libtpu: 0.0.40
codegen_flags: <defaults>
</compile_context>

<pallas_src>
import functools
import math

import jax
import jax.numpy as jnp
from jax import lax
from jax.experimental import pallas as pl
from jax.experimental.pallas import tpu as pltpu


_VMEM_LIMIT = 64 * 1024 * 1024


def _cparams(dims):
    return pltpu.CompilerParams(dimension_semantics=dims,
                                vmem_limit_bytes=_VMEM_LIMIT)


def _pick_tile(dim, cap, quantum):
    """Largest tile <= cap that divides dim and is a multiple of quantum
    (returns dim itself when dim <= cap or no such multiple exists)."""
    if dim <= cap:
        return dim
    t = (cap // quantum) * quantum
    while t >= quantum:
        if dim % t == 0:
            return t
        t -= quantum
    return dim


# ----------------------------------------------------------------------------
# LayerNorm kernel (f32 math, bf16 activation out)
# ----------------------------------------------------------------------------
def layernorm_kernel(x_ref, g_ref, b_ref, o_ref, *, eps):
    x = x_ref[...].astype(jnp.float32)              # (tm, D)
    mean = jnp.mean(x, axis=-1, keepdims=True)
    xc = x - mean
    var = jnp.mean(xc * xc, axis=-1, keepdims=True)
    inv = lax.rsqrt(var + eps)
    o_ref[...] = (xc * inv * g_ref[...] + b_ref[...]).astype(o_ref.dtype)


def pallas_layernorm(x, gamma, beta, *, eps, out_dtype=jnp.bfloat16):
    M, D = x.shape
    tm = _pick_tile(M, 256, 8)
    return pl.pallas_call(
        functools.partial(layernorm_kernel, eps=eps),
        out_shape=jax.ShapeDtypeStruct((M, D), out_dtype),
        grid=(M // tm,),
        in_specs=[
            pl.BlockSpec((tm, D), lambda i: (i, 0)),
            pl.BlockSpec((1, D), lambda i: (0, 0)),
            pl.BlockSpec((1, D), lambda i: (0, 0)),
        ],
        out_specs=pl.BlockSpec((tm, D), lambda i: (i, 0)),
        compiler_params=_cparams(("parallel",)),
    )(x, gamma, beta)


# ----------------------------------------------------------------------------
# Tiled bf16 matmul with fused (optional) bias / gelu_new / residual epilogue
# ----------------------------------------------------------------------------
def matmul_kernel(x_ref, w_ref, *rest, activation, n_res, has_bias):
    idx = 0
    b_ref = None
    if has_bias:
        b_ref = rest[0]
        idx = 1
    res_refs = rest[idx:idx + n_res]
    o_ref = rest[idx + n_res]
    acc_ref = rest[idx + n_res + 1]
    k = pl.program_id(2)

    @pl.when(k == 0)
    def _():
        acc_ref[...] = jnp.zeros_like(acc_ref)

    acc_ref[...] += jnp.dot(x_ref[...], w_ref[...],
                            preferred_element_type=jnp.float32)

    @pl.when(k == pl.num_programs(2) - 1)
    def _():
        y = acc_ref[...]
        if has_bias:
            y = y + b_ref[...].astype(jnp.float32)
        if activation == "gelu_new":
            y = 0.5 * y * (1.0 + jnp.tanh(
                0.7978845608028654 * (y + 0.044715 * y * y * y)))
        for r in res_refs:
            y = y + r[...].astype(jnp.float32)
        o_ref[...] = y.astype(o_ref.dtype)


def pallas_matmul(x, w, bias=None, *, residuals=(), activation=None,
                  out_dtype=jnp.bfloat16, tm_cap=256, tn_cap=512, tk_cap=512):
    """out = act(x @ w + bias) + sum(residuals); bf16 MXU, f32 accumulate."""
    M, K = x.shape
    Kw, N = w.shape
    assert K == Kw
    tm = _pick_tile(M, tm_cap, 8)
    tn = _pick_tile(N, tn_cap, 128)
    tk = _pick_tile(K, tk_cap, 128)
    has_bias = bias is not None
    n_res = len(residuals)

    in_specs = [
        pl.BlockSpec((tm, tk), lambda i, j, k: (i, k)),
        pl.BlockSpec((tk, tn), lambda i, j, k: (k, j)),
    ]
    args = [x, w]
    if has_bias:
        in_specs.append(pl.BlockSpec((1, tn), lambda i, j, k: (0, j)))
        args.append(bias)
    in_specs += [pl.BlockSpec((tm, tn), lambda i, j, k: (i, j))
                 for _ in residuals]
    args += list(residuals)

    return pl.pallas_call(
        functools.partial(matmul_kernel, activation=activation,
                          n_res=n_res, has_bias=has_bias),
        out_shape=jax.ShapeDtypeStruct((M, N), out_dtype),
        grid=(M // tm, N // tn, K // tk),
        in_specs=in_specs,
        out_specs=pl.BlockSpec((tm, tn), lambda i, j, k: (i, j)),
        scratch_shapes=[pltpu.VMEM((tm, tn), jnp.float32)],
        compiler_params=_cparams(("parallel", "parallel", "arbitrary")),
    )(*args)


# ----------------------------------------------------------------------------
# Rotary + head-split kernel.
# Reads the (B, S, 3D) qkv projection, applies rotary to q and k, folds
# 1/sqrt(dh) into q, and writes:
#   q_rot, k_rot, v   in bf16 (B, H, S, dh)   -> attention inputs
#   present_k, present_v in f32 (B, H, S, dh) -> module outputs
# ----------------------------------------------------------------------------
def rotary_split_kernel(qkv_ref, sin_ref, cos_ref,
                        q_ref, k_ref, v_ref, pk_ref, pv_ref,
                        *, n_head, d_head, rot, q_scale):
    D = n_head * d_head
    sin = sin_ref[0]                                  # (ts, rot) f32
    cos = cos_ref[0]

    # rotate_every_two as a tiny constant permutation matrix built in-register
    # from iota (no extra HBM stream; negligible MXU work, once per token tile).
    # TODO(synk): could also be pltpu.roll + parity select on the XLU/VPU.
    r = lax.broadcasted_iota(jnp.int32, (rot, rot), 0)
    c = lax.broadcasted_iota(jnp.int32, (rot, rot), 1)
    rot_m = jnp.where((c == r - 1) & (r % 2 == 1), -1.0,
                      jnp.where((c == r + 1) & (r % 2 == 0), 1.0, 0.0)
                      ).astype(jnp.float32)

    def rope(x):                                      # x: (ts, d_head) f32
        xr = x[:, :rot]
        xr = xr * cos + jnp.dot(xr, rot_m,
                                preferred_element_type=jnp.float32) * sin
        if rot < d_head:
            return jnp.concatenate([xr, x[:, rot:]], axis=-1)
        return xr

    for h in range(n_head):                           # static unrolled loop
        q = qkv_ref[0, :, h * d_head:(h + 1) * d_head].astype(jnp.float32)
        k = qkv_ref[0, :, D + h * d_head:D + (h + 1) * d_head].astype(jnp.float32)
        v = qkv_ref[0, :, 2 * D + h * d_head:
                    2 * D + (h + 1) * d_head].astype(jnp.float32)
        qr = rope(q) * q_scale                        # fold 1/sqrt(dh) into q
        kr = rope(k)
        q_ref[0, h] = qr.astype(q_ref.dtype)
        k_ref[0, h] = kr.astype(k_ref.dtype)
        v_ref[0, h] = v.astype(v_ref.dtype)
        pk_ref[0, h] = kr.astype(pk_ref.dtype)        # f32 present_k
        pv_ref[0, h] = v.astype(pv_ref.dtype)         # f32 present_v


def pallas_rotary_split(qkv, sin, cos, *, n_head, rotary_dim, q_scale):
    B, S, threeD = qkv.shape
    D = threeD // 3
    dh = D // n_head
    ts = _pick_tile(S, 128, 8)
    head_shape = (B, n_head, S, dh)
    hs_spec = pl.BlockSpec((1, n_head, ts, dh), lambda b, s: (b, 0, s, 0))
    out_shape = (
        jax.ShapeDtypeStruct(head_shape, jnp.bfloat16),   # q (rotated, scaled)
        jax.ShapeDtypeStruct(head_shape, jnp.bfloat16),   # k (rotated)
        jax.ShapeDtypeStruct(head_shape, jnp.bfloat16),   # v
        jax.ShapeDtypeStruct(head_shape, jnp.float32),    # present_k
        jax.ShapeDtypeStruct(head_shape, jnp.float32),    # present_v
    )
    return pl.pallas_call(
        functools.partial(rotary_split_kernel, n_head=n_head, d_head=dh,
                          rot=rotary_dim, q_scale=q_scale),
        out_shape=out_shape,
        grid=(B, S // ts),
        in_specs=[
            pl.BlockSpec((1, ts, threeD), lambda b, s: (b, s, 0)),
            pl.BlockSpec((1, ts, rotary_dim), lambda b, s: (b, s, 0)),
            pl.BlockSpec((1, ts, rotary_dim), lambda b, s: (b, s, 0)),
        ],
        out_specs=tuple(hs_spec for _ in range(5)),
        compiler_params=_cparams(("parallel", "parallel")),
    )(qkv, sin, cos)


# ----------------------------------------------------------------------------
# Flash attention: grid (B, H, Q_tiles, KV_tiles), online softmax, causal +
# additive mask, causal block-skip.  q is pre-scaled; k is pre-rotated.
# ----------------------------------------------------------------------------
def flash_attention_kernel(q_ref, k_ref, v_ref, mask_ref, o_ref,
                           m_ref, l_ref, acc_ref, *, tq, tkv):
    qi = pl.program_id(2)
    ki = pl.program_id(3)

    @pl.when(ki == 0)
    def _():
        m_ref[...] = jnp.full(m_ref.shape, -jnp.inf, m_ref.dtype)
        l_ref[...] = jnp.zeros_like(l_ref)
        acc_ref[...] = jnp.zeros_like(acc_ref)

    # Skip KV blocks entirely above the causal diagonal.
    @pl.when(ki * tkv < (qi + 1) * tq)
    def _():
        q = q_ref[0, 0]                      # (tq, dh)  bf16
        k = k_ref[0, 0]                      # (tkv, dh) bf16
        s = lax.dot_general(q, k, (((1,), (1,)), ((), ())),
                            preferred_element_type=jnp.float32)   # (tq, tkv)
        rows = qi * tq + lax.broadcasted_iota(jnp.int32, (tq, tkv), 0)
        cols = ki * tkv + lax.broadcasted_iota(jnp.int32, (tq, tkv), 1)
        # finite fill (not -inf) so adding the additive mask can't produce NaN
        s = jnp.where(rows >= cols, s, -1e30)
        s = s + mask_ref[0, 0]               # (1, tkv) additive mask, broadcast
        m_prev = m_ref[...]
        m_new = jnp.maximum(m_prev, jnp.max(s, axis=-1, keepdims=True))
        alpha = jnp.exp(m_prev - m_new)
        p = jnp.exp(s - m_new)
        l_ref[...] = alpha * l_ref[...] + jnp.sum(p, axis=-1, keepdims=True)
        acc_ref[...] = alpha * acc_ref[...] + jnp.dot(
            p.astype(v_ref.dtype), v_ref[0, 0],
            preferred_element_type=jnp.float32)
        m_ref[...] = m_new

    @pl.when(ki == pl.num_programs(3) - 1)
    def _():
        o_ref[0, 0] = (acc_ref[...] *
                       pl.reciprocal(l_ref[...], approx=True)
                       ).astype(o_ref.dtype)


def pallas_flash_attention(q, k, v, attn_mask):
    B, H, S, dh = q.shape
    tq = _pick_tile(S, 256, 8)
    tkv = _pick_tile(S, 512, 128)
    q_spec = pl.BlockSpec((1, 1, tq, dh), lambda b, h, qi, ki: (b, h, qi, 0))
    kv_spec = pl.BlockSpec((1, 1, tkv, dh), lambda b, h, qi, ki: (b, h, ki, 0))
    mask_spec = pl.BlockSpec((1, 1, 1, tkv), lambda b, h, qi, ki: (b, 0, 0, ki))
    return pl.pallas_call(
        functools.partial(flash_attention_kernel, tq=tq, tkv=tkv),
        out_shape=jax.ShapeDtypeStruct((B, H, S, dh), jnp.bfloat16),
        grid=(B, H, S // tq, S // tkv),
        in_specs=[q_spec, kv_spec, kv_spec, mask_spec],
        out_specs=q_spec,
        scratch_shapes=[pltpu.VMEM((tq, 1), jnp.float32),
                        pltpu.VMEM((tq, 1), jnp.float32),
                        pltpu.VMEM((tq, dh), jnp.float32)],
        compiler_params=_cparams(
            ("parallel", "parallel", "parallel", "arbitrary")),
    )(q, k, v, attn_mask)


# ----------------------------------------------------------------------------
# Full Block forward (wrapper = layout plumbing only)
# ----------------------------------------------------------------------------
def block_forward(hidden_states, position_ids, attention_mask, params,
                  *, n_head, rotary_dim, eps):
    B, S, D = hidden_states.shape
    dh = D // n_head
    M = B * S

    x2 = hidden_states.reshape(M, D).astype(jnp.float32)   # residual (f32)

    # ln_1 (bf16 activation out)
    ln = pallas_layernorm(x2, params["ln_g"], params["ln_b"], eps=eps)

    # bf16 weights for the MXU path (real Moss checkpoints are fp16 already)
    w_qkv = params["w_qkv"].astype(jnp.bfloat16)
    w_out = params["w_out"].astype(jnp.bfloat16)
    w_fc_in = params["w_fc_in"].astype(jnp.bfloat16)
    w_fc_out = params["w_fc_out"].astype(jnp.bfloat16)

    # fused qkv projection (no bias in Moss qkv_proj)
    qkv = pallas_matmul(ln, w_qkv).reshape(B, S, 3 * D)

    # rotary tables from position_ids (tiny, O(B*S*rot))
    inv_freq = 1.0 / (10000.0 ** (jnp.arange(0, rotary_dim, 2,
                                              dtype=jnp.float32) / rotary_dim))
    sinusoid = position_ids.astype(jnp.float32)[..., None] * inv_freq
    sin = jnp.repeat(jnp.sin(sinusoid), 2, axis=-1)         # (B, S, rot)
    cos = jnp.repeat(jnp.cos(sinusoid), 2, axis=-1)

    # head split + rotary + q pre-scale; also emits f32 presents
    q_rot, k_rot, v_bf, present_k, present_v = pallas_rotary_split(
        qkv, sin, cos, n_head=n_head, rotary_dim=rotary_dim,
        q_scale=1.0 / math.sqrt(dh))

    # flash attention (KV streamed through VMEM, online softmax)
    attn = pallas_flash_attention(q_rot, k_rot, v_bf,
                                  attention_mask.astype(jnp.float32))

    # merge heads + out_proj (no bias)
    attn2 = attn.transpose(0, 2, 1, 3).reshape(M, D)
    attn_out = pallas_matmul(attn2, w_out)

    # MLP on ln (parallel branch); attn_out + residual fused into fc_out epilogue
    h1 = pallas_matmul(ln, w_fc_in, params["b_fc_in"], activation="gelu_new")
    hidden = pallas_matmul(h1, w_fc_out, params["b_fc_out"],
                           residuals=(attn_out, x2), out_dtype=jnp.float32)
    hidden = hidden.reshape(B, S, D)

    return (hidden.astype(jnp.float32),
            present_k.astype(jnp.float32),
            present_v.astype(jnp.float32))


# ----------------------------------------------------------------------------
# Pure-JAX f32 reference (mirrors the PyTorch Moss block math)
# ----------------------------------------------------------------------------
def block_reference(hidden_states, position_ids, attention_mask, params,
                    *, n_head, rotary_dim, eps):
    B, S, D = hidden_states.shape
    dh = D // n_head
    x = hidden_states.astype(jnp.float32)

    mean = x.mean(-1, keepdims=True)
    var = ((x - mean) ** 2).mean(-1, keepdims=True)
    ln = (x - mean) * lax.rsqrt(var + eps) * params["ln_g"] + params["ln_b"]
    ln2 = ln.reshape(B * S, D)

    qkv = (ln2 @ params["w_qkv"]).reshape(B, S, 3 * D)
    q = qkv[..., :D].reshape(B, S, n_head, dh).transpose(0, 2, 1, 3)
    k = qkv[..., D:2 * D].reshape(B, S, n_head, dh).transpose(0, 2, 1, 3)
    v = qkv[..., 2 * D:].reshape(B, S, n_head, dh).transpose(0, 2, 1, 3)

    inv_freq = 1.0 / (10000.0 ** (jnp.arange(0, rotary_dim, 2,
                                              dtype=jnp.float32) / rotary_dim))
    sinusoid = position_ids.astype(jnp.float32)[..., None] * inv_freq
    sin = jnp.repeat(jnp.sin(sinusoid), 2, axis=-1)[:, None]   # (B,1,S,rot)
    cos = jnp.repeat(jnp.cos(sinusoid), 2, axis=-1)[:, None]

    def rotate_every_two(t):
        t1 = t[..., ::2]
        t2 = t[..., 1::2]
        return jnp.stack((-t2, t1), axis=-1).reshape(t.shape)

    def apply_rot(t):
        tr = t[..., :rotary_dim]
        tp = t[..., rotary_dim:]
        tr = tr * cos + rotate_every_two(tr) * sin
        return jnp.concatenate([tr, tp], axis=-1)

    qr, kr = apply_rot(q), apply_rot(k)

    s = jnp.einsum("bhqd,bhkd->bhqk", qr, kr) / jnp.sqrt(jnp.float32(dh))
    causal = jnp.tril(jnp.ones((S, S), dtype=bool))
    s = jnp.where(causal[None, None], s, jnp.finfo(jnp.float32).min)
    s = s + attention_mask.astype(jnp.float32)
    p = jax.nn.softmax(s, axis=-1)
    attn = jnp.einsum("bhqk,bhkd->bhqd", p, v)
    attn2 = attn.transpose(0, 2, 1, 3).reshape(B * S, D)
    attn_out = attn2 @ params["w_out"]

    h1 = ln2 @ params["w_fc_in"] + params["b_fc_in"]
    h1 = 0.5 * h1 * (1.0 + jnp.tanh(0.7978845608028654 *
                                    (h1 + 0.044715 * h1 ** 3)))
    mlp = h1 @ params["w_fc_out"] + params["b_fc_out"]

    hidden = (attn_out + mlp + x.reshape(B * S, D)).reshape(B, S, D)
    return hidden, kr, v


# ----------------------------------------------------------------------------
if __name__ == "__main__":
    # Small synthetic shapes consistent with the module's forward.
    B, S, D = 2, 16, 128
    n_head, rotary_dim = 4, 16
    inner = 4 * D
    eps = 1e-5

    key = jax.random.PRNGKey(0)
    ks = jax.random.split(key, 10)
    params = {
        "ln_g": 1.0 + 0.1 * jax.random.normal(ks[0], (1, D), jnp.float32),
        "ln_b": 0.1 * jax.random.normal(ks[1], (1, D), jnp.float32),
        "w_qkv": 0.02 * jax.random.normal(ks[2], (D, 3 * D), jnp.float32),
        "w_out": 0.02 * jax.random.normal(ks[3], (D, D), jnp.float32),
        "w_fc_in": 0.02 * jax.random.normal(ks[4], (D, inner), jnp.float32),
        "b_fc_in": 0.02 * jax.random.normal(ks[5], (1, inner), jnp.float32),
        "w_fc_out": 0.02 * jax.random.normal(ks[6], (inner, D), jnp.float32),
        "b_fc_out": 0.02 * jax.random.normal(ks[7], (1, D), jnp.float32),
    }
    hidden_states = jax.random.normal(ks[8], (B, S, D), jnp.float32)
    position_ids = jnp.broadcast_to(jnp.arange(S, dtype=jnp.int32), (B, S))
    # HF-style extended additive mask (B,1,1,S); batch 1 pads the last 2 keys.
    keep = jnp.ones((B, S), jnp.float32).at[1, -2:].set(0.0)
    attention_mask = (1.0 - keep)[:, None, None, :] * jnp.finfo(jnp.float32).min

    fwd = jax.jit(block_forward, static_argnames=("n_head", "rotary_dim", "eps"))
    hs, pk, pv = fwd(hidden_states, position_ids, attention_mask, params,
                     n_head=n_head, rotary_dim=rotary_dim, eps=eps)
    hs, pk, pv = jax.block_until_ready((hs, pk, pv))

    r_hs, r_pk, r_pv = block_reference(hidden_states, position_ids,
                                       attention_mask, params,
                                       n_head=n_head, rotary_dim=rotary_dim,
                                       eps=eps)

    dh = D // n_head
    assert hs.shape == (B, S, D) and hs.dtype == jnp.float32
    assert pk.shape == (B, n_head, S, dh) and pk.dtype == jnp.float32
    assert pv.shape == (B, n_head, S, dh) and pv.dtype == jnp.float32

    # bf16 operands / activations vs a pure-f32 reference -> loosen tolerance.
    for name, a, b in (("hidden_states", hs, r_hs),
                       ("present_k", pk, r_pk),
                       ("present_v", pv, r_pv)):
        err = float(jnp.max(jnp.abs(a - b)))
        assert jnp.allclose(a, b, atol=3e-2, rtol=3e-2), (
            f"{name} mismatch vs reference (max abs err {err})")

    print("KERNEL_OK")
</pallas_src>

<mosaic_0001>
module attributes {stable_mosaic.version = 11 : i64} {
  func.func @matmul_kernel(%arg0: i32, %arg1: i32, %arg2: i32, %arg3: memref<32x128xbf16, #tpu.memory_space<vmem>>, %arg4: memref<128x384xbf16, #tpu.memory_space<vmem>>, %arg5: memref<32x384xbf16, #tpu.memory_space<vmem>>, %arg6: memref<32x384xf32, #tpu.memory_space<vmem>>) attributes {dimension_semantics = [#tpu.dimension_semantics<parallel>, #tpu.dimension_semantics<parallel>, #tpu.dimension_semantics<arbitrary>], iteration_bounds = array<i64: 1, 1, 1>, scalar_prefetch = 0 : i64, scratch_operands = 1 : i64, tpu.core_type = #tpu.core_type<tc>, window_params = [{transform_indices = @transform_0, window_bounds = array<i64: 32, 128>}, {transform_indices = @transform_1, window_bounds = array<i64: 128, 384>}, {transform_indices = @transform_2, window_bounds = array<i64: 32, 384>}]} {
    %c0_i32 = arith.constant 0 : i32
    %0 = arith.cmpi eq, %arg2, %c0_i32 : i32
    %1 = arith.extui %0 : i1 to i32
    %c0_i32_0 = arith.constant 0 : i32
    %2 = arith.cmpi ne, %1, %c0_i32_0 : i32
    scf.if %2 {
      %cst_10 = arith.constant 0.000000e+00 : f32
      %12 = vector.broadcast %cst_10 : f32 to vector<32x384xf32>
      %c0_11 = arith.constant 0 : index
      %c0_12 = arith.constant 0 : index
      %13 = vector.load %arg6[%c0_11, %c0_12] : memref<32x384xf32, #tpu.memory_space<vmem>>, vector<32x384xf32>
      tpu.vector_store %arg6[%c0_11, %c0_12], %12 {strides = array<i32>} : memref<32x384xf32, #tpu.memory_space<vmem>>, vector<32x384xf32>,
    } else {
    }
    %c0 = arith.constant 0 : index
    %c0_1 = arith.constant 0 : index
    %3 = vector.load %arg6[%c0, %c0_1] : memref<32x384xf32, #tpu.memory_space<vmem>>, vector<32x384xf32>
    %c0_2 = arith.constant 0 : index
    %c0_3 = arith.constant 0 : index
    %4 = vector.load %arg3[%c0_2, %c0_3] : memref<32x128xbf16, #tpu.memory_space<vmem>>, vector<32x128xbf16>
    %c0_4 = arith.constant 0 : index
    %c0_5 = arith.constant 0 : index
    %5 = vector.load %arg4[%c0_4, %c0_5] : memref<128x384xbf16, #tpu.memory_space<vmem>>, vector<128x384xbf16>
    %cst = arith.constant dense<0.000000e+00> : vector<32x384xf32>
    %6 = tpu.matmul %4, %5, %cst {dimension_numbers = #tpu.dot_dimension_numbers<[1], [0], [0], [1], [0, 0, 1, 1], [], []>} : vector<32x128xbf16>, vector<128x384xbf16>, vector<32x384xf32> -> vector<32x384xf32>
    %7 = arith.addf %3, %6 : vector<32x384xf32>
    %c0_6 = arith.constant 0 : index
    %c0_7 = arith.constant 0 : index
    %8 = vector.load %arg6[%c0_6, %c0_7] : memref<32x384xf32, #tpu.memory_space<vmem>>, vector<32x384xf32>
    tpu.vector_store %arg6[%c0_6, %c0_7], %7 {strides = array<i32>} : memref<32x384xf32, #tpu.memory_space<vmem>>, vector<32x384xf32>,
    %c0_i32_8 = arith.constant 0 : i32
    %9 = arith.cmpi eq, %arg2, %c0_i32_8 : i32
    %10 = arith.extui %9 : i1 to i32
    %c0_i32_9 = arith.constant 0 : i32
    %11 = arith.cmpi ne, %10, %c0_i32_9 : i32
    scf.if %11 {
      %c0_10 = arith.constant 0 : index
      %c0_11 = arith.constant 0 : index
      %12 = vector.load %arg6[%c0_10, %c0_11] : memref<32x384xf32, #tpu.memory_space<vmem>>, vector<32x384xf32>
      %13 = arith.truncf %12 : vector<32x384xf32> to vector<32x384xbf16>
      %c0_12 = arith.constant 0 : index
      %c0_13 = arith.constant 0 : index
      %14 = vector.load %arg5[%c0_12, %c0_13] : memref<32x384xbf16, #tpu.memory_space<vmem>>, vector<32x384xbf16>
      tpu.vector_store %arg5[%c0_12, %c0_13], %13 {strides = array<i32>} : memref<32x384xbf16, #tpu.memory_space<vmem>>, vector<32x384xbf16>,
    } else {
    }
    return
  }
  func.func @transform_0(%arg0: i32, %arg1: i32, %arg2: i32) -> (i32, i32) {
    %c0_i32 = arith.constant 0 : i32
    return %arg0, %arg2 : i32, i32
  }
  func.func @transform_1(%arg0: i32, %arg1: i32, %arg2: i32) -> (i32, i32) {
    %c0_i32 = arith.constant 0 : i32
    return %arg2, %arg1 : i32, i32
  }
  func.func @transform_2(%arg0: i32, %arg1: i32, %arg2: i32) -> (i32, i32) {
    %c0_i32 = arith.constant 0 : i32
    return %arg0, %arg1 : i32, i32
  }
}

module attributes {stable_mosaic.version = 11 : i64} {
  func.func @layernorm_kernel(%arg0: i32, %arg1: memref<32x128xf32, #tpu.memory_space<vmem>>, %arg2: memref<1x128xf32, #tpu.memory_space<vmem>>, %arg3: memref<1x128xf32, #tpu.memory_space<vmem>>, %arg4: memref<32x128xbf16, #tpu.memory_space<vmem>>) attributes {dimension_semantics = [#tpu.dimension_semantics<parallel>], iteration_bounds = array<i64: 1>, scalar_prefetch = 0 : i64, scratch_operands = 0 : i64, tpu.core_type = #tpu.core_type<tc>, window_params = [{transform_indices = @transform_0, window_bounds = array<i64: 32, 128>}, {pipeline_mode = #tpu.pipeline_mode<synchronous>, transform_indices = @transform_1, window_bounds = array<i64: 1, 128>}, {pipeline_mode = #tpu.pipeline_mode<synchronous>, transform_indices = @transform_2, window_bounds = array<i64: 1, 128>}, {transform_indices = @transform_3, window_bounds = array<i64: 32, 128>}]} {
    %c0 = arith.constant 0 : index
    %c0_0 = arith.constant 0 : index
    %0 = vector.load %arg1[%c0, %c0_0] : memref<32x128xf32, #tpu.memory_space<vmem>>, vector<32x128xf32>
    %cst = arith.constant dense<0.000000e+00> : vector<32xf32>
    %1 = vector.multi_reduction <add>, %0, %cst [1] : vector<32x128xf32> to vector<32xf32>
    %2 = vector.shape_cast %1 : vector<32xf32> to vector<32x1xf32>
    %cst_1 = arith.constant 1.280000e+02 : f32
    %3 = vector.broadcast %cst_1 : f32 to vector<32x1xf32>
    %4 = arith.divf %2, %3 : vector<32x1xf32>
    %5 = vector.broadcast %4 : vector<32x1xf32> to vector<32x128xf32>
    %6 = arith.subf %0, %5 : vector<32x128xf32>
    %7 = arith.mulf %6, %6 : vector<32x128xf32>
    %cst_2 = arith.constant dense<0.000000e+00> : vector<32xf32>
    %8 = vector.multi_reduction <add>, %7, %cst_2 [1] : vector<32x128xf32> to vector<32xf32>
    %9 = vector.shape_cast %8 : vector<32xf32> to vector<32x1xf32>
    %cst_3 = arith.constant 1.280000e+02 : f32
    %10 = vector.broadcast %cst_3 : f32 to vector<32x1xf32>
    %11 = arith.divf %9, %10 : vector<32x1xf32>
    %cst_4 = arith.constant 9.99999974E-6 : f32
    %12 = vector.broadcast %cst_4 : f32 to vector<32x1xf32>
    %13 = arith.addf %11, %12 : vector<32x1xf32>
    %14 = math.rsqrt %13 : vector<32x1xf32>
    %15 = vector.broadcast %14 : vector<32x1xf32> to vector<32x128xf32>
    %16 = arith.mulf %6, %15 : vector<32x128xf32>
    %c0_5 = arith.constant 0 : index
    %c0_6 = arith.constant 0 : index
    %17 = vector.load %arg2[%c0_5, %c0_6] : memref<1x128xf32, #tpu.memory_space<vmem>>, vector<1x128xf32>
    %18 = vector.broadcast %17 : vector<1x128xf32> to vector<32x128xf32>
    %19 = arith.mulf %16, %18 : vector<32x128xf32>
    %c0_7 = arith.constant 0 : index
    %c0_8 = arith.constant 0 : index
    %20 = vector.load %arg3[%c0_7, %c0_8] : memref<1x128xf32, #tpu.memory_space<vmem>>, vector<1x128xf32>
    %21 = vector.broadcast %20 : vector<1x128xf32> to vector<32x128xf32>
    %22 = arith.addf %19, %21 : vector<32x128xf32>
    %23 = arith.truncf %22 : vector<32x128xf32> to vector<32x128xbf16>
    %c0_9 = arith.constant 0 : index
    %c0_10 = arith.constant 0 : index
    %24 = vector.load %arg4[%c0_9, %c0_10] : memref<32x128xbf16, #tpu.memory_space<vmem>>, vector<32x128xbf16>
    tpu.vector_store %arg4[%c0_9, %c0_10], %23 {strides = array<i32>} : memref<32x128xbf16, #tpu.memory_space<vmem>>, vector<32x128xbf16>,
    return
  }
  func.func @transform_0(%arg0: i32) -> (i32, i32) {
    %c0_i32 = arith.constant 0 : i32
    %c0_i32_0 = arith.constant 0 : i32
    return %arg0, %c0_i32 : i32, i32
  }
  func.func @transform_1(%arg0: i32) -> (i32, i32) {
    %c0_i32 = arith.constant 0 : i32
    %c0_i32_0 = arith.constant 0 : i32
    %c0_i32_1 = arith.constant 0 : i32
    return %c0_i32, %c0_i32_0 : i32, i32
  }
  func.func @transform_2(%arg0: i32) -> (i32, i32) {
    %c0_i32 = arith.constant 0 : i32
    %c0_i32_0 = arith.constant 0 : i32
    %c0_i32_1 = arith.constant 0 : i32
    return %c0_i32, %c0_i32_0 : i32, i32
  }
  func.func @transform_3(%arg0: i32) -> (i32, i32) {
    %c0_i32 = arith.constant 0 : i32
    %c0_i32_0 = arith.constant 0 : i32
    return %arg0, %c0_i32 : i32, i32
  }
}

module attributes {stable_mosaic.version = 11 : i64} {
  func.func @flash_attention_kernel(%arg0: i32, %arg1: i32, %arg2: i32, %arg3: i32, %arg4: memref<1x1x16x32xbf16, #tpu.memory_space<vmem>>, %arg5: memref<1x1x16x32xbf16, #tpu.memory_space<vmem>>, %arg6: memref<1x1x16x32xbf16, #tpu.memory_space<vmem>>, %arg7: memref<1x1x1x16xf32, #tpu.memory_space<vmem>>, %arg8: memref<1x1x16x32xbf16, #tpu.memory_space<vmem>>, %arg9: memref<16x1xf32, #tpu.memory_space<vmem>>, %arg10: memref<16x1xf32, #tpu.memory_space<vmem>>, %arg11: memref<16x32xf32, #tpu.memory_space<vmem>>) attributes {dimension_semantics = [#tpu.dimension_semantics<parallel>, #tpu.dimension_semantics<parallel>, #tpu.dimension_semantics<parallel>, #tpu.dimension_semantics<arbitrary>], iteration_bounds = array<i64: 2, 4, 1, 1>, scalar_prefetch = 0 : i64, scratch_operands = 3 : i64, tpu.core_type = #tpu.core_type<tc>, window_params = [{transform_indices = @transform_0, window_bounds = array<i64: 1, 1, 16, 32>}, {transform_indices = @transform_1, window_bounds = array<i64: 1, 1, 16, 32>}, {transform_indices = @transform_2, window_bounds = array<i64: 1, 1, 16, 32>}, {transform_indices = @transform_3, window_bounds = array<i64: 1, 1, 1, 16>}, {transform_indices = @transform_4, window_bounds = array<i64: 1, 1, 16, 32>}]} {
    %c0_i32 = arith.constant 0 : i32
    %0 = arith.cmpi eq, %arg3, %c0_i32 : i32
    %1 = arith.extui %0 : i1 to i32
    %c0_i32_0 = arith.constant 0 : i32
    %2 = arith.cmpi ne, %1, %c0_i32_0 : i32
    scf.if %2 {
      %cst = arith.constant 0xFF800000 : f32
      %12 = vector.broadcast %cst : f32 to vector<16x1xf32>
      %c0 = arith.constant 0 : index
      %c0_5 = arith.constant 0 : index
      %13 = vector.load %arg9[%c0, %c0_5] : memref<16x1xf32, #tpu.memory_space<vmem>>, vector<16x1xf32>
      tpu.vector_store %arg9[%c0, %c0_5], %12 {strides = array<i32>} : memref<16x1xf32, #tpu.memory_space<vmem>>, vector<16x1xf32>,
      %cst_6 = arith.constant 0.000000e+00 : f32
      %14 = vector.broadcast %cst_6 : f32 to vector<16x1xf32>
      %c0_7 = arith.constant 0 : index
      %c0_8 = arith.constant 0 : index
      %15 = vector.load %arg10[%c0_7, %c0_8] : memref<16x1xf32, #tpu.memory_space<vmem>>, vector<16x1xf32>
      tpu.vector_store %arg10[%c0_7, %c0_8], %14 {strides = array<i32>} : memref<16x1xf32, #tpu.memory_space<vmem>>, vector<16x1xf32>,
      %cst_9 = arith.constant 0.000000e+00 : f32
      %16 = vector.broadcast %cst_9 : f32 to vector<16x32xf32>
      %c0_10 = arith.constant 0 : index
      %c0_11 = arith.constant 0 : index
      %17 = vector.load %arg11[%c0_10, %c0_11] : memref<16x32xf32, #tpu.memory_space<vmem>>, vector<16x32xf32>
      tpu.vector_store %arg11[%c0_10, %c0_11], %16 {strides = array<i32>} : memref<16x32xf32, #tpu.memory_space<vmem>>, vector<16x32xf32>,
    } else {
    }
    %c16_i32 = arith.constant 16 : i32
    %3 = arith.muli %arg3, %c16_i32 : i32
    %c1_i32 = arith.constant 1 : i32
    %4 = arith.addi %arg2, %c1_i32 : i32
    %c16_i32_1 = arith.constant 16 : i32
    %5 = arith.muli %4, %c16_i32_1 : i32
    %6 = arith.cmpi slt, %3, %5 : i32
    %7 = arith.extui %6 : i1 to i32
    %c0_i32_2 = arith.constant 0 : i32
    %8 = arith.cmpi ne, %7, %c0_i32_2 : i32
    scf.if %8 {
      %c0 = arith.constant 0 : index
      %c0_5 = arith.constant 0 : index
      %c0_6 = arith.constant 0 : index
      %c0_7 = arith.constant 0 : index
      %12 = vector.load %arg4[%c0, %c0_5, %c0_6, %c0_7] : memref<1x1x16x32xbf16, #tpu.memory_space<vmem>>, vector<1x1x16x32xbf16>
      %13 = vector.shape_cast %12 : vector<1x1x16x32xbf16> to vector<16x32xbf16>
      %c0_8 = arith.constant 0 : index
      %c0_9 = arith.constant 0 : index
      %c0_10 = arith.constant 0 : index
      %c0_11 = arith.constant 0 : index
      %14 = vector.load %arg5[%c0_8, %c0_9, %c0_10, %c0_11] : memref<1x1x16x32xbf16, #tpu.memory_space<vmem>>, vector<1x1x16x32xbf16>
      %15 = vector.shape_cast %14 : vector<1x1x16x32xbf16> to vector<16x32xbf16>
      %cst = arith.constant dense<0.000000e+00> : vector<16x16xf32>
      %16 = tpu.matmul %13, %15, %cst {dimension_numbers = #tpu.dot_dimension_numbers<[1], [1], [0], [0], [0, 0, 1, 0], [], []>} : vector<16x32xbf16>, vector<16x32xbf16>, vector<16x16xf32> -> vector<16x16xf32>
      %c16_i32_12 = arith.constant 16 : i32
      %17 = arith.muli %arg2, %c16_i32_12 : i32
      %18 = tpu.iota {dimensions = array<i32: 0>} : vector<16x16xi32>
      %19 = vector.broadcast %17 : i32 to vector<16x16xi32>
      %20 = arith.addi %19, %18 : vector<16x16xi32>
      %c16_i32_13 = arith.constant 16 : i32
      %21 = arith.muli %arg3, %c16_i32_13 : i32
      %22 = tpu.iota {dimensions = array<i32: 1>} : vector<16x16xi32>
      %23 = vector.broadcast %21 : i32 to vector<16x16xi32>
      %24 = arith.addi %23, %22 : vector<16x16xi32>
      %25 = arith.cmpi sge, %20, %24 : vector<16x16xi32>
      %cst_14 = arith.constant -1.000000e+30 : f32
      %26 = vector.broadcast %cst_14 : f32 to vector<16x16xf32>
      %27 = arith.select %25, %16, %26 : vector<16x16xi1>, vector<16x16xf32>
      %c0_15 = arith.constant 0 : index
      %c0_16 = arith.constant 0 : index
      %c0_17 = arith.constant 0 : index
      %c0_18 = arith.constant 0 : index
      %28 = vector.load %arg7[%c0_15, %c0_16, %c0_17, %c0_18] : memref<1x1x1x16xf32, #tpu.memory_space<vmem>>, vector<1x1x1x16xf32>
      %29 = vector.shape_cast %28 : vector<1x1x1x16xf32> to vector<1x16xf32>
      %30 = vector.broadcast %29 : vector<1x16xf32> to vector<16x16xf32>
      %31 = arith.addf %27, %30 : vector<16x16xf32>
      %c0_19 = arith.constant 0 : index
      %c0_20 = arith.constant 0 : index
      %32 = vector.load %arg9[%c0_19, %c0_20] : memref<16x1xf32, #tpu.memory_space<vmem>>, vector<16x1xf32>
      %cst_21 = arith.constant dense<0xFF800000> : vector<16xf32>
      %33 = vector.multi_reduction <maximumf>, %31, %cst_21 [1] : vector<16x16xf32> to vector<16xf32>
      %34 = vector.shape_cast %33 : vector<16xf32> to vector<16x1xf32>
      %35 = arith.maximumf %32, %34 : vector<16x1xf32>
      %36 = arith.subf %32, %35 : vector<16x1xf32>
      %37 = math.exp %36 : vector<16x1xf32>
      %38 = vector.broadcast %35 : vector<16x1xf32> to vector<16x16xf32>
      %39 = arith.subf %31, %38 : vector<16x16xf32>
      %40 = math.exp %39 : vector<16x16xf32>
      %c0_22 = arith.constant 0 : index
      %c0_23 = arith.constant 0 : index
      %41 = vector.load %arg10[%c0_22, %c0_23] : memref<16x1xf32, #tpu.memory_space<vmem>>, vector<16x1xf32>
      %42 = arith.mulf %37, %41 : vector<16x1xf32>
      %cst_24 = arith.constant dense<0.000000e+00> : vector<16xf32>
      %43 = vector.multi_reduction <add>, %40, %cst_24 [1] : vector<16x16xf32> to vector<16xf32>
      %44 = vector.shape_cast %43 : vector<16xf32> to vector<16x1xf32>
      %45 = arith.addf %42, %44 : vector<16x1xf32>
      %c0_25 = arith.constant 0 : index
      %c0_26 = arith.constant 0 : index
      %46 = vector.load %arg10[%c0_25, %c0_26] : memref<16x1xf32, #tpu.memory_space<vmem>>, vector<16x1xf32>
      tpu.vector_store %arg10[%c0_25, %c0_26], %45 {strides = array<i32>} : memref<16x1xf32, #tpu.memory_space<vmem>>, vector<16x1xf32>,
      %c0_27 = arith.constant 0 : index
      %c0_28 = arith.constant 0 : index
      %47 = vector.load %arg11[%c0_27, %c0_28] : memref<16x32xf32, #tpu.memory_space<vmem>>, vector<16x32xf32>
      %48 = vector.broadcast %37 : vector<16x1xf32> to vector<16x32xf32>
      %49 = arith.mulf %48, %47 : vector<16x32xf32>
      %50 = arith.truncf %40 : vector<16x16xf32> to vector<16x16xbf16>
      %c0_29 = arith.constant 0 : index
      %c0_30 = arith.constant 0 : index
      %c0_31 = arith.constant 0 : index
      %c0_32 = arith.constant 0 : index
      %51 = vector.load %arg6[%c0_29, %c0_30, %c0_31, %c0_32] : memref<1x1x16x32xbf16, #tpu.memory_space<vmem>>, vector<1x1x16x32xbf16>
      %52 = vector.shape_cast %51 : vector<1x1x16x32xbf16> to vector<16x32xbf16>
      %cst_33 = arith.constant dense<0.000000e+00> : vector<16x32xf32>
      %53 = tpu.matmul %50, %52, %cst_33 {dimension_numbers = #tpu.dot_dimension_numbers<[1], [0], [0], [1], [0, 0, 1, 1], [], []>} : vector<16x16xbf16>, vector<16x32xbf16>, vector<16x32xf32> -> vector<16x32xf32>
      %54 = arith.addf %49, %53 : vector<16x32xf32>
      %c0_34 = arith.constant 0 : index
      %c0_35 = arith.constant 0 : index
      %55 = vector.load %arg11[%c0_34, %c0_35] : memref<16x32xf32, #tpu.memory_space<vmem>>, vector<16x32xf32>
      tpu.vector_store %arg11[%c0_34, %c0_35], %54 {strides = array<i32>} : memref<16x32xf32, #tpu.memory_space<vmem>>, vector<16x32xf32>,
      %c0_36 = arith.constant 0 : index
      %c0_37 = arith.constant 0 : index
      %56 = vector.load %arg9[%c0_36, %c0_37] : memref<16x1xf32, #tpu.memory_space<vmem>>, vector<16x1xf32>
      tpu.vector_store %arg9[%c0_36, %c0_37], %35 {strides = array<i32>} : memref<16x1xf32, #tpu.memory_space<vmem>>, vector<16x1xf32>,
    } else {
    }
    %c0_i32_3 = arith.constant 0 : i32
    %9 = arith.cmpi eq, %arg3, %c0_i32_3 : i32
    %10 = arith.extui %9 : i1 to i32
    %c0_i32_4 = arith.constant 0 : i32
    %11 = arith.cmpi ne, %10, %c0_i32_4 : i32
    scf.if %11 {
      %c0 = arith.constant 0 : index
      %c0_5 = arith.constant 0 : index
      %12 = vector.load %arg11[%c0, %c0_5] : memref<16x32xf32, #tpu.memory_space<vmem>>, vector<16x32xf32>
      %c0_6 = arith.constant 0 : index
      %c0_7 = arith.constant 0 : index
      %13 = vector.load %arg10[%c0_6, %c0_7] : memref<16x1xf32, #tpu.memory_space<vmem>>, vector<16x1xf32>
      %14 = tpu.reciprocal %13 {approx = true} : vector<16x1xf32> -> vector<16x1xf32>
      %15 = vector.broadcast %14 : vector<16x1xf32> to vector<16x32xf32>
      %16 = arith.mulf %12, %15 : vector<16x32xf32>
      %17 = arith.truncf %16 : vector<16x32xf32> to vector<16x32xbf16>
      %c0_8 = arith.constant 0 : index
      %c0_9 = arith.constant 0 : index
      %c0_10 = arith.constant 0 : index
      %c0_11 = arith.constant 0 : index
      %18 = vector.load %arg8[%c0_8, %c0_9, %c0_10, %c0_11] : memref<1x1x16x32xbf16, #tpu.memory_space<vmem>>, vector<1x1x16x32xbf16>
      %19 = vector.shape_cast %18 : vector<1x1x16x32xbf16> to vector<16x32xbf16>
      %20 = vector.shape_cast %17 : vector<16x32xbf16> to vector<1x1x16x32xbf16>
      tpu.vector_store %arg8[%c0_8, %c0_9, %c0_10, %c0_11], %20 {strides = array<i32>} : memref<1x1x16x32xbf16, #tpu.memory_space<vmem>>, vector<1x1x16x32xbf16>,
    } else {
    }
    return
  }
  func.func @transform_0(%arg0: i32, %arg1: i32, %arg2: i32, %arg3: i32) -> (i32, i32, i32, i32) {
    %c0_i32 = arith.constant 0 : i32
    %c0_i32_0 = arith.constant 0 : i32
    return %arg0, %arg1, %arg2, %c0_i32 : i32, i32, i32, i32
  }
  func.func @transform_1(%arg0: i32, %arg1: i32, %arg2: i32, %arg3: i32) -> (i32, i32, i32, i32) {
    %c0_i32 = arith.constant 0 : i32
    %c0_i32_0 = arith.constant 0 : i32
    return %arg0, %arg1, %arg3, %c0_i32 : i32, i32, i32, i32
  }
  func.func @transform_2(%arg0: i32, %arg1: i32, %arg2: i32, %arg3: i32) -> (i32, i32, i32, i32) {
    %c0_i32 = arith.constant 0 : i32
    %c0_i32_0 = arith.constant 0 : i32
    return %arg0, %arg1, %arg3, %c0_i32 : i32, i32, i32, i32
  }
  func.func @transform_3(%arg0: i32, %arg1: i32, %arg2: i32, %arg3: i32) -> (i32, i32, i32, i32) {
    %c0_i32 = arith.constant 0 : i32
    %c0_i32_0 = arith.constant 0 : i32
    %c0_i32_1 = arith.constant 0 : i32
    return %arg0, %c0_i32, %c0_i32_0, %arg3 : i32, i32, i32, i32
  }
  func.func @transform_4(%arg0: i32, %arg1: i32, %arg2: i32, %arg3: i32) -> (i32, i32, i32, i32) {
    %c0_i32 = arith.constant 0 : i32
    %c0_i32_0 = arith.constant 0 : i32
    return %arg0, %arg1, %arg2, %c0_i32 : i32, i32, i32, i32
  }
}

module attributes {stable_mosaic.version = 11 : i64} {
  func.func @rotary_split_kernel(%arg0: i32, %arg1: i32, %arg2: memref<1x16x384xbf16, #tpu.memory_space<vmem>>, %arg3: memref<1x16x16xf32, #tpu.memory_space<vmem>>, %arg4: memref<1x16x16xf32, #tpu.memory_space<vmem>>, %arg5: memref<1x4x16x32xbf16, #tpu.memory_space<vmem>>, %arg6: memref<1x4x16x32xbf16, #tpu.memory_space<vmem>>, %arg7: memref<1x4x16x32xbf16, #tpu.memory_space<vmem>>, %arg8: memref<1x4x16x32xf32, #tpu.memory_space<vmem>>, %arg9: memref<1x4x16x32xf32, #tpu.memory_space<vmem>>) attributes {dimension_semantics = [#tpu.dimension_semantics<parallel>, #tpu.dimension_semantics<parallel>], iteration_bounds = array<i64: 2, 1>, scalar_prefetch = 0 : i64, scratch_operands = 0 : i64, tpu.core_type = #tpu.core_type<tc>, window_params = [{transform_indices = @transform_0, window_bounds = array<i64: 1, 16, 384>}, {transform_indices = @transform_1, window_bounds = array<i64: 1, 16, 16>}, {transform_indices = @transform_2, window_bounds = array<i64: 1, 16, 16>}, {transform_indices = @transform_3, window_bounds = array<i64: 1, 4, 16, 32>}, {transform_indices = @transform_4, window_bounds = array<i64: 1, 4, 16, 32>}, {transform_indices = @transform_5, window_bounds = array<i64: 1, 4, 16, 32>}, {transform_indices = @transform_6, window_bounds = array<i64: 1, 4, 16, 32>}, {transform_indices = @transform_7, window_bounds = array<i64: 1, 4, 16, 32>}]} {
    %c0 = arith.constant 0 : index
    %c0_0 = arith.constant 0 : index
    %c0_1 = arith.constant 0 : index
    %0 = vector.load %arg3[%c0, %c0_0, %c0_1] : memref<1x16x16xf32, #tpu.memory_space<vmem>>, vector<1x16x16xf32>
    %1 = vector.shape_cast %0 : vector<1x16x16xf32> to vector<16x16xf32>
    %c0_2 = arith.constant 0 : index
    %c0_3 = arith.constant 0 : index
    %c0_4 = arith.constant 0 : index
    %2 = vector.load %arg4[%c0_2, %c0_3, %c0_4] : memref<1x16x16xf32, #tpu.memory_space<vmem>>, vector<1x16x16xf32>
    %3 = vector.shape_cast %2 : vector<1x16x16xf32> to vector<16x16xf32>
    %4 = tpu.iota {dimensions = array<i32: 0>} : vector<16x16xi32>
    %5 = tpu.iota {dimensions = array<i32: 1>} : vector<16x16xi32>
    %c1_i32 = arith.constant 1 : i32
    %6 = vector.broadcast %c1_i32 : i32 to vector<16x16xi32>
    %7 = arith.subi %4, %6 : vector<16x16xi32>
    %8 = arith.cmpi eq, %5, %7 : vector<16x16xi32>
    %c2_i32 = arith.constant 2 : i32
    %c0_i32 = arith.constant 0 : i32
    %9 = arith.cmpi eq, %c2_i32, %c0_i32 : i32
    %c1_i32_5 = arith.constant 1 : i32
    %10 = arith.select %9, %c1_i32_5, %c2_i32 : i32
    %11 = vector.broadcast %10 : i32 to vector<16x16xi32>
    %12 = arith.remsi %4, %11 : vector<16x16xi32>
    %c0_i32_6 = arith.constant 0 : i32
    %13 = vector.broadcast %c0_i32_6 : i32 to vector<16x16xi32>
    %14 = arith.cmpi ne, %12, %13 : vector<16x16xi32>
    %c0_i32_7 = arith.constant 0 : i32
    %15 = vector.broadcast %c0_i32_7 : i32 to vector<16x16xi32>
    %16 = arith.cmpi slt, %12, %15 : vector<16x16xi32>
    %c0_i32_8 = arith.constant 0 : i32
    %17 = arith.cmpi slt, %10, %c0_i32_8 : i32
    %18 = vector.broadcast %17 : i1 to vector<16x16xi1>
    %19 = vector.broadcast %18 : vector<16x16xi1> to vector<16x16xi1>
    %20 = arith.xori %16, %19 : vector<16x16xi1>
    %21 = arith.andi %20, %14 : vector<16x16xi1>
    %22 = vector.broadcast %10 : i32 to vector<16x16xi32>
    %23 = arith.addi %12, %22 : vector<16x16xi32>
    %24 = arith.select %21, %23, %12 : vector<16x16xi1>, vector<16x16xi32>
    %c1_i32_9 = arith.constant 1 : i32
    %25 = vector.broadcast %c1_i32_9 : i32 to vector<16x16xi32>
    %26 = arith.cmpi eq, %24, %25 : vector<16x16xi32>
    %27 = arith.andi %8, %26 : vector<16x16xi1>
    %c1_i32_10 = arith.constant 1 : i32
    %28 = vector.broadcast %c1_i32_10 : i32 to vector<16x16xi32>
    %29 = arith.addi %4, %28 : vector<16x16xi32>
    %30 = arith.cmpi eq, %5, %29 : vector<16x16xi32>
    %c2_i32_11 = arith.constant 2 : i32
    %c0_i32_12 = arith.constant 0 : i32
    %31 = arith.cmpi eq, %c2_i32_11, %c0_i32_12 : i32
    %c1_i32_13 = arith.constant 1 : i32
    %32 = arith.select %31, %c1_i32_13, %c2_i32_11 : i32
    %33 = vector.broadcast %32 : i32 to vector<16x16xi32>
    %34 = arith.remsi %4, %33 : vector<16x16xi32>
    %c0_i32_14 = arith.constant 0 : i32
    %35 = vector.broadcast %c0_i32_14 : i32 to vector<16x16xi32>
    %36 = arith.cmpi ne, %34, %35 : vector<16x16xi32>
    %c0_i32_15 = arith.constant 0 : i32
    %37 = vector.broadcast %c0_i32_15 : i32 to vector<16x16xi32>
    %38 = arith.cmpi slt, %34, %37 : vector<16x16xi32>
    %c0_i32_16 = arith.constant 0 : i32
    %39 = arith.cmpi slt, %32, %c0_i32_16 : i32
    %40 = vector.broadcast %39 : i1 to vector<16x16xi1>
    %41 = vector.broadcast %40 : vector<16x16xi1> to vector<16x16xi1>
    %42 = arith.xori %38, %41 : vector<16x16xi1>
    %43 = arith.andi %42, %36 : vector<16x16xi1>
    %44 = vector.broadcast %32 : i32 to vector<16x16xi32>
    %45 = arith.addi %34, %44 : vector<16x16xi32>
    %46 = arith.select %43, %45, %34 : vector<16x16xi1>, vector<16x16xi32>
    %c0_i32_17 = arith.constant 0 : i32
    %47 = vector.broadcast %c0_i32_17 : i32 to vector<16x16xi32>
    %48 = arith.cmpi eq, %46, %47 : vector<16x16xi32>
    %49 = arith.andi %30, %48 : vector<16x16xi1>
    %cst = arith.constant 1.000000e+00 : f32
    %cst_18 = arith.constant 0.000000e+00 : f32
    %50 = vector.broadcast %cst : f32 to vector<16x16xf32>
    %51 = vector.broadcast %cst_18 : f32 to vector<16x16xf32>
    %52 = arith.select %49, %50, %51 : vector<16x16xi1>, vector<16x16xf32>
    %cst_19 = arith.constant -1.000000e+00 : f32
    %53 = vector.broadcast %cst_19 : f32 to vector<16x16xf32>
    %54 = arith.select %27, %53, %52 : vector<16x16xi1>, vector<16x16xf32>
    %c0_20 = arith.constant 0 : index
    %c0_21 = arith.constant 0 : index
    %c0_22 = arith.constant 0 : index
    %55 = vector.load %arg2[%c0_20, %c0_21, %c0_22] : memref<1x16x384xbf16, #tpu.memory_space<vmem>>, vector<1x16x32xbf16>
    %56 = vector.shape_cast %55 : vector<1x16x32xbf16> to vector<16x32xbf16>
    %57 = arith.extf %56 : vector<16x32xbf16> to vector<16x32xf32>
    %c0_23 = arith.constant 0 : index
    %c0_24 = arith.constant 0 : index
    %c128 = arith.constant 128 : index
    %58 = vector.load %arg2[%c0_23, %c0_24, %c128] : memref<1x16x384xbf16, #tpu.memory_space<vmem>>, vector<1x16x32xbf16>
    %59 = vector.shape_cast %58 : vector<1x16x32xbf16> to vector<16x32xbf16>
    %60 = arith.extf %59 : vector<16x32xbf16> to vector<16x32xf32>
    %c0_25 = arith.constant 0 : index
    %c0_26 = arith.constant 0 : index
    %c256 = arith.constant 256 : index
    %61 = vector.load %arg2[%c0_25, %c0_26, %c256] : memref<1x16x384xbf16, #tpu.memory_space<vmem>>, vector<1x16x32xbf16>
    %62 = vector.shape_cast %61 : vector<1x16x32xbf16> to vector<16x32xbf16>
    %63 = arith.extf %62 : vector<16x32xbf16> to vector<16x32xf32>
    %64 = vector.extract_strided_slice %57 {offsets = [0, 0], sizes = [16, 16], strides = [1, 1]} : vector<16x32xf32> to vector<16x16xf32>
    %65 = arith.mulf %64, %3 : vector<16x16xf32>
    %cst_27 = arith.constant dense<0.000000e+00> : vector<16x16xf32>
    %66 = tpu.matmul %64, %54, %cst_27 {dimension_numbers = #tpu.dot_dimension_numbers<[1], [0], [0], [1], [0, 0, 1, 1], [], []>} : vector<16x16xf32>, vector<16x16xf32>, vector<16x16xf32> -> vector<16x16xf32>
    %67 = arith.mulf %66, %1 : vector<16x16xf32>
    %68 = arith.addf %65, %67 : vector<16x16xf32>
    %69 = vector.extract_strided_slice %57 {offsets = [0, 16], sizes = [16, 16], strides = [1, 1]} : vector<16x32xf32> to vector<16x16xf32>
    %70 = tpu.concatenate %68, %69 in 1 : vector<16x16xf32>, vector<16x16xf32> -> vector<16x32xf32>
    %cst_28 = arith.constant 0.176776692 : f32
    %71 = vector.broadcast %cst_28 : f32 to vector<16x32xf32>
    %72 = arith.mulf %70, %71 : vector<16x32xf32>
    %73 = vector.extract_strided_slice %60 {offsets = [0, 0], sizes = [16, 16], strides = [1, 1]} : vector<16x32xf32> to vector<16x16xf32>
    %74 = arith.mulf %73, %3 : vector<16x16xf32>
    %cst_29 = arith.constant dense<0.000000e+00> : vector<16x16xf32>
    %75 = tpu.matmul %73, %54, %cst_29 {dimension_numbers = #tpu.dot_dimension_numbers<[1], [0], [0], [1], [0, 0, 1, 1], [], []>} : vector<16x16xf32>, vector<16x16xf32>, vector<16x16xf32> -> vector<16x16xf32>
    %76 = arith.mulf %75, %1 : vector<16x16xf32>
    %77 = arith.addf %74, %76 : vector<16x16xf32>
    %78 = vector.extract_strided_slice %60 {offsets = [0, 16], sizes = [16, 16], strides = [1, 1]} : vector<16x32xf32> to vector<16x16xf32>
    %79 = tpu.concatenate %77, %78 in 1 : vector<16x16xf32>, vector<16x16xf32> -> vector<16x32xf32>
    %80 = arith.truncf %72 : vector<16x32xf32> to vector<16x32xbf16>
    %c0_30 = arith.constant 0 : index
    %c0_31 = arith.constant 0 : index
    %c0_32 = arith.constant 0 : index
    %c0_33 = arith.constant 0 : index
    %81 = vector.load %arg5[%c0_30, %c0_31, %c0_32, %c0_33] : memref<1x4x16x32xbf16, #tpu.memory_space<vmem>>, vector<1x1x16x32xbf16>
    %82 = vector.shape_cast %81 : vector<1x1x16x32xbf16> to vector<16x32xbf16>
    %83 = vector.shape_cast %80 : vector<16x32xbf16> to vector<1x1x16x32xbf16>
    tpu.vector_store %arg5[%c0_30, %c0_31, %c0_32, %c0_33], %83 {strides = array<i32>} : memref<1x4x16x32xbf16, #tpu.memory_space<vmem>>, vector<1x1x16x32xbf16>,
    %84 = arith.truncf %79 : vector<16x32xf32> to vector<16x32xbf16>
    %c0_34 = arith.constant 0 : index
    %c0_35 = arith.constant 0 : index
    %c0_36 = arith.constant 0 : index
    %c0_37 = arith.constant 0 : index
    %85 = vector.load %arg6[%c0_34, %c0_35, %c0_36, %c0_37] : memref<1x4x16x32xbf16, #tpu.memory_space<vmem>>, vector<1x1x16x32xbf16>
    %86 = vector.shape_cast %85 : vector<1x1x16x32xbf16> to vector<16x32xbf16>
    %87 = vector.shape_cast %84 : vector<16x32xbf16> to vector<1x1x16x32xbf16>
    tpu.vector_store %arg6[%c0_34, %c0_35, %c0_36, %c0_37], %87 {strides = array<i32>} : memref<1x4x16x32xbf16, #tpu.memory_space<vmem>>, vector<1x1x16x32xbf16>,
    %88 = arith.truncf %63 : vector<16x32xf32> to vector<16x32xbf16>
    %c0_38 = arith.constant 0 : index
    %c0_39 = arith.constant 0 : index
    %c0_40 = arith.constant 0 : index
    %c0_41 = arith.constant 0 : index
    %89 = vector.load %arg7[%c0_38, %c0_39, %c0_40, %c0_41] : memref<1x4x16x32xbf16, #tpu.memory_space<vmem>>, vector<1x1x16x32xbf16>
    %90 = vector.shape_cast %89 : vector<1x1x16x32xbf16> to vector<16x32xbf16>
    %91 = vector.shape_cast %88 : vector<16x32xbf16> to vector<1x1x16x32xbf16>
    tpu.vector_store %arg7[%c0_38, %c0_39, %c0_40, %c0_41], %91 {strides = array<i32>} : memref<1x4x16x32xbf16, #tpu.memory_space<vmem>>, vector<1x1x16x32xbf16>,
    %c0_42 = arith.constant 0 : index
    %c0_43 = arith.constant 0 : index
    %c0_44 = arith.constant 0 : index
    %c0_45 = arith.constant 0 : index
    %92 = vector.load %arg8[%c0_42, %c0_43, %c0_44, %c0_45] : memref<1x4x16x32xf32, #tpu.memory_space<vmem>>, vector<1x1x16x32xf32>
    %93 = vector.shape_cast %92 : vector<1x1x16x32xf32> to vector<16x32xf32>
    %94 = vector.shape_cast %79 : vector<16x32xf32> to vector<1x1x16x32xf32>
    tpu.vector_store %arg8[%c0_42, %c0_43, %c0_44, %c0_45], %94 {strides = array<i32>} : memref<1x4x16x32xf32, #tpu.memory_space<vmem>>, vector<1x1x16x32xf32>,
    %c0_46 = arith.constant 0 : index
    %c0_47 = arith.constant 0 : index
    %c0_48 = arith.constant 0 : index
    %c0_49 = arith.constant 0 : index
    %95 = vector.load %arg9[%c0_46, %c0_47, %c0_48, %c0_49] : memref<1x4x16x32xf32, #tpu.memory_space<vmem>>, vector<1x1x16x32xf32>
    %96 = vector.shape_cast %95 : vector<1x1x16x32xf32> to vector<16x32xf32>
    %97 = vector.shape_cast %63 : vector<16x32xf32> to vector<1x1x16x32xf32>
    tpu.vector_store %arg9[%c0_46, %c0_47, %c0_48, %c0_49], %97 {strides = array<i32>} : memref<1x4x16x32xf32, #tpu.memory_space<vmem>>, vector<1x1x16x32xf32>,
    %c0_50 = arith.constant 0 : index
    %c0_51 = arith.constant 0 : index
    %c32 = arith.constant 32 : index
    %98 = vector.load %arg2[%c0_50, %c0_51, %c32] : memref<1x16x384xbf16, #tpu.memory_space<vmem>>, vector<1x16x32xbf16>
    %99 = vector.shape_cast %98 : vector<1x16x32xbf16> to vector<16x32xbf16>
    %100 = arith.extf %99 : vector<16x32xbf16> to vector<16x32xf32>
    %c0_52 = arith.constant 0 : index
    %c0_53 = arith.constant 0 : index
    %c160 = arith.constant 160 : index
    %101 = vector.load %arg2[%c0_52, %c0_53, %c160] : memref<1x16x384xbf16, #tpu.memory_space<vmem>>, vector<1x16x32xbf16>
    %102 = vector.shape_cast %101 : vector<1x16x32xbf16> to vector<16x32xbf16>
    %103 = arith.extf %102 : vector<16x32xbf16> to vector<16x32xf32>
    %c0_54 = arith.constant 0 : index
    %c0_55 = arith.constant 0 : index
    %c288 = arith.constant 288 : index
    %104 = vector.load %arg2[%c0_54, %c0_55, %c288] : memref<1x16x384xbf16, #tpu.memory_space<vmem>>, vector<1x16x32xbf16>
    %105 = vector.shape_cast %104 : vector<1x16x32xbf16> to vector<16x32xbf16>
    %106 = arith.extf %105 : vector<16x32xbf16> to vector<16x32xf32>
    %107 = vector.extract_strided_slice %100 {offsets = [0, 0], sizes = [16, 16], strides = [1, 1]} : vector<16x32xf32> to vector<16x16xf32>
    %108 = arith.mulf %107, %3 : vector<16x16xf32>
    %cst_56 = arith.constant dense<0.000000e+00> : vector<16x16xf32>
    %109 = tpu.matmul %107, %54, %cst_56 {dimension_numbers = #tpu.dot_dimension_numbers<[1], [0], [0], [1], [0, 0, 1, 1], [], []>} : vector<16x16xf32>, vector<16x16xf32>, vector<16x16xf32> -> vector<16x16xf32>
    %110 = arith.mulf %109, %1 : vector<16x16xf32>
    %111 = arith.addf %108, %110 : vector<16x16xf32>
    %112 = vector.extract_strided_slice %100 {offsets = [0, 16], sizes = [16, 16], strides = [1, 1]} : vector<16x32xf32> to vector<16x16xf32>
    %113 = tpu.concatenate %111, %112 in 1 : vector<16x16xf32>, vector<16x16xf32> -> vector<16x32xf32>
    %cst_57 = arith.constant 0.176776692 : f32
    %114 = vector.broadcast %cst_57 : f32 to vector<16x32xf32>
    %115 = arith.mulf %113, %114 : vector<16x32xf32>
    %116 = vector.extract_strided_slice %103 {offsets = [0, 0], sizes = [16, 16], strides = [1, 1]} : vector<16x32xf32> to vector<16x16xf32>
    %117 = arith.mulf %116, %3 : vector<16x16xf32>
    %cst_58 = arith.constant dense<0.000000e+00> : vector<16x16xf32>
    %118 = tpu.matmul %116, %54, %cst_58 {dimension_numbers = #tpu.dot_dimension_numbers<[1], [0], [0], [1], [0, 0, 1, 1], [], []>} : vector<16x16xf32>, vector<16x16xf32>, vector<16x16xf32> -> vector<16x16xf32>
    %119 = arith.mulf %118, %1 : vector<16x16xf32>
    %120 = arith.addf %117, %119 : vector<16x16xf32>
    %121 = vector.extract_strided_slice %103 {offsets = [0, 16], sizes = [16, 16], strides = [1, 1]} : vector<16x32xf32> to vector<16x16xf32>
    %122 = tpu.concatenate %120, %121 in 1 : vector<16x16xf32>, vector<16x16xf32> -> vector<16x32xf32>
    %123 = arith.truncf %115 : vector<16x32xf32> to vector<16x32xbf16>
    %c0_59 = arith.constant 0 : index
    %c1 = arith.constant 1 : index
    %c0_60 = arith.constant 0 : index
    %c0_61 = arith.constant 0 : index
    %124 = vector.load %arg5[%c0_59, %c1, %c0_60, %c0_61] : memref<1x4x16x32xbf16, #tpu.memory_space<vmem>>, vector<1x1x16x32xbf16>
    %125 = vector.shape_cast %124 : vector<1x1x16x32xbf16> to vector<16x32xbf16>
    %126 = vector.shape_cast %123 : vector<16x32xbf16> to vector<1x1x16x32xbf16>
    tpu.vector_store %arg5[%c0_59, %c1, %c0_60, %c0_61], %126 {strides = array<i32>} : memref<1x4x16x32xbf16, #tpu.memory_space<vmem>>, vector<1x1x16x32xbf16>,
    %127 = arith.truncf %122 : vector<16x32xf32> to vector<16x32xbf16>
    %c0_62 = arith.constant 0 : index
    %c1_63 = arith.constant 1 : index
    %c0_64 = arith.constant 0 : index
    %c0_65 = arith.constant 0 : index
    %128 = vector.load %arg6[%c0_62, %c1_63, %c0_64, %c0_65] : memref<1x4x16x32xbf16, #tpu.memory_space<vmem>>, vector<1x1x16x32xbf16>
    %129 = vector.shape_cast %128 : vector<1x1x16x32xbf16> to vector<16x32xbf16>
    %130 = vector.shape_cast %127 : vector<16x32xbf16> to vector<1x1x16x32xbf16>
    tpu.vector_store %arg6[%c0_62, %c1_63, %c0_64, %c0_65], %130 {strides = array<i32>} : memref<1x4x16x32xbf16, #tpu.memory_space<vmem>>, vector<1x1x16x32xbf16>,
    %131 = arith.truncf %106 : vector<16x32xf32> to vector<16x32xbf16>
    %c0_66 = arith.constant 0 : index
    %c1_67 = arith.constant 1 : index
    %c0_68 = arith.constant 0 : index
    %c0_69 = arith.constant 0 : index
    %132 = vector.load %arg7[%c0_66, %c1_67, %c0_68, %c0_69] : memref<1x4x16x32xbf16, #tpu.memory_space<vmem>>, vector<1x1x16x32xbf16>
    %133 = vector.shape_cast %132 : vector<1x1x16x32xbf16> to vector<16x32xbf16>
    %134 = vector.shape_cast %131 : vector<16x32xbf16> to vector<1x1x16x32xbf16>
    tpu.vector_store %arg7[%c0_66, %c1_67, %c0_68, %c0_69], %134 {strides = array<i32>} : memref<1x4x16x32xbf16, #tpu.memory_space<vmem>>, vector<1x1x16x32xbf16>,
    %c0_70 = arith.constant 0 : index
    %c1_71 = arith.constant 1 : index
    %c0_72 = arith.constant 0 : index
    %c0_73 = arith.constant 0 : index
    %135 = vector.load %arg8[%c0_70, %c1_71, %c0_72, %c0_73] : memref<1x4x16x32xf32, #tpu.memory_space<vmem>>, vector<1x1x16x32xf32>
    %136 = vector.shape_cast %135 : vector<1x1x16x32xf32> to vector<16x32xf32>
    %137 = vector.shape_cast %122 : vector<16x32xf32> to vector<1x1x16x32xf32>
    tpu.vector_store %arg8[%c0_70, %c1_71, %c0_72, %c0_73], %137 {strides = array<i32>} : memref<1x4x16x32xf32, #tpu.memory_space<vmem>>, vector<1x1x16x32xf32>,
    %c0_74 = arith.constant 0 : index
    %c1_75 = arith.constant 1 : index
    %c0_76 = arith.constant 0 : index
    %c0_77 = arith.constant 0 : index
    %138 = vector.load %arg9[%c0_74, %c1_75, %c0_76, %c0_77] : memref<1x4x16x32xf32, #tpu.memory_space<vmem>>, vector<1x1x16x32xf32>
    %139 = vector.shape_cast %138 : vector<1x1x16x32xf32> to vector<16x32xf32>
    %140 = vector.shape_cast %106 : vector<16x32xf32> to vector<1x1x16x32xf32>
    tpu.vector_store %arg9[%c0_74, %c1_75, %c0_76, %c0_77], %140 {strides = array<i32>} : memref<1x4x16x32xf32, #tpu.memory_space<vmem>>, vector<1x1x16x32xf32>,
    %c0_78 = arith.constant 0 : index
    %c0_79 = arith.constant 0 : index
    %c64 = arith.constant 64 : index
    %141 = vector.load %arg2[%c0_78, %c0_79, %c64] : memref<1x16x384xbf16, #tpu.memory_space<vmem>>, vector<1x16x32xbf16>
    %142 = vector.shape_cast %141 : vector<1x16x32xbf16> to vector<16x32xbf16>
    %143 = arith.extf %142 : vector<16x32xbf16> to vector<16x32xf32>
    %c0_80 = arith.constant 0 : index
    %c0_81 = arith.constant 0 : index
    %c192 = arith.constant 192 : index
    %144 = vector.load %arg2[%c0_80, %c0_81, %c192] : memref<1x16x384xbf16, #tpu.memory_space<vmem>>, vector<1x16x32xbf16>
    %145 = vector.shape_cast %144 : vector<1x16x32xbf16> to vector<16x32xbf16>
    %146 = arith.extf %145 : vector<16x32xbf16> to vector<16x32xf32>
    %c0_82 = arith.constant 0 : index
    %c0_83 = arith.constant 0 : index
    %c320 = arith.constant 320 : index
    %147 = vector.load %arg2[%c0_82, %c0_83, %c320] : memref<1x16x384xbf16, #tpu.memory_space<vmem>>, vector<1x16x32xbf16>
    %148 = vector.shape_cast %147 : vector<1x16x32xbf16> to vector<16x32xbf16>
    %149 = arith.extf %148 : vector<16x32xbf16> to vector<16x32xf32>
    %150 = vector.extract_strided_slice %143 {offsets = [0, 0], sizes = [16, 16], strides = [1, 1]} : vector<16x32xf32> to vector<16x16xf32>
    %151 = arith.mulf %150, %3 : vector<16x16xf32>
    %cst_84 = arith.constant dense<0.000000e+00> : vector<16x16xf32>
    %152 = tpu.matmul %150, %54, %cst_84 {dimension_numbers = #tpu.dot_dimension_numbers<[1], [0], [0], [1], [0, 0, 1, 1], [], []>} : vector<16x16xf32>, vector<16x16xf32>, vector<16x16xf32> -> vector<16x16xf32>
    %153 = arith.mulf %152, %1 : vector<16x16xf32>
    %154 = arith.addf %151, %153 : vector<16x16xf32>
    %155 = vector.extract_strided_slice %143 {offsets = [0, 16], sizes = [16, 16], strides = [1, 1]} : vector<16x32xf32> to vector<16x16xf32>
    %156 = tpu.concatenate %154, %155 in 1 : vector<16x16xf32>, vector<16x16xf32> -> vector<16x32xf32>
    %cst_85 = arith.constant 0.176776692 : f32
    %157 = vector.broadcast %cst_85 : f32 to vector<16x32xf32>
    %158 = arith.mulf %156, %157 : vector<16x32xf32>
    %159 = vector.extract_strided_slice %146 {offsets = [0, 0], sizes = [16, 16], strides = [1, 1]} : vector<16x32xf32> to vector<16x16xf32>
    %160 = arith.mulf %159, %3 : vector<16x16xf32>
    %cst_86 = arith.constant dense<0.000000e+00> : vector<16x16xf32>
    %161 = tpu.matmul %159, %54, %cst_86 {dimension_numbers = #tpu.dot_dimension_numbers<[1], [0], [0], [1], [0, 0, 1, 1], [], []>} : vector<16x16xf32>, vector<16x16xf32>, vector<16x16xf32> -> vector<16x16xf32>
    %162 = arith.mulf %161, %1 : vector<16x16xf32>
    %163 = arith.addf %160, %162 : vector<16x16xf32>
    %164 = vector.extract_strided_slice %146 {offsets = [0, 16], sizes = [16, 16], strides = [1, 1]} : vector<16x32xf32> to vector<16x16xf32>
    %165 = tpu.concatenate %163, %164 in 1 : vector<16x16xf32>, vector<16x16xf32> -> vector<16x32xf32>
    %166 = arith.truncf %158 : vector<16x32xf32> to vector<16x32xbf16>
    %c0_87 = arith.constant 0 : index
    %c2 = arith.constant 2 : index
    %c0_88 = arith.constant 0 : index
    %c0_89 = arith.constant 0 : index
    %167 = vector.load %arg5[%c0_87, %c2, %c0_88, %c0_89] : memref<1x4x16x32xbf16, #tpu.memory_space<vmem>>, vector<1x1x16x32xbf16>
    %168 = vector.shape_cast %167 : vector<1x1x16x32xbf16> to vector<16x32xbf16>
    %169 = vector.shape_cast %166 : vector<16x32xbf16> to vector<1x1x16x32xbf16>
    tpu.vector_store %arg5[%c0_87, %c2, %c0_88, %c0_89], %169 {strides = array<i32>} : memref<1x4x16x32xbf16, #tpu.memory_space<vmem>>, vector<1x1x16x32xbf16>,
    %170 = arith.truncf %165 : vector<16x32xf32> to vector<16x32xbf16>
    %c0_90 = arith.constant 0 : index
    %c2_91 = arith.constant 2 : index
    %c0_92 = arith.constant 0 : index
    %c0_93 = arith.constant 0 : index
    %171 = vector.load %arg6[%c0_90, %c2_91, %c0_92, %c0_93] : memref<1x4x16x32xbf16, #tpu.memory_space<vmem>>, vector<1x1x16x32xbf16>
    %172 = vector.shape_cast %171 : vector<1x1x16x32xbf16> to vector<16x32xbf16>
    %173 = vector.shape_cast %170 : vector<16x32xbf16> to vector<1x1x16x32xbf16>
    tpu.vector_store %arg6[%c0_90, %c2_91, %c0_92, %c0_93], %173 {strides = array<i32>} : memref<1x4x16x32xbf16, #tpu.memory_space<vmem>>, vector<1x1x16x32xbf16>,
    %174 = arith.truncf %149 : vector<16x32xf32> to vector<16x32xbf16>
    %c0_94 = arith.constant 0 : index
    %c2_95 = arith.constant 2 : index
    %c0_96 = arith.constant 0 : index
    %c0_97 = arith.constant 0 : index
    %175 = vector.load %arg7[%c0_94, %c2_95, %c0_96, %c0_97] : memref<1x4x16x32xbf16, #tpu.memory_space<vmem>>, vector<1x1x16x32xbf16>
    %176 = vector.shape_cast %175 : vector<1x1x16x32xbf16> to vector<16x32xbf16>
    %177 = vector.shape_cast %174 : vector<16x32xbf16> to vector<1x1x16x32xbf16>
    tpu.vector_store %arg7[%c0_94, %c2_95, %c0_96, %c0_97], %177 {strides = array<i32>} : memref<1x4x16x32xbf16, #tpu.memory_space<vmem>>, vector<1x1x16x32xbf16>,
    %c0_98 = arith.constant 0 : index
    %c2_99 = arith.constant 2 : index
    %c0_100 = arith.constant 0 : index
    %c0_101 = arith.constant 0 : index
    %178 = vector.load %arg8[%c0_98, %c2_99, %c0_100, %c0_101] : memref<1x4x16x32xf32, #tpu.memory_space<vmem>>, vector<1x1x16x32xf32>
    %179 = vector.shape_cast %178 : vector<1x1x16x32xf32> to vector<16x32xf32>
    %180 = vector.shape_cast %165 : vector<16x32xf32> to vector<1x1x16x32xf32>
    tpu.vector_store %arg8[%c0_98, %c2_99, %c0_100, %c0_101], %180 {strides = array<i32>} : memref<1x4x16x32xf32, #tpu.memory_space<vmem>>, vector<1x1x16x32xf32>,
    %c0_102 = arith.constant 0 : index
    %c2_103 = arith.constant 2 : index
    %c0_104 = arith.constant 0 : index
    %c0_105 = arith.constant 0 : index
    %181 = vector.load %arg9[%c0_102, %c2_103, %c0_104, %c0_105] : memref<1x4x16x32xf32, #tpu.memory_space<vmem>>, vector<1x1x16x32xf32>
    %182 = vector.shape_cast %181 : vector<1x1x16x32xf32> to vector<16x32xf32>
    %183 = vector.shape_cast %149 : vector<16x32xf32> to vector<1x1x16x32xf32>
    tpu.vector_store %arg9[%c0_102, %c2_103, %c0_104, %c0_105], %183 {strides = array<i32>} : memref<1x4x16x32xf32, #tpu.memory_space<vmem>>, vector<1x1x16x32xf32>,
    %c0_106 = arith.constant 0 : index
    %c0_107 = arith.constant 0 : index
    %c96 = arith.constant 96 : index
    %184 = vector.load %arg2[%c0_106, %c0_107, %c96] : memref<1x16x384xbf16, #tpu.memory_space<vmem>>, vector<1x16x32xbf16>
    %185 = vector.shape_cast %184 : vector<1x16x32xbf16> to vector<16x32xbf16>
    %186 = arith.extf %185 : vector<16x32xbf16> to vector<16x32xf32>
    %c0_108 = arith.constant 0 : index
    %c0_109 = arith.constant 0 : index
    %c224 = arith.constant 224 : index
    %187 = vector.load %arg2[%c0_108, %c0_109, %c224] : memref<1x16x384xbf16, #tpu.memory_space<vmem>>, vector<1x16x32xbf16>
    %188 = vector.shape_cast %187 : vector<1x16x32xbf16> to vector<16x32xbf16>
    %189 = arith.extf %188 : vector<16x32xbf16> to vector<16x32xf32>
    %c0_110 = arith.constant 0 : index
    %c0_111 = arith.constant 0 : index
    %c352 = arith.constant 352 : index
    %190 = vector.load %arg2[%c0_110, %c0_111, %c352] : memref<1x16x384xbf16, #tpu.memory_space<vmem>>, vector<1x16x32xbf16>
    %191 = vector.shape_cast %190 : vector<1x16x32xbf16> to vector<16x32xbf16>
    %192 = arith.extf %191 : vector<16x32xbf16> to vector<16x32xf32>
    %193 = vector.extract_strided_slice %186 {offsets = [0, 0], sizes = [16, 16], strides = [1, 1]} : vector<16x32xf32> to vector<16x16xf32>
    %194 = arith.mulf %193, %3 : vector<16x16xf32>
    %cst_112 = arith.constant dense<0.000000e+00> : vector<16x16xf32>
    %195 = tpu.matmul %193, %54, %cst_112 {dimension_numbers = #tpu.dot_dimension_numbers<[1], [0], [0], [1], [0, 0, 1, 1], [], []>} : vector<16x16xf32>, vector<16x16xf32>, vector<16x16xf32> -> vector<16x16xf32>
    %196 = arith.mulf %195, %1 : vector<16x16xf32>
    %197 = arith.addf %194, %196 : vector<16x16xf32>
    %198 = vector.extract_strided_slice %186 {offsets = [0, 16], sizes = [16, 16], strides = [1, 1]} : vector<16x32xf32> to vector<16x16xf32>
    %199 = tpu.concatenate %197, %198 in 1 : vector<16x16xf32>, vector<16x16xf32> -> vector<16x32xf32>
    %cst_113 = arith.constant 0.176776692 : f32
    %200 = vector.broadcast %cst_113 : f32 to vector<16x32xf32>
    %201 = arith.mulf %199, %200 : vector<16x32xf32>
    %202 = vector.extract_strided_slice %189 {offsets = [0, 0], sizes = [16, 16], strides = [1, 1]} : vector<16x32xf32> to vector<16x16xf32>
    %203 = arith.mulf %202, %3 : vector<16x16xf32>
    %cst_114 = arith.constant dense<0.000000e+00> : vector<16x16xf32>
    %204 = tpu.matmul %202, %54, %cst_114 {dimension_numbers = #tpu.dot_dimension_numbers<[1], [0], [0], [1], [0, 0, 1, 1], [], []>} : vector<16x16xf32>, vector<16x16xf32>, vector<16x16xf32> -> vector<16x16xf32>
    %205 = arith.mulf %204, %1 : vector<16x16xf32>
    %206 = arith.addf %203, %205 : vector<16x16xf32>
    %207 = vector.extract_strided_slice %189 {offsets = [0, 16], sizes = [16, 16], strides = [1, 1]} : vector<16x32xf32> to vector<16x16xf32>
    %208 = tpu.concatenate %206, %207 in 1 : vector<16x16xf32>, vector<16x16xf32> -> vector<16x32xf32>
    %209 = arith.truncf %201 : vector<16x32xf32> to vector<16x32xbf16>
    %c0_115 = arith.constant 0 : index
    %c3 = arith.constant 3 : index
    %c0_116 = arith.constant 0 : index
    %c0_117 = arith.constant 0 : index
    %210 = vector.load %arg5[%c0_115, %c3, %c0_116, %c0_117] : memref<1x4x16x32xbf16, #tpu.memory_space<vmem>>, vector<1x1x16x32xbf16>
    %211 = vector.shape_cast %210 : vector<1x1x16x32xbf16> to vector<16x32xbf16>
    %212 = vector.shape_cast %209 : vector<16x32xbf16> to vector<1x1x16x32xbf16>
    tpu.vector_store %arg5[%c0_115, %c3, %c0_116, %c0_117], %212 {strides = array<i32>} : memref<1x4x16x32xbf16, #tpu.memory_space<vmem>>, vector<1x1x16x32xbf16>,
    %213 = arith.truncf %208 : vector<16x32xf32> to vector<16x32xbf16>
    %c0_118 = arith.constant 0 : index
    %c3_119 = arith.constant 3 : index
    %c0_120 = arith.constant 0 : index
    %c0_121 = arith.constant 0 : index
    %214 = vector.load %arg6[%c0_118, %c3_119, %c0_120, %c0_121] : memref<1x4x16x32xbf16, #tpu.memory_space<vmem>>, vector<1x1x16x32xbf16>
    %215 = vector.shape_cast %214 : vector<1x1x16x32xbf16> to vector<16x32xbf16>
    %216 = vector.shape_cast %213 : vector<16x32xbf16> to vector<1x1x16x32xbf16>
    tpu.vector_store %arg6[%c0_118, %c3_119, %c0_120, %c0_121], %216 {strides = array<i32>} : memref<1x4x16x32xbf16, #tpu.memory_space<vmem>>, vector<1x1x16x32xbf16>,
    %217 = arith.truncf %192 : vector<16x32xf32> to vector<16x32xbf16>
    %c0_122 = arith.constant 0 : index
    %c3_123 = arith.constant 3 : index
    %c0_124 = arith.constant 0 : index
    %c0_125 = arith.constant 0 : index
    %218 = vector.load %arg7[%c0_122, %c3_123, %c0_124, %c0_125] : memref<1x4x16x32xbf16, #tpu.memory_space<vmem>>, vector<1x1x16x32xbf16>
    %219 = vector.shape_cast %218 : vector<1x1x16x32xbf16> to vector<16x32xbf16>
    %220 = vector.shape_cast %217 : vector<16x32xbf16> to vector<1x1x16x32xbf16>
    tpu.vector_store %arg7[%c0_122, %c3_123, %c0_124, %c0_125], %220 {strides = array<i32>} : memref<1x4x16x32xbf16, #tpu.memory_space<vmem>>, vector<1x1x16x32xbf16>,
    %c0_126 = arith.constant 0 : index
    %c3_127 = arith.constant 3 : index
    %c0_128 = arith.constant 0 : index
    %c0_129 = arith.constant 0 : index
    %221 = vector.load %arg8[%c0_126, %c3_127, %c0_128, %c0_129] : memref<1x4x16x32xf32, #tpu.memory_space<vmem>>, vector<1x1x16x32xf32>
    %222 = vector.shape_cast %221 : vector<1x1x16x32xf32> to vector<16x32xf32>
    %223 = vector.shape_cast %208 : vector<16x32xf32> to vector<1x1x16x32xf32>
    tpu.vector_store %arg8[%c0_126, %c3_127, %c0_128, %c0_129], %223 {strides = array<i32>} : memref<1x4x16x32xf32, #tpu.memory_space<vmem>>, vector<1x1x16x32xf32>,
    %c0_130 = arith.constant 0 : index
    %c3_131 = arith.constant 3 : index
    %c0_132 = arith.constant 0 : index
    %c0_133 = arith.constant 0 : index
    %224 = vector.load %arg9[%c0_130, %c3_131, %c0_132, %c0_133] : memref<1x4x16x32xf32, #tpu.memory_space<vmem>>, vector<1x1x16x32xf32>
    %225 = vector.shape_cast %224 : vector<1x1x16x32xf32> to vector<16x32xf32>
    %226 = vector.shape_cast %192 : vector<16x32xf32> to vector<1x1x16x32xf32>
    tpu.vector_store %arg9[%c0_130, %c3_131, %c0_132, %c0_133], %226 {strides = array<i32>} : memref<1x4x16x32xf32, #tpu.memory_space<vmem>>, vector<1x1x16x32xf32>,
    return
  }
  func.func @transform_0(%arg0: i32, %arg1: i32) -> (i32, i32, i32) {
    %c0_i32 = arith.constant 0 : i32
    %c0_i32_0 = arith.constant 0 : i32
    return %arg0, %arg1, %c0_i32 : i32, i32, i32
  }
  func.func @transform_1(%arg0: i32, %arg1: i32) -> (i32, i32, i32) {
    %c0_i32 = arith.constant 0 : i32
    %c0_i32_0 = arith.constant 0 : i32
    return %arg0, %arg1, %c0_i32 : i32, i32, i32
  }
  func.func @transform_2(%arg0: i32, %arg1: i32) -> (i32, i32, i32) {
    %c0_i32 = arith.constant 0 : i32
    %c0_i32_0 = arith.constant 0 : i32
    return %arg0, %arg1, %c0_i32 : i32, i32, i32
  }
  func.func @transform_3(%arg0: i32, %arg1: i32) -> (i32, i32, i32, i32) {
    %c0_i32 = arith.constant 0 : i32
    %c0_i32_0 = arith.constant 0 : i32
    %c0_i32_1 = arith.constant 0 : i32
    return %arg0, %c0_i32, %arg1, %c0_i32_0 : i32, i32, i32, i32
  }
  func.func @transform_4(%arg0: i32, %arg1: i32) -> (i32, i32, i32, i32) {
    %c0_i32 = arith.constant 0 : i32
    %c0_i32_0 = arith.constant 0 : i32
    %c0_i32_1 = arith.constant 0 : i32
    return %arg0, %c0_i32, %arg1, %c0_i32_0 : i32, i32, i32, i32
  }
  func.func @transform_5(%arg0: i32, %arg1: i32) -> (i32, i32, i32, i32) {
    %c0_i32 = arith.constant 0 : i32
    %c0_i32_0 = arith.constant 0 : i32
    %c0_i32_1 = arith.constant 0 : i32
    return %arg0, %c0_i32, %arg1, %c0_i32_0 : i32, i32, i32, i32
  }
  func.func @transform_6(%arg0: i32, %arg1: i32) -> (i32, i32, i32, i32) {
    %c0_i32 = arith.constant 0 : i32
    %c0_i32_0 = arith.constant 0 : i32
    %c0_i32_1 = arith.constant 0 : i32
    return %arg0, %c0_i32, %arg1, %c0_i32_0 : i32, i32, i32, i32
  }
  func.func @transform_7(%arg0: i32, %arg1: i32) -> (i32, i32, i32, i32) {
    %c0_i32 = arith.constant 0 : i32
    %c0_i32_0 = arith.constant 0 : i32
    %c0_i32_1 = arith.constant 0 : i32
    return %arg0, %c0_i32, %arg1, %c0_i32_0 : i32, i32, i32, i32
  }
}

module attributes {stable_mosaic.version = 11 : i64} {
  func.func @matmul_kernel(%arg0: i32, %arg1: i32, %arg2: i32, %arg3: memref<32x128xbf16, #tpu.memory_space<vmem>>, %arg4: memref<128x128xbf16, #tpu.memory_space<vmem>>, %arg5: memref<32x128xbf16, #tpu.memory_space<vmem>>, %arg6: memref<32x128xf32, #tpu.memory_space<vmem>>) attributes {dimension_semantics = [#tpu.dimension_semantics<parallel>, #tpu.dimension_semantics<parallel>, #tpu.dimension_semantics<arbitrary>], iteration_bounds = array<i64: 1, 1, 1>, scalar_prefetch = 0 : i64, scratch_operands = 1 : i64, tpu.core_type = #tpu.core_type<tc>, window_params = [{transform_indices = @transform_0, window_bounds = array<i64: 32, 128>}, {transform_indices = @transform_1, window_bounds = array<i64: 128, 128>}, {transform_indices = @transform_2, window_bounds = array<i64: 32, 128>}]} {
    %c0_i32 = arith.constant 0 : i32
    %0 = arith.cmpi eq, %arg2, %c0_i32 : i32
    %1 = arith.extui %0 : i1 to i32
    %c0_i32_0 = arith.constant 0 : i32
    %2 = arith.cmpi ne, %1, %c0_i32_0 : i32
    scf.if %2 {
      %cst_10 = arith.constant 0.000000e+00 : f32
      %12 = vector.broadcast %cst_10 : f32 to vector<32x128xf32>
      %c0_11 = arith.constant 0 : index
      %c0_12 = arith.constant 0 : index
      %13 = vector.load %arg6[%c0_11, %c0_12] : memref<32x128xf32, #tpu.memory_space<vmem>>, vector<32x128xf32>
      tpu.vector_store %arg6[%c0_11, %c0_12], %12 {strides = array<i32>} : memref<32x128xf32, #tpu.memory_space<vmem>>, vector<32x128xf32>,
    } else {
    }
    %c0 = arith.constant 0 : index
    %c0_1 = arith.constant 0 : index
    %3 = vector.load %arg6[%c0, %c0_1] : memref<32x128xf32, #tpu.memory_space<vmem>>, vector<32x128xf32>
    %c0_2 = arith.constant 0 : index
    %c0_3 = arith.constant 0 : index
    %4 = vector.load %arg3[%c0_2, %c0_3] : memref<32x128xbf16, #tpu.memory_space<vmem>>, vector<32x128xbf16>
    %c0_4 = arith.constant 0 : index
    %c0_5 = arith.constant 0 : index
    %5 = vector.load %arg4[%c0_4, %c0_5] : memref<128x128xbf16, #tpu.memory_space<vmem>>, vector<128x128xbf16>
    %cst = arith.constant dense<0.000000e+00> : vector<32x128xf32>
    %6 = tpu.matmul %4, %5, %cst {dimension_numbers = #tpu.dot_dimension_numbers<[1], [0], [0], [1], [0, 0, 1, 1], [], []>} : vector<32x128xbf16>, vector<128x128xbf16>, vector<32x128xf32> -> vector<32x128xf32>
    %7 = arith.addf %3, %6 : vector<32x128xf32>
    %c0_6 = arith.constant 0 : index
    %c0_7 = arith.constant 0 : index
    %8 = vector.load %arg6[%c0_6, %c0_7] : memref<32x128xf32, #tpu.memory_space<vmem>>, vector<32x128xf32>
    tpu.vector_store %arg6[%c0_6, %c0_7], %7 {strides = array<i32>} : memref<32x128xf32, #tpu.memory_space<vmem>>, vector<32x128xf32>,
    %c0_i32_8 = arith.constant 0 : i32
    %9 = arith.cmpi eq, %arg2, %c0_i32_8 : i32
    %10 = arith.extui %9 : i1 to i32
    %c0_i32_9 = arith.constant 0 : i32
    %11 = arith.cmpi ne, %10, %c0_i32_9 : i32
    scf.if %11 {
      %c0_10 = arith.constant 0 : index
      %c0_11 = arith.constant 0 : index
      %12 = vector.load %arg6[%c0_10, %c0_11] : memref<32x128xf32, #tpu.memory_space<vmem>>, vector<32x128xf32>
      %13 = arith.truncf %12 : vector<32x128xf32> to vector<32x128xbf16>
      %c0_12 = arith.constant 0 : index
      %c0_13 = arith.constant 0 : index
      %14 = vector.load %arg5[%c0_12, %c0_13] : memref<32x128xbf16, #tpu.memory_space<vmem>>, vector<32x128xbf16>
      tpu.vector_store %arg5[%c0_12, %c0_13], %13 {strides = array<i32>} : memref<32x128xbf16, #tpu.memory_space<vmem>>, vector<32x128xbf16>,
    } else {
    }
    return
  }
  func.func @transform_0(%arg0: i32, %arg1: i32, %arg2: i32) -> (i32, i32) {
    %c0_i32 = arith.constant 0 : i32
    return %arg0, %arg2 : i32, i32
  }
  func.func @transform_1(%arg0: i32, %arg1: i32, %arg2: i32) -> (i32, i32) {
    %c0_i32 = arith.constant 0 : i32
    return %arg2, %arg1 : i32, i32
  }
  func.func @transform_2(%arg0: i32, %arg1: i32, %arg2: i32) -> (i32, i32) {
    %c0_i32 = arith.constant 0 : i32
    return %arg0, %arg1 : i32, i32
  }
}

module attributes {stable_mosaic.version = 11 : i64} {
  func.func @matmul_kernel(%arg0: i32, %arg1: i32, %arg2: i32, %arg3: memref<32x128xbf16, #tpu.memory_space<vmem>>, %arg4: memref<128x512xbf16, #tpu.memory_space<vmem>>, %arg5: memref<1x512xf32, #tpu.memory_space<vmem>>, %arg6: memref<32x512xbf16, #tpu.memory_space<vmem>>, %arg7: memref<32x512xf32, #tpu.memory_space<vmem>>) attributes {dimension_semantics = [#tpu.dimension_semantics<parallel>, #tpu.dimension_semantics<parallel>, #tpu.dimension_semantics<arbitrary>], iteration_bounds = array<i64: 1, 1, 1>, scalar_prefetch = 0 : i64, scratch_operands = 1 : i64, tpu.core_type = #tpu.core_type<tc>, window_params = [{transform_indices = @transform_0, window_bounds = array<i64: 32, 128>}, {transform_indices = @transform_1, window_bounds = array<i64: 128, 512>}, {transform_indices = @transform_2, window_bounds = array<i64: 1, 512>}, {transform_indices = @transform_3, window_bounds = array<i64: 32, 512>}]} {
    %c0_i32 = arith.constant 0 : i32
    %0 = arith.cmpi eq, %arg2, %c0_i32 : i32
    %1 = arith.extui %0 : i1 to i32
    %c0_i32_0 = arith.constant 0 : i32
    %2 = arith.cmpi ne, %1, %c0_i32_0 : i32
    scf.if %2 {
      %cst_10 = arith.constant 0.000000e+00 : f32
      %12 = vector.broadcast %cst_10 : f32 to vector<32x512xf32>
      %c0_11 = arith.constant 0 : index
      %c0_12 = arith.constant 0 : index
      %13 = vector.load %arg7[%c0_11, %c0_12] : memref<32x512xf32, #tpu.memory_space<vmem>>, vector<32x512xf32>
      tpu.vector_store %arg7[%c0_11, %c0_12], %12 {strides = array<i32>} : memref<32x512xf32, #tpu.memory_space<vmem>>, vector<32x512xf32>,
    } else {
    }
    %c0 = arith.constant 0 : index
    %c0_1 = arith.constant 0 : index
    %3 = vector.load %arg7[%c0, %c0_1] : memref<32x512xf32, #tpu.memory_space<vmem>>, vector<32x512xf32>
    %c0_2 = arith.constant 0 : index
    %c0_3 = arith.constant 0 : index
    %4 = vector.load %arg3[%c0_2, %c0_3] : memref<32x128xbf16, #tpu.memory_space<vmem>>, vector<32x128xbf16>
    %c0_4 = arith.constant 0 : index
    %c0_5 = arith.constant 0 : index
    %5 = vector.load %arg4[%c0_4, %c0_5] : memref<128x512xbf16, #tpu.memory_space<vmem>>, vector<128x512xbf16>
    %cst = arith.constant dense<0.000000e+00> : vector<32x512xf32>
    %6 = tpu.matmul %4, %5, %cst {dimension_numbers = #tpu.dot_dimension_numbers<[1], [0], [0], [1], [0, 0, 1, 1], [], []>} : vector<32x128xbf16>, vector<128x512xbf16>, vector<32x512xf32> -> vector<32x512xf32>
    %7 = arith.addf %3, %6 : vector<32x512xf32>
    %c0_6 = arith.constant 0 : index
    %c0_7 = arith.constant 0 : index
    %8 = vector.load %arg7[%c0_6, %c0_7] : memref<32x512xf32, #tpu.memory_space<vmem>>, vector<32x512xf32>
    tpu.vector_store %arg7[%c0_6, %c0_7], %7 {strides = array<i32>} : memref<32x512xf32, #tpu.memory_space<vmem>>, vector<32x512xf32>,
    %c0_i32_8 = arith.constant 0 : i32
    %9 = arith.cmpi eq, %arg2, %c0_i32_8 : i32
    %10 = arith.extui %9 : i1 to i32
    %c0_i32_9 = arith.constant 0 : i32
    %11 = arith.cmpi ne, %10, %c0_i32_9 : i32
    scf.if %11 {
      %c0_10 = arith.constant 0 : index
      %c0_11 = arith.constant 0 : index
      %12 = vector.load %arg7[%c0_10, %c0_11] : memref<32x512xf32, #tpu.memory_space<vmem>>, vector<32x512xf32>
      %c0_12 = arith.constant 0 : index
      %c0_13 = arith.constant 0 : index
      %13 = vector.load %arg5[%c0_12, %c0_13] : memref<1x512xf32, #tpu.memory_space<vmem>>, vector<1x512xf32>
      %14 = vector.broadcast %13 : vector<1x512xf32> to vector<32x512xf32>
      %15 = arith.addf %12, %14 : vector<32x512xf32>
      %cst_14 = arith.constant 5.000000e-01 : f32
      %16 = vector.broadcast %cst_14 : f32 to vector<32x512xf32>
      %17 = arith.mulf %16, %15 : vector<32x512xf32>
      %cst_15 = arith.constant 4.471500e-02 : f32
      %18 = vector.broadcast %cst_15 : f32 to vector<32x512xf32>
      %19 = arith.mulf %18, %15 : vector<32x512xf32>
      %20 = arith.mulf %19, %15 : vector<32x512xf32>
      %21 = arith.mulf %20, %15 : vector<32x512xf32>
      %22 = arith.addf %15, %21 : vector<32x512xf32>
      %cst_16 = arith.constant 0.797884583 : f32
      %23 = vector.broadcast %cst_16 : f32 to vector<32x512xf32>
      %24 = arith.mulf %23, %22 : vector<32x512xf32>
      %25 = math.tanh %24 : vector<32x512xf32>
      %cst_17 = arith.constant 1.000000e+00 : f32
      %26 = vector.broadcast %cst_17 : f32 to vector<32x512xf32>
      %27 = arith.addf %26, %25 : vector<32x512xf32>
      %28 = arith.mulf %17, %27 : vector<32x512xf32>
      %29 = arith.truncf %28 : vector<32x512xf32> to vector<32x512xbf16>
      %c0_18 = arith.constant 0 : index
      %c0_19 = arith.constant 0 : index
      %30 = vector.load %arg6[%c0_18, %c0_19] : memref<32x512xbf16, #tpu.memory_space<vmem>>, vector<32x512xbf16>
      tpu.vector_store %arg6[%c0_18, %c0_19], %29 {strides = array<i32>} : memref<32x512xbf16, #tpu.memory_space<vmem>>, vector<32x512xbf16>,
    } else {
    }
    return
  }
  func.func @transform_0(%arg0: i32, %arg1: i32, %arg2: i32) -> (i32, i32) {
    %c0_i32 = arith.constant 0 : i32
    return %arg0, %arg2 : i32, i32
  }
  func.func @transform_1(%arg0: i32, %arg1: i32, %arg2: i32) -> (i32, i32) {
    %c0_i32 = arith.constant 0 : i32
    return %arg2, %arg1 : i32, i32
  }
  func.func @transform_2(%arg0: i32, %arg1: i32, %arg2: i32) -> (i32, i32) {
    %c0_i32 = arith.constant 0 : i32
    %c0_i32_0 = arith.constant 0 : i32
    return %c0_i32, %arg1 : i32, i32
  }
  func.func @transform_3(%arg0: i32, %arg1: i32, %arg2: i32) -> (i32, i32) {
    %c0_i32 = arith.constant 0 : i32
    return %arg0, %arg1 : i32, i32
  }
}

module attributes {stable_mosaic.version = 11 : i64} {
  func.func @matmul_kernel(%arg0: i32, %arg1: i32, %arg2: i32, %arg3: memref<32x512xbf16, #tpu.memory_space<vmem>>, %arg4: memref<512x128xbf16, #tpu.memory_space<vmem>>, %arg5: memref<1x128xf32, #tpu.memory_space<vmem>>, %arg6: memref<32x128xbf16, #tpu.memory_space<vmem>>, %arg7: memref<32x128xf32, #tpu.memory_space<vmem>>, %arg8: memref<32x128xf32, #tpu.memory_space<vmem>>, %arg9: memref<32x128xf32, #tpu.memory_space<vmem>>) attributes {dimension_semantics = [#tpu.dimension_semantics<parallel>, #tpu.dimension_semantics<parallel>, #tpu.dimension_semantics<arbitrary>], iteration_bounds = array<i64: 1, 1, 1>, scalar_prefetch = 0 : i64, scratch_operands = 1 : i64, tpu.core_type = #tpu.core_type<tc>, window_params = [{transform_indices = @transform_0, window_bounds = array<i64: 32, 512>}, {transform_indices = @transform_1, window_bounds = array<i64: 512, 128>}, {transform_indices = @transform_2, window_bounds = array<i64: 1, 128>}, {transform_indices = @transform_3, window_bounds = array<i64: 32, 128>}, {transform_indices = @transform_4, window_bounds = array<i64: 32, 128>}, {transform_indices = @transform_5, window_bounds = array<i64: 32, 128>}]} {
    %c0_i32 = arith.constant 0 : i32
    %0 = arith.cmpi eq, %arg2, %c0_i32 : i32
    %1 = arith.extui %0 : i1 to i32
    %c0_i32_0 = arith.constant 0 : i32
    %2 = arith.cmpi ne, %1, %c0_i32_0 : i32
    scf.if %2 {
      %cst_10 = arith.constant 0.000000e+00 : f32
      %12 = vector.broadcast %cst_10 : f32 to vector<32x128xf32>
      %c0_11 = arith.constant 0 : index
      %c0_12 = arith.constant 0 : index
      %13 = vector.load %arg9[%c0_11, %c0_12] : memref<32x128xf32, #tpu.memory_space<vmem>>, vector<32x128xf32>
      tpu.vector_store %arg9[%c0_11, %c0_12], %12 {strides = array<i32>} : memref<32x128xf32, #tpu.memory_space<vmem>>, vector<32x128xf32>,
    } else {
    }
    %c0 = arith.constant 0 : index
    %c0_1 = arith.constant 0 : index
    %3 = vector.load %arg9[%c0, %c0_1] : memref<32x128xf32, #tpu.memory_space<vmem>>, vector<32x128xf32>
    %c0_2 = arith.constant 0 : index
    %c0_3 = arith.constant 0 : index
    %4 = vector.load %arg3[%c0_2, %c0_3] : memref<32x512xbf16, #tpu.memory_space<vmem>>, vector<32x512xbf16>
    %c0_4 = arith.constant 0 : index
    %c0_5 = arith.constant 0 : index
    %5 = vector.load %arg4[%c0_4, %c0_5] : memref<512x128xbf16, #tpu.memory_space<vmem>>, vector<512x128xbf16>
    %cst = arith.constant dense<0.000000e+00> : vector<32x128xf32>
    %6 = tpu.matmul %4, %5, %cst {dimension_numbers = #tpu.dot_dimension_numbers<[1], [0], [0], [1], [0, 0, 1, 1], [], []>} : vector<32x512xbf16>, vector<512x128xbf16>, vector<32x128xf32> -> vector<32x128xf32>
    %7 = arith.addf %3, %6 : vector<32x128xf32>
    %c0_6 = arith.constant 0 : index
    %c0_7 = arith.constant 0 : index
    %8 = vector.load %arg9[%c0_6, %c0_7] : memref<32x128xf32, #tpu.memory_space<vmem>>, vector<32x128xf32>
    tpu.vector_store %arg9[%c0_6, %c0_7], %7 {strides = array<i32>} : memref<32x128xf32, #tpu.memory_space<vmem>>, vector<32x128xf32>,
    %c0_i32_8 = arith.constant 0 : i32
    %9 = arith.cmpi eq, %arg2, %c0_i32_8 : i32
    %10 = arith.extui %9 : i1 to i32
    %c0_i32_9 = arith.constant 0 : i32
    %11 = arith.cmpi ne, %10, %c0_i32_9 : i32
    scf.if %11 {
      %c0_10 = arith.constant 0 : index
      %c0_11 = arith.constant 0 : index
      %12 = vector.load %arg9[%c0_10, %c0_11] : memref<32x128xf32, #tpu.memory_space<vmem>>, vector<32x128xf32>
      %c0_12 = arith.constant 0 : index
      %c0_13 = arith.constant 0 : index
      %13 = vector.load %arg5[%c0_12, %c0_13] : memref<1x128xf32, #tpu.memory_space<vmem>>, vector<1x128xf32>
      %14 = vector.broadcast %13 : vector<1x128xf32> to vector<32x128xf32>
      %15 = arith.addf %12, %14 : vector<32x128xf32>
      %c0_14 = arith.constant 0 : index
      %c0_15 = arith.constant 0 : index
      %16 = vector.load %arg6[%c0_14, %c0_15] : memref<32x128xbf16, #tpu.memory_space<vmem>>, vector<32x128xbf16>
      %17 = arith.extf %16 : vector<32x128xbf16> to vector<32x128xf32>
      %18 = arith.addf %15, %17 : vector<32x128xf32>
      %c0_16 = arith.constant 0 : index
      %c0_17 = arith.constant 0 : index
      %19 = vector.load %arg7[%c0_16, %c0_17] : memref<32x128xf32, #tpu.memory_space<vmem>>, vector<32x128xf32>
      %20 = arith.addf %18, %19 : vector<32x128xf32>
      %c0_18 = arith.constant 0 : index
      %c0_19 = arith.constant 0 : index
      %21 = vector.load %arg8[%c0_18, %c0_19] : memref<32x128xf32, #tpu.memory_space<vmem>>, vector<32x128xf32>
      tpu.vector_store %arg8[%c0_18, %c0_19], %20 {strides = array<i32>} : memref<32x128xf32, #tpu.memory_space<vmem>>, vector<32x128xf32>,
    } else {
    }
    return
  }
  func.func @transform_0(%arg0: i32, %arg1: i32, %arg2: i32) -> (i32, i32) {
    %c0_i32 = arith.constant 0 : i32
    return %arg0, %arg2 : i32, i32
  }
  func.func @transform_1(%arg0: i32, %arg1: i32, %arg2: i32) -> (i32, i32) {
    %c0_i32 = arith.constant 0 : i32
    return %arg2, %arg1 : i32, i32
  }
  func.func @transform_2(%arg0: i32, %arg1: i32, %arg2: i32) -> (i32, i32) {
    %c0_i32 = arith.constant 0 : i32
    %c0_i32_0 = arith.constant 0 : i32
    return %c0_i32, %arg1 : i32, i32
  }
  func.func @transform_3(%arg0: i32, %arg1: i32, %arg2: i32) -> (i32, i32) {
    %c0_i32 = arith.constant 0 : i32
    return %arg0, %arg1 : i32, i32
  }
  func.func @transform_4(%arg0: i32, %arg1: i32, %arg2: i32) -> (i32, i32) {
    %c0_i32 = arith.constant 0 : i32
    return %arg0, %arg1 : i32, i32
  }
  func.func @transform_5(%arg0: i32, %arg1: i32, %arg2: i32) -> (i32, i32) {
    %c0_i32 = arith.constant 0 : i32
    return %arg0, %arg1 : i32, i32
  }
}

</mosaic_0001>

<bundles_post_ra>
// kernel: block_forward.7
= control target key start
LH: loop header
LB: loop body
LE: loop exit
PB: predicated region body
PF: predicated region fallthrough
CT: control target
= control target key end

     0   :  { %8 = vsyncpa [#allocation3], 0  ;;  %s203_s15 = smov [#allocation2]   ;;  %s204_s17 = smov 128   ;;  %s262_s0 = inlined_call_operand.hbm [shape: f32[32,128], index: 0, kind: input, shape index: {}]   ;;  %s263_s1 = inlined_call_operand.vmem [shape: f32[1,128], index: 1, kind: input, shape index: {}]   ;;  %s264_s2 = inlined_call_operand.vmem [shape: f32[1,128], index: 2, kind: input, shape index: {}]   ;;  %s265_s3 = inlined_call_operand.vmem [shape: bf16[32,128], index: 3, kind: output, shape index: {}]  }
   0x1   :  { %s13_s14 = sshll.u32 %s262_s0, 4  ;;  %s15_s16 = sshll.u32 %s203_s15, 4  ;;  %s14_s14 = int_to_ptr.hbm [resolvable:$true] %s13_s14  ;;  %s16_s16 = int_to_ptr.vmem [resolvable:$true] %s15_s16 }
   0x2   :  { %s205_s18 = smov 8  }
   0x3   :  { %21 = dma.hbm_to_vmem [thread:$0]  %s14_s14, 512, %s16_s16, [#allocation3], %s204_s17, %s204_s17, %s205_s18  }
   0x4   :  { %201 = dma.done.wait [#allocation3], 512  }
   0x5   :  { %202 = vsyncadd [#allocation3], 4294966784  ;;  %v32_v0 = vld [vmem:[#allocation2 + $0x10] sm:$0xff]  ;;  %v30_v1 = vld [vmem:[#allocation2] sm:$0xff]  ;;  %v206_v4 = vmov 128.0  }
   0x6   :  { %38 = vadd.xlane.f32.xlu1 %v32_v0  ;;  %34 = vadd.xlane.f32.xlu0 %v30_v1  ;;  %v33_v2 = vld [vmem:[#allocation2 + $0x18] sm:$0xff]  ;;  %v31_v3 = vld [vmem:[#allocation2 + $0x8] sm:$0xff]  ;;  %167 = vrcp.f32 %v206_v4  ;;  %v165_v62 = vld [vmem:[%s263_s1] ss:$0 sm:$0xff] }
   0xc   :  { %v168_v5 = vpop.eup %167 }
   0xd   :  { %v43_v6 = vmul.f32 128.0, %v168_v5  ;;  %vm47_vm0 = vweird.f32 %v168_v5 }
   0xe   :  { %40 = vadd.xlane.f32.xlu1 %v33_v2  ;;  %36 = vadd.xlane.f32.xlu0 %v31_v3 }
   0xf   :  { %v44_v7 = vsub.f32 1.0, %v43_v6 }
  0x11   :  { %v45_v8 = vmul.f32 %v168_v5, %v44_v7 }
  0x13   :  { %v46_v9 = vadd.f32 %v168_v5, %v45_v8 }
  0x15   :  { %v48_v10 = vsel %vm47_vm0, %v168_v5, %v46_v9  ;;  %v166_v5 = vld [vmem:[%s264_s2] ss:$0 sm:$0xff] }
  0x79   :  { %v39_v11 = vpop.xlane.xlu1 %38  ;;  %v35_v12 = vpop.xlane.xlu0 %34 }
  0x7a   :  { %v51_v13 = vmul.f32 %v48_v10, %v39_v11  ;;  %v49_v14 = vmul.f32 %v48_v10, %v35_v12 }
  0x7c   :  { %v230_v15 = vsub.f32 %v32_v0, %v51_v13  ;;  %v232_v16 = vsub.f32 %v30_v1, %v49_v14 }
  0x7e   :  { %v59_v17 = vmul.f32 %v230_v15, %v230_v15  ;;  %v57_v18 = vmul.f32 %v232_v16, %v232_v16 }
  0x80   :  { %65 = vadd.xlane.f32.xlu0 %v59_v17  ;;  %61 = vadd.xlane.f32.xlu2 %v57_v18 }
  0x81   :  { %v41_v19 = vpop.xlane.xlu1 %40  ;;  %v37_v20 = vpop.xlane.xlu0 %36 }
  0x82   :  { %v52_v21 = vmul.f32 %v48_v10, %v41_v19  ;;  %v50_v22 = vmul.f32 %v48_v10, %v37_v20 }
  0x84   :  { %v238_v23 = vsub.f32 %v33_v2, %v52_v21  ;;  %v240_v24 = vsub.f32 %v31_v3, %v50_v22 }
  0x86   :  { %v60_v25 = vmul.f32 %v238_v23, %v238_v23  ;;  %v58_v26 = vmul.f32 %v240_v24, %v240_v24 }
  0x88   :  { %67 = vadd.xlane.f32.xlu1 %v60_v25  ;;  %63 = vadd.xlane.f32.xlu2 %v58_v26 }
  0xf3   :  { %v62_v27 = vpop.xlane.xlu2 %61  ;;  %v66_v28 = vpop.xlane.xlu0 %65 }
  0xf4   :  { %v69_v29 = vmul.f32 %v62_v27, %v48_v10  ;;  %v71_v30 = vmul.f32 %v66_v28, %v48_v10 }
  0xf6   :  { %v73_v31 = vadd.f32 1e-05, %v69_v29  ;;  %v75_v32 = vadd.f32 1e-05, %v71_v30 }
  0xf8   :  { %169 = vrsqrt.f32 %v73_v31  ;;  %vm103_vm3 = vweird.f32 %v75_v32  ;;  %vm83_vm4 = vweird.f32 %v73_v31 }
  0xf9   :  { %171 = vrsqrt.f32 %v75_v32 }
  0xfb   :  { %v68_v33 = vpop.xlane.xlu1 %67  ;;  %v64_v34 = vpop.xlane.xlu2 %63 }
  0xfc   :  { %v72_v35 = vmul.f32 %v68_v33, %v48_v10  ;;  %v70_v36 = vmul.f32 %v64_v34, %v48_v10 }
  0xfe   :  { %v170_v37 = vpop.eup %169  ;;  %v76_v38 = vadd.f32 1e-05, %v72_v35  ;;  %v74_v39 = vadd.f32 1e-05, %v70_v36 }
  0xff   :  { %v172_v40 = vpop.eup %171  ;;  %v78_v41 = vmul.f32 %v170_v37, %v73_v31  ;;  %vm84_vm2 = vweird.f32 %v170_v37 }
 0x100   :  { %v98_v42 = vmul.f32 %v172_v40, %v75_v32  ;;  %173 = vrsqrt.f32 %v76_v38  ;;  %vm104_vm1 = vweird.f32 %v172_v40  ;;  %vm85_vm6 = vmor %vm83_vm4, %vm84_vm2  ;;  %vm113_vm9 = vweird.f32 %v76_v38 }
 0x101   :  { %v79_v43 = vmul.f32 %v170_v37, %v78_v41  ;;  %175 = vrsqrt.f32 %v74_v39  ;;  %vm105_vm5 = vmor %vm103_vm3, %vm104_vm1  ;;  %vm93_vm11 = vweird.f32 %v74_v39 }
 0x102   :  { %v99_v44 = vmul.f32 %v172_v40, %v98_v42 }
 0x103   :  { %v80_v45 = vmul.f32 0.5, %v79_v43 }
 0x104   :  { %v100_v46 = vmul.f32 0.5, %v99_v44 }
 0x105   :  { %v81_v47 = vsub.f32 1.5, %v80_v45 }
 0x106   :  { %v174_v48 = vpop.eup %173  ;;  %v101_v49 = vsub.f32 1.5, %v100_v46 }
 0x107   :  { %v176_v50 = vpop.eup %175  ;;  %v108_v51 = vmul.f32 %v174_v48, %v76_v38  ;;  %v82_v52 = vmul.f32 %v170_v37, %v81_v47  ;;  %vm114_vm7 = vweird.f32 %v174_v48 }
 0x108   :  { %v102_v53 = vmul.f32 %v172_v40, %v101_v49  ;;  %v88_v54 = vmul.f32 %v176_v50, %v74_v39  ;;  %vm94_vm8 = vweird.f32 %v176_v50  ;;  %vm115_vm10 = vmor %vm113_vm9, %vm114_vm7 }
 0x109   :  { %v109_v55 = vmul.f32 %v174_v48, %v108_v51  ;;  %v86_v59 = vsel %vm85_vm6, %v170_v37, %v82_v52  ;;  %vm95_vm12 = vmor %vm93_vm11, %vm94_vm8 }
 0x10a   :  { %v89_v56 = vmul.f32 %v176_v50, %v88_v54  ;;  %v106_v57 = vsel %vm105_vm5, %v172_v40, %v102_v53  ;;  %v117_v1 = vmul.f32 %v86_v59, %v232_v16 }
 0x10b   :  { %v110_v58 = vmul.f32 0.5, %v109_v55  ;;  %v119_v63 = vmul.f32 %v106_v57, %v230_v15 }
 0x10c   :  { %v90_v60 = vmul.f32 0.5, %v89_v56  ;;  %v125_v9 = vmul.f32 %v165_v62, %v117_v1 }
 0x10d   :  { %v111_v61 = vsub.f32 1.5, %v110_v58  ;;  %v127_v6 = vmul.f32 %v165_v62, %v119_v63 }
 0x10e   :  { %v91_v0 = vsub.f32 1.5, %v90_v60  ;;  %v133_v15 = vadd.f32 %v166_v5, %v125_v9 }
 0x10f   :  { %v112_v2 = vmul.f32 %v174_v48, %v111_v61  ;;  %v135_v13 = vadd.f32 %v166_v5, %v127_v6 }
 0x110   :  { %v92_v3 = vmul.f32 %v176_v50, %v91_v0 }
 0x111   :  { %v116_v4 = vsel %vm115_vm10, %v174_v48, %v112_v2 }
 0x112   :  { %v120_v7 = vmul.f32 %v116_v4, %v238_v23  ;;  %v96_v8 = vsel %vm95_vm12, %v176_v50, %v92_v3 }
 0x113   :  { %v118_v10 = vmul.f32 %v96_v8, %v240_v24 }
 0x114   :  { %v128_v11 = vmul.f32 %v165_v62, %v120_v7 }
 0x115   :  { %v126_v12 = vmul.f32 %v165_v62, %v118_v10 }
 0x116   :  { %v136_v14 = vadd.f32 %v166_v5, %v128_v11 }
 0x117   :  { %v134_v16 = vadd.f32 %v166_v5, %v126_v12 }
 0x118   :  { %v158_v17 = vpack.c.bf16 %v136_v14, %v135_v13 }
 0x119   :  { %v153_v18 = vpack.c.bf16 %v134_v16, %v133_v15 }
 0x11a   :  { %160 = vst [vmem:[%s265_s3 + $0x8] sm:$0xff] %v158_v17  }
 0x11b   :  { %154 = vst [vmem:[%s265_s3] sm:$0xff] %v153_v18  }
 0x11c   :  { %149 = vsyncpa [#allocation3], 1 }

// kernel: block_forward.8
= control target key start
LH: loop header
LB: loop body
LE: loop exit
PB: predicated region body
PF: predicated region fallthrough
CT: control target
= control target key end

     0   :  { %s658_s1 = inlined_call_operand.vmem [shape: bf16[128,384], index: 1, kind: input, shape index: {}]   ;;  %s659_s0 = inlined_call_operand.vmem [shape: bf16[32,128], index: 0, kind: input, shape index: {}]   ;;  %s660_s2 = inlined_call_operand.vmem [shape: bf16[32,384], index: 2, kind: output, shape index: {}]  }
   0x1   :  { %v425_v0 = vld [vmem:[%s658_s1 + $0xa8] sm:$0xf]  ;;  %v459_v1 = vld [vmem:[%s658_s1 + $0xb0] sm:$0xf0]  ;;  %v458_v2 = vld [vmem:[%s658_s1 + $0xac] sm:$0xf] }
   0x2   :  { %v426_v3 = vor.u32 %v459_v1, %v425_v0  ;;  %v427_v4 = vld [vmem:[%s658_s1 + $0xb4] sm:$0xf0]  ;;  %v433_v5 = vld [vmem:[%s658_s1 + $0xb0] sm:$0xf]  ;;  %v460_v6 = vld [vmem:[%s658_s1 + $0xb8] sm:$0xf0] }
   0x3   :  { %v430_v7 = vor.u32 %v458_v2, %v427_v4  ;;  %v434_v8 = vor.u32 %v460_v6, %v433_v5  ;;  %v413_v9 = vld [vmem:[%s658_s1 + $0x90] sm:$0xf]  ;;  %v456_v10 = vld [vmem:[%s658_s1 + $0x98] sm:$0xf0]  ;;  %v455_v11 = vld [vmem:[%s658_s1 + $0x94] sm:$0xf] }
   0x4   :  { %215 = vmatpush.bf16.msra.mxu0 %v426_v3  ;;  %v414_v12 = vor.u32 %v456_v10, %v413_v9  ;;  %v415_v13 = vld [vmem:[%s658_s1 + $0x9c] sm:$0xf0]  ;;  %v421_v14 = vld [vmem:[%s658_s1 + $0x98] sm:$0xf]  ;;  %v457_v15 = vld [vmem:[%s658_s1 + $0xa0] sm:$0xf0]  ;;  %461 = vmatpush.bf16.msra.mxu3 %v426_v3 }
   0x5   :  { %234 = vmatpush.bf16.msra.mxu1 %v430_v7  ;;  %253 = vmatpush.bf16.msra.mxu2 %v434_v8  ;;  %v418_v16 = vor.u32 %v455_v11, %v415_v13  ;;  %v422_v17 = vor.u32 %v457_v15, %v421_v14  ;;  %v401_v18 = vld [vmem:[%s658_s1 + $0x78] sm:$0xf]  ;;  %v453_v19 = vld [vmem:[%s658_s1 + $0x80] sm:$0xf0]  ;;  %v452_v20 = vld [vmem:[%s658_s1 + $0x7c] sm:$0xf] }
   0x6   :  { %v403_v21 = vld [vmem:[%s658_s1 + $0x84] sm:$0xf0]  ;;  %v409_v22 = vld [vmem:[%s658_s1 + $0x80] sm:$0xf]  ;;  %v454_v23 = vld [vmem:[%s658_s1 + $0x88] sm:$0xf0]  ;;  %v402_v24 = vor.u32 %v453_v19, %v401_v18 }
   0x7   :  { %v406_v25 = vor.u32 %v452_v20, %v403_v21  ;;  %v410_v26 = vor.u32 %v454_v23, %v409_v22  ;;  %v389_v27 = vld [vmem:[%s658_s1 + $0x60] sm:$0xf]  ;;  %v450_v28 = vld [vmem:[%s658_s1 + $0x68] sm:$0xf0]  ;;  %v449_v29 = vld [vmem:[%s658_s1 + $0x64] sm:$0xf] }
   0x8   :  { %216 = vmatpush.bf16.msra.mxu0 %v414_v12  ;;  %462 = vmatpush.bf16.msra.mxu3 %v414_v12  ;;  %v391_v30 = vld [vmem:[%s658_s1 + $0x6c] sm:$0xf0]  ;;  %v397_v31 = vld [vmem:[%s658_s1 + $0x68] sm:$0xf]  ;;  %v451_v32 = vld [vmem:[%s658_s1 + $0x70] sm:$0xf0]  ;;  %v390_v33 = vor.u32 %v450_v28, %v389_v27 }
   0x9   :  { %235 = vmatpush.bf16.msra.mxu1 %v418_v16  ;;  %254 = vmatpush.bf16.msra.mxu2 %v422_v17  ;;  %v394_v34 = vor.u32 %v449_v29, %v391_v30  ;;  %v398_v35 = vor.u32 %v451_v32, %v397_v31  ;;  %v377_v36 = vld [vmem:[%s658_s1 + $0x48] sm:$0xf]  ;;  %v447_v37 = vld [vmem:[%s658_s1 + $0x50] sm:$0xf0]  ;;  %v446_v38 = vld [vmem:[%s658_s1 + $0x4c] sm:$0xf] }
   0xa   :  { %v379_v39 = vld [vmem:[%s658_s1 + $0x54] sm:$0xf0]  ;;  %v385_v40 = vld [vmem:[%s658_s1 + $0x50] sm:$0xf]  ;;  %v448_v41 = vld [vmem:[%s658_s1 + $0x58] sm:$0xf0]  ;;  %v378_v42 = vor.u32 %v447_v37, %v377_v36 }
   0xb   :  { %v382_v43 = vor.u32 %v446_v38, %v379_v39  ;;  %v386_v44 = vor.u32 %v448_v41, %v385_v40  ;;  %v365_v45 = vld [vmem:[%s658_s1 + $0x30] sm:$0xf]  ;;  %v444_v46 = vld [vmem:[%s658_s1 + $0x38] sm:$0xf0]  ;;  %v443_v47 = vld [vmem:[%s658_s1 + $0x34] sm:$0xf] }
   0xc   :  { %217 = vmatpush.bf16.msra.mxu0 %v402_v24  ;;  %463 = vmatpush.bf16.msra.mxu3 %v402_v24  ;;  %v367_v48 = vld [vmem:[%s658_s1 + $0x3c] sm:$0xf0]  ;;  %v373_v49 = vld [vmem:[%s658_s1 + $0x38] sm:$0xf]  ;;  %v445_v50 = vld [vmem:[%s658_s1 + $0x40] sm:$0xf0]  ;;  %v366_v51 = vor.u32 %v444_v46, %v365_v45 }
   0xd   :  { %236 = vmatpush.bf16.msra.mxu1 %v406_v25  ;;  %255 = vmatpush.bf16.msra.mxu2 %v410_v26  ;;  %v370_v52 = vor.u32 %v443_v47, %v367_v48  ;;  %v374_v53 = vor.u32 %v445_v50, %v373_v49  ;;  %v353_v54 = vld [vmem:[%s658_s1 + $0x18] sm:$0xf]  ;;  %v441_v55 = vld [vmem:[%s658_s1 + $0x20] sm:$0xf0]  ;;  %v440_v56 = vld [vmem:[%s658_s1 + $0x1c] sm:$0xf] }
   0xe   :  { %v355_v57 = vld [vmem:[%s658_s1 + $0x24] sm:$0xf0]  ;;  %v361_v58 = vld [vmem:[%s658_s1 + $0x20] sm:$0xf]  ;;  %v442_v59 = vld [vmem:[%s658_s1 + $0x28] sm:$0xf0]  ;;  %v354_v60 = vor.u32 %v441_v55, %v353_v54 }
   0xf   :  { %v358_v61 = vor.u32 %v440_v56, %v355_v57  ;;  %v362_v62 = vor.u32 %v442_v59, %v361_v58  ;;  %v341_v63 = vld [vmem:[%s658_s1] sm:$0xf]  ;;  %v438_v0 = vld [vmem:[%s658_s1 + $0x8] sm:$0xf0]  ;;  %v437_v1 = vld [vmem:[%s658_s1 + $0x4] sm:$0xf] }
  0x10   :  { %218 = vmatpush.bf16.msra.mxu0 %v390_v33  ;;  %464 = vmatpush.bf16.msra.mxu3 %v390_v33  ;;  %v343_v2 = vld [vmem:[%s658_s1 + $0xc] sm:$0xf0]  ;;  %v349_v3 = vld [vmem:[%s658_s1 + $0x8] sm:$0xf]  ;;  %v439_v4 = vld [vmem:[%s658_s1 + $0x10] sm:$0xf0]  ;;  %v342_v5 = vor.u32 %v438_v0, %v341_v63 }
  0x11   :  { %237 = vmatpush.bf16.msra.mxu1 %v394_v34  ;;  %256 = vmatpush.bf16.msra.mxu2 %v398_v35  ;;  %v346_v6 = vor.u32 %v437_v1, %v343_v2  ;;  %v350_v7 = vor.u32 %v439_v4, %v349_v3  ;;  %v435_v8 = vld [vmem:[%s659_s0] sm:$0xff]  ;;  %v436_v9 = vld [vmem:[%s659_s0 + $0x8] sm:$0xff] }
  0x14   :  { %219 = vmatpush.bf16.msra.mxu0 %v378_v42  ;;  %465 = vmatpush.bf16.msra.mxu3 %v378_v42 }
  0x15   :  { %238 = vmatpush.bf16.msra.mxu1 %v382_v43  ;;  %257 = vmatpush.bf16.msra.mxu2 %v386_v44 }
  0x18   :  { %220 = vmatpush.bf16.msra.mxu0 %v366_v51  ;;  %466 = vmatpush.bf16.msra.mxu3 %v366_v51 }
  0x19   :  { %239 = vmatpush.bf16.msra.mxu1 %v370_v52  ;;  %258 = vmatpush.bf16.msra.mxu2 %v374_v53 }
  0x1c   :  { %221 = vmatpush.bf16.msra.mxu0 %v354_v60  ;;  %467 = vmatpush.bf16.msra.mxu3 %v354_v60 }
  0x1d   :  { %240 = vmatpush.bf16.msra.mxu1 %v358_v61  ;;  %259 = vmatpush.bf16.msra.mxu2 %v362_v62 }
  0x20   :  { %222 = vmatpush.bf16.msra.mxu0 %v342_v5  ;;  %468 = vmatpush.bf16.msra.mxu3 %v342_v5 }
  0x21   :  { %241 = vmatpush.bf16.msra.mxu1 %v346_v6  ;;  %260 = vmatpush.bf16.msra.mxu2 %v350_v7 }
  0x23   :  { %223 = vmatmul.bf16.vlgmr.msra.gmra.mxu0 %v435_v8  ;;  %228 = vmatmul.bf16.vlgmr.msra.gmra.mxu3 %v436_v9 }
  0x24   :  { %242 = vmatmul.bf16.vlgmr.msra.gmra.mxu1 %v435_v8  ;;  %261 = vmatmul.bf16.vlgmr.msra.gmra.mxu2 %v435_v8 }
  0x34   :  { %247 = vmatmul.bf16.gmra.mxu1 %v436_v9  ;;  %266 = vmatmul.bf16.gmra.mxu2 %v436_v9 }
  0xa0   :  { %v224_v10 = vpop.f32.mrf.mxu0 }
  0xa1   :  { %v243_v11 = vpop.f32.mrf.mxu1 }
  0xa2   :  { %v311_v12 = vpack.c.bf16 %v243_v11, %v224_v10 }
  0xa4   :  { %319 = vst [vmem:[%s660_s2] sm:$0xff] %v311_v12 }
  0xa6   :  { %v229_v18 = vpop.f32.mrf.mxu3 }
  0xa7   :  { %v262_v13 = vpop.f32.mrf.mxu2 }
  0xa8   :  { %v312_v14 = vpack.c.bf16 %v262_v13, %v262_v13  ;;  %v226_v15 = vpop.f32.mrf.mxu0 }
  0xa9   :  { %v245_v16 = vpop.f32.mrf.mxu1 }
  0xaa   :  { %320 = vst [vmem:[%s660_s2 + $0x8] sm:$0xf] %v312_v14  ;;  %v313_v17 = vpack.c.bf16 %v245_v16, %v226_v15 }
  0xac   :  { %321 = vst [vmem:[%s660_s2 + $0xc] sm:$0xff] %v313_v17 }
  0xae   :  { %v231_v25 = vpop.f32.mrf.mxu3 }
  0xaf   :  { %v264_v19 = vpop.f32.mrf.mxu2 }
  0xb0   :  { %v314_v20 = vpack.c.bf16 %v264_v19, %v264_v19 }
  0xb1   :  { %v248_v21 = vpop.f32.mrf.mxu1 }
  0xb2   :  { %322 = vst [vmem:[%s660_s2 + $0x14] sm:$0xf] %v314_v20  ;;  %v315_v22 = vpack.c.bf16 %v248_v21, %v229_v18 }
  0xb4   :  { %323 = vst [vmem:[%s660_s2 + $0x18] sm:$0xff] %v315_v22 }
  0xb7   :  { %v267_v23 = vpop.f32.mrf.mxu2 }
  0xb8   :  { %v316_v24 = vpack.c.bf16 %v267_v23, %v267_v23 }
  0xb9   :  { %v250_v26 = vpop.f32.mrf.mxu1 }
  0xba   :  { %324 = vst [vmem:[%s660_s2 + $0x20] sm:$0xf] %v316_v24  ;;  %v317_v27 = vpack.c.bf16 %v250_v26, %v231_v25 }
  0xbc   :  { %325 = vst [vmem:[%s660_s2 + $0x24] sm:$0xff] %v317_v27 }
  0xbf   :  { %v269_v28 = vpop.f32.mrf.mxu2 }
  0xc0   :  { %v318_v29 = vpack.c.bf16 %v269_v28, %v269_v28 }
  0xc2   :  { %326 = vst [vmem:[%s660_s2 + $0x2c] sm:$0xf] %v318_v29 }

// kernel: block_forward.10
= control target key start
LH: loop header
LB: loop body
LE: loop exit
PB: predicated region body
PF: predicated region fallthrough
CT: control target
= control target key end

     0   :  { %s937_s15 = smov 0   ;;  %s939_s16 = smov 0   ;;  %s1022_s0 = inlined_call_operand.vmem [shape: bf16[2,4,16,32], index: 0, kind: input, shape index: {}]   ;;  %s1023_s1 = inlined_call_operand.vmem [shape: bf16[2,4,16,32], index: 1, kind: input, shape index: {}]   ;;  %s1024_s2 = inlined_call_operand.vmem [shape: bf16[2,4,16,32], index: 2, kind: input, shape index: {}]   ;;  %s1025_s3 = inlined_call_operand.vmem [shape: f32[2,1,1,16], index: 3, kind: input, shape index: {}]   ;;  %s1026_s4 = inlined_call_operand.vmem [shape: bf16[2,4,16,32], index: 4, kind: output, shape index: {}]  }
   0x1   :  { %s941_s17 = smov 0   ;;  %s943_s18 = smov 0  }
   0x2   :  { %s945_s19 = smov 0  }
   0x3 LB: > { %s36_s20 = sadd.s32 1, %s899_s17  ;;  %s40_s21 = sadd.s32 1, %s903_s18  ;;  %s907_s19 = sphi %s945_s19, %s14_s19   ;;  %s903_s18 = sphi %s943_s18, %s1030_s18   ;;  %s899_s17 = sphi %s941_s17, %s1029_s17   ;;  %s895_s16 = sphi %s939_s16, %s1028_s16   ;;  %s891_s15 = sphi %s937_s15, %s1027_s15  }
   0x4   : > { %p38_p0 = scmp.ge.s32.totalorder %s36_s20, 4  ;;  %p778_p1 = scmp.ge.s32.totalorder %s907_s19, 1 }
   0x5   : > { %p264_p2 = scmp.lt.s32.totalorder %s907_s19, 9 }
   0x6   : > { %s1032_s20 = smov (%p38_p0, %s36_s20), 0  ;;  %s1034_s21 = smov (!%p38_p0, %s40_s21), %s903_s18 }
   0x7   : > { %p265_p3 = pnand %p778_p1, %p264_p2  ;;  %p42_p4 = scmp.ge.s32.totalorder %s1034_s21, 2 }
   0x8   : > { %p339_p5 = scmp.lt.s32.totalorder (!%p265_p3), %s895_s16, 1  ;;  %p341_p6 = scmp.lt.s32.totalorder (!%p265_p3), %s891_s15, 3 }
   0x9   : > { %s1036_s21 = smov (%p42_p4, %s1034_s21), 0  ;;  %268 = sbr.rel (%p265_p3) target bundleno = 665 (0x299), region = 36 }
   0xe   : > { %vm410_vm0 = vcmask 261120   ;;  %v909_v0 = vmov 0.0   ;;  %s1038_s16 = smov (!%p339_p5, %s895_s16), 1  ;;  %s1040_s15 = smov (!%p341_p6, %s891_s15), 3  ;;  %vm405_vm1 = vcmask 7168   ;;  %v910_v4 = vmov -inf  }
   0xf   : > { %411 = vst.msk [vmem:[#allocation4] sm:$0xff] %vm410_vm0, %v909_v0  ;;  %s780_s22 = sshll.u32 %s1038_s16, 3  ;;  %s385_s25 = scalar_lea.vmem %s1025_s3, %s1038_s16  ;;  %v456_v5 = vlaneseq  ;;  %vm478_vm3 = vcmask 130048   ;;  %v911_v18 = vmov 0   ;;  %vm593_vm5 = vcmask 257024  }
  0x10   : > { %412 = vst.msk [vmem:[#allocation4 + $0x8] sm:$0xff] %vm410_vm0, %v909_v0  ;;  %s779_s26 = sshll.u32 %s1040_s15, 1  ;;  %v856_v8 = vld [vmem:[%s385_s25] ss:$0 sm:$0xff]  ;;  %853 = vset.pattern.permute.xlu1 %v911_v18  ;;  %854 = vset.pattern.permute.xlu0 %v911_v18 }
  0x11   : > { %s348_s27 = sadd.s32 %s780_s22, %s779_s26  ;;  %406 = vst.msk [vmem:[#allocation2] sm:$0xff] %vm405_vm1, %v910_v4  ;;  %v457_v6 = vshrl.u32 %v456_v5, 7  ;;  %v463_v7 = vand.u32 127, %v456_v5  ;;  %855 = vset.pattern.permute.xlu2 %v911_v18 }
  0x12   : > { %s972_s28 = sshll.u32 %s348_s27, 2  ;;  %407 = vst.msk [vmem:[#allocation2 + $0x8] sm:$0xff] %vm405_vm1, %v910_v4 }
  0x13   : > { %s364_s5 = scalar_lea.vmem %s1023_s1, %s972_s28  ;;  %s350_s8 = scalar_lea.vmem %s1022_s0, %s972_s28  ;;  %408 = vst.msk [vmem:[#allocation3] sm:$0xff] %vm405_vm1, %v909_v0  ;;  %vm466_vm2 = vcmp.ge.s32.totalorder %v457_v6, %v463_v7  ;;  %v458_v12 = vadd.s32 8, %v457_v6 }
  0x14   : > { %v808_v1 = vld [vmem:[%s364_s5] sm:$0xff]  ;;  %409 = vst.msk [vmem:[#allocation3 + $0x8] sm:$0xff] %vm405_vm1, %v909_v0  ;;  %s378_s11 = scalar_lea.vmem %s1024_s2, %s972_s28  ;;  %s398_s14 = scalar_lea.vmem %s1026_s4, %s972_s28 }
  0x15   : > { %v439_v2 = vsel %vm410_vm0, %v808_v1, 0  ;;  %v807_v3 = vld [vmem:[%s350_s8] sm:$0xff]  ;;  %vm467_vm4 = vcmp.ge.s32.totalorder %v458_v12, %v463_v7 }
  0x16   : > { %448 = vmatpush.bf16.xpose.msra.mxu0 %v439_v2  ;;  %v809_v31 = vld [vmem:[%s378_s11] sm:$0xff] }
  0x17   : > { %557 = vmatpush.bf16.msra.mxu1 %v809_v31  ;;  %v524_v52 = vld [vmem:[#allocation4] sm:$0xff]  ;;  %v525_v59 = vld [vmem:[#allocation4 + $0x8] sm:$0xff] }
  0x18   : > { %v476_v19 = vld [vmem:[#allocation2] sm:$0xff] }
  0x19   : > { %v477_v24 = vld [vmem:[#allocation2 + $0x8] sm:$0xff] }
  0x1a   : > { %v509_v43 = vld [vmem:[#allocation3] sm:$0xff] }
  0x1b   : > { %v510_v47 = vld [vmem:[#allocation3 + $0x8] sm:$0xff] }
  0x1d   : > { %799 = vmatmul.msk.bf16.vlgmr.msra.gmra.mxu0 %vm410_vm0, %v807_v3 }
  0x9a   : > { %v450_v9 = vpop.f32.mrf.mxu0 }
  0x9b   : > { %v468_v10 = vsel %vm466_vm2, %v450_v9, -1e+30 }
  0x9c   : > { %v474_v11 = vadd.f32 %v856_v8, %v468_v10 }
  0x9e   : > { %v479_v13 = vsel %vm478_vm3, %v474_v11, -inf }
  0x9f   : > { %480 = vmax.xlane.f32.xlu0 %v479_v13 }
  0xa2   : > { %v452_v14 = vpop.f32.mrf.mxu0 }
  0xa3   : > { %v469_v15 = vsel %vm467_vm4, %v452_v14, -1e+30 }
  0xa4   : > { %v475_v16 = vadd.f32 %v856_v8, %v469_v15 }
  0xa6   : > { %v482_v17 = vsel %vm478_vm3, %v475_v16, -inf }
  0xa7   : > { %483 = vmax.xlane.f32.xlu0 %v482_v17 }
 0x112   : > { %v481_v20 = vpop.xlane.xlu0 %480 }
 0x113   : > { %v485_v21 = vmax.f32 %v476_v19, %v481_v20 }
 0x115   : > { %v487_v22 = vsub.f32 %v476_v19, %v485_v21  ;;  %568 = vst.msk [vmem:[#allocation2] sm:$0xff] %vm405_vm1, %v485_v21  ;;  %495 = vperm.xlu1 %853, %v485_v21  }
 0x117   : > { %v489_v23 = vmul.f32 1.442695, %v487_v22 }
 0x119   : > { %857 = vpow2.f32 %v489_v23 }
 0x11a   : > { %v484_v25 = vpop.xlane.xlu0 %483 }
 0x11b   : > { %v486_v26 = vmax.f32 %v477_v24, %v484_v25 }
 0x11d   : > { %v488_v27 = vsub.f32 %v477_v24, %v486_v26  ;;  %569 = vst.msk [vmem:[#allocation2 + $0x8] sm:$0xff] %vm405_vm1, %v486_v26  ;;  %500 = vperm.xlu1 %853, %v486_v26  }
 0x11f   : > { %v858_v28 = vpop.eup %857  ;;  %v491_v29 = vmul.f32 1.442695, %v488_v27 }
 0x120   : > { %528 = vperm.xlu0 %854, %v858_v28   ;;  %v511_v44 = vmul.f32 %v858_v28, %v509_v43 }
 0x121   : > { %859 = vpow2.f32 %v491_v29 }
 0x127   : > { %v860_v30 = vpop.eup %859 }
 0x128   : > { %533 = vperm.xlu1 %853, %v860_v30   ;;  %v512_v48 = vmul.f32 %v860_v30, %v510_v47 }
 0x187   : > { %v496_v32 = vpop.permute.xlu1 %495 }
 0x188   : > { %v503_v33 = vsub.f32 %v474_v11, %v496_v32 }
 0x18a   : > { %v505_v34 = vmul.f32 1.442695, %v503_v33 }
 0x18c   : > { %861 = vpow2.f32 %v505_v34 }
 0x18f   : > { %v501_v35 = vpop.permute.xlu1 %500 }
 0x190   : > { %v504_v36 = vsub.f32 %v475_v16, %v501_v35 }
 0x192   : > { %v862_v37 = vpop.eup %861  ;;  %v507_v38 = vmul.f32 1.442695, %v504_v36  ;;  %v529_v53 = vpop.permute.xlu0 %528 }
 0x193   : > { %v513_v39 = vsel %vm478_vm3, %v862_v37, 0.0  ;;  %v536_v55 = vmul.f32 %v529_v53, %v524_v52 }
 0x194   : > { %863 = vpow2.f32 %v507_v38  ;;  %514 = vadd.xlane.f32.xlu2 %v513_v39 }
 0x19a   : > { %v864_v40 = vpop.eup %863  ;;  %v534_v60 = vpop.permute.xlu1 %533 }
 0x19b   : > { %v516_v41 = vsel %vm478_vm3, %v864_v40, 0.0  ;;  %v538_v42 = vpack.c.bf16 %v864_v40, %v862_v37  ;;  %v537_v62 = vmul.f32 %v534_v60, %v525_v59 }
 0x19c   : > { %517 = vadd.xlane.f32.xlu2 %v516_v41 }
 0x19d   : > { %804 = vmatmul.msk.bf16.vlgmr.msra.gmra.mxu1 %vm478_vm3, %v538_v42 }
 0x207   : > { %v515_v45 = vpop.xlane.xlu2 %514 }
 0x208   : > { %v519_v46 = vadd.f32 %v515_v45, %v511_v44 }
 0x20a   : > { %522 = vst.msk [vmem:[#allocation3] sm:$0xff] %vm405_vm1, %v519_v46 }
 0x20f   : > { %v518_v49 = vpop.xlane.xlu2 %517 }
 0x210   : > { %v520_v50 = vadd.f32 %v518_v49, %v512_v48 }
 0x211   : > { %v575_v51 = vld [vmem:[#allocation3] sm:$0xff] }
 0x212   : > { %523 = vst.msk [vmem:[#allocation3 + $0x8] sm:$0xff] %vm405_vm1, %v520_v50  ;;  %865 = vrcp.f32 %v575_v51 }
 0x218   : > { %v866_v54 = vpop.eup %865 }
 0x219   : > { %581 = vperm.xlu2 %855, %v866_v54   ;;  %v576_v56 = vld [vmem:[#allocation3 + $0x8] sm:$0xff] }
 0x21a   : > { %v559_v57 = vpop.f32.mrf.mxu1  ;;  %867 = vrcp.f32 %v576_v56 }
 0x21b   : > { %v564_v58 = vadd.f32 %v559_v57, %v536_v55 }
 0x21d   : > { %566 = vst.msk [vmem:[#allocation4] sm:$0xff] %vm410_vm0, %v564_v58 }
 0x220   : > { %v868_v61 = vpop.eup %867 }
 0x221   : > { %586 = vperm.xlu1 %853, %v868_v61  }
 0x222   : > { %v561_v63 = vpop.f32.mrf.mxu1 }
 0x223   : > { %v565_v0 = vadd.f32 %v561_v63, %v537_v62 }
 0x224   : > { %v573_v2 = vld [vmem:[#allocation4] sm:$0xff] }
 0x225   : > { %567 = vst.msk [vmem:[#allocation4 + $0x8] sm:$0xff] %vm410_vm0, %v565_v0 }
 0x22c   : > { %v574_v5 = vld [vmem:[#allocation4 + $0x8] sm:$0xff] }
 0x273   : > { %v582_v1 = vpop.permute.xlu2 %581 }
 0x274   : > { %v589_v3 = vmul.f32 %v582_v1, %v573_v2 }
 0x276   : > { %v591_v4 = vpack.c.bf16 %v589_v3, %v589_v3 }
 0x278   : > { %594 = vst.msk [vmem:[%s398_s14] sm:$0xf] %vm593_vm5, %v591_v4 }
 0x293   : > { %v587_v6 = vpop.permute.xlu1 %586 }
 0x294   : > { %v590_v7 = vmul.f32 %v587_v6, %v574_v5 }
 0x296   : > { %v592_v8 = vpack.c.bf16 %v590_v7, %v590_v7 }
 0x298   : > { %595 = vst.msk [vmem:[%s398_s14 + $0x4] sm:$0xf] %vm593_vm5, %v592_v8 }
 0x299 PF: > { %s14_s19 = sadd.s32 1, %s907_s19   ;;  %s1027_s15 = smov %s899_s17 }
 0x29a   : > { %p11_p7 = scmp.ge.s32.totalorder %s14_s19, 10   ;;  %s1028_s16 = smov %s903_s18 }
 0x29b   : > { %s1029_s17 = smov %s1032_s20  ;;  %s1030_s18 = smov %s1036_s21 }
 0x29c   :  { %13 = sbr.rel (!%p11_p7) target bundleno = 3 (0x3), region = 87 }

// kernel: block_forward.9
= control target key start
LH: loop header
LB: loop body
LE: loop exit
PB: predicated region body
PF: predicated region fallthrough
CT: control target
= control target key end

     0   :  { %s2393_s0 = inlined_call_operand.vmem [shape: bf16[2,16,384], index: 0, kind: input, shape index: {}]   ;;  %s2394_s1 = inlined_call_operand.vmem [shape: f32[2,16,16], index: 1, kind: input, shape index: {}]   ;;  %s2395_s2 = inlined_call_operand.vmem [shape: f32[2,16,16], index: 2, kind: input, shape index: {}]   ;;  %s2396_s3 = inlined_call_operand.vmem [shape: bf16[2,4,16,32], index: 3, kind: output, shape index: {0}]   ;;  %s2397_s4 = inlined_call_operand.vmem [shape: bf16[2,4,16,32], index: 4, kind: output, shape index: {1}]   ;;  %s2398_s5 = inlined_call_operand.vmem [shape: bf16[2,4,16,32], index: 5, kind: output, shape index: {2}]   ;;  %s2399_s6 = inlined_call_operand.hbm [shape: f32[2,4,16,32], index: 6, kind: output, shape index: {3}]   ;;  %s2400_s7 = inlined_call_operand.hbm [shape: f32[2,4,16,32], index: 7, kind: output, shape index: {4}]  }
   0x1   :  { %2406 = sst [smem:[#allocation8_spill]] %s2393_s0 }
   0x2   :  { %2407 = sst [smem:[#allocation9_spill]] %s2394_s1 }
   0x3   :  { %2408 = sst [smem:[#allocation10_spill]] %s2395_s2 }
   0x4   :  { %2409 = sst [smem:[#allocation11_spill]] %s2396_s3 }
   0x5   :  { %13 = vsyncpa [#allocation3], 0 }
   0x6   :  { %15 = vsyncpa [#allocation3 + $0x1], 0 }
   0x7   :  { %16 = vsyncpa [#allocation5], 0 }
   0x8   :  { %18 = vsyncpa [#allocation5 + $0x1], 0  ;;  %s1858_s24 = smov 0   ;;  %s1860_s25 = smov 0  }
   0x9   :  { %s1862_s26 = smov 0   ;;  %s1864_s27 = smov 0  }
   0xa   :  { %s1866_s28 = smov 0   ;;  %s1868_s29 = smov 0  }
   0xb LB: > { %s1491_s30 = sadd.s32 4294967295, %s1810_s29   ;;  %s1492_s8 = sadd.s32 4294967294, %s1810_s29   ;;  %s1810_s29 = sphi %s1868_s29, %s24_s29   ;;  %s1806_s28 = sphi %s1866_s28, %s2429_s28   ;;  %s1802_s27 = sphi %s1864_s27, %s2428_s27   ;;  %s1798_s26 = sphi %s1862_s26, %s2427_s26   ;;  %s1794_s25 = sphi %s1860_s25, %s2426_s25   ;;  %s1790_s24 = sphi %s1858_s24, %s2425_s24  }
   0xc   : > { %s36_s9 = sadd.s32 1, %s1806_s28  ;;  %s213_s10 = sadd.s32 1, %s1798_s26 }
   0xd   : > { %p38_p0 = scmp.ge.s32.totalorder %s36_s9, 2  ;;  %p223_p1 = scmp.ne.s32.totalorder %s1798_s26, %s1794_s25 }
   0xe   : > { %p224_p2 = scmp.eq.s32.totalorder %s1491_s30, 1  ;;  %p229_p3 = scmp.ne.s32.totalorder %s1794_s25, %s1790_s24 }
   0xf   : > { %s2431_s9 = smov (%p38_p0, %s36_s9), 0  ;;  %p230_p5 = scmp.eq.s32.totalorder %s1492_s8, 1 }
  0x10   : > { %p1898_p4 = por %p224_p2, %p223_p1  ;;  %s208_s12 = ssub.s32 %s1806_s28, %s2431_s9 }
  0x11   : > { %p1495_p6 = scmp.ge.s32.totalorder %s1810_s29, 1  ;;  %p211_p7 = scmp.eq.s32.totalorder %s208_s12, 0 }
  0x12   : > { %p1905_p8 = por %p230_p5, %p229_p3  ;;  %p316_p9 = scmp.lt.s32.totalorder %s1810_s29, 3 }
  0x13   : > { %s1911_s14 = scalar_select %p211_p7, %s1798_s26, %s213_s10  }
  0x14   : > { %p317_p10 = pnand %p1495_p6, %p316_p9 }
  0x15   : > { %p404_p11 = scmp.lt.s32.totalorder (!%p317_p10), %s1802_s27, 1  ;;  %s2412_s0 = sld [smem:[#allocation8_spill]] (!%p317_p10) }
  0x16   : > { %320 = sbr.rel (%p317_p10) target bundleno = 558 (0x22e), region = 32  ;;  %s2403_s20 = smov (!%p317_p10), 32  }
  0x17   : > { %s2401_s21 = smov (!%p317_p10), 96   ;;  %s1815_s22 = smov (!%p317_p10), 64  }
  0x18   : > { %s2419_s2 = sld [smem:[#allocation10_spill]] (!%p317_p10)  ;;  %s2058_s18 = sand.u32 (!%p317_p10), 1, %s1794_s25  }
  0x19   : > { %s2420_s1 = sld [smem:[#allocation9_spill]] (!%p317_p10)  ;;  %s2422_s8 = smov (!%p317_p10), 32  }
  0x1a   : > { %s2421_s3 = sld [smem:[#allocation11_spill]] (!%p317_p10) }
  0x1b   : > { %v470_v0 = vlaneseq  ;;  %s1915_s15 = scalar_select %p404_p11, %s1802_s27, 1  ;;  %v1814_v25 = vmov 0.0   ;;  %vm533_vm12 = vcmask 130048   ;;  %vm619_vm13 = vcmask 261120  }
  0x1c   : > { %vm610_vm14 = vcmask 257024  }
  0x1d   : > { %v471_v1 = vshrl.u32 %v470_v0, 7  ;;  %s1588_s16 = smul.u32 24, %s1915_s15  ;;  %v474_v6 = vand.u32 127, %v470_v0  ;;  %s1565_s23 = sshll.u32 %s1915_s15, 4 }
  0x1e   : > { %s432_s10 = scalar_lea.vmem %s2419_s2, %s1565_s23  ;;  %s2079_s30 = sshll.u32 %s1915_s15, 5 }
  0x1f   : > { %v472_v2 = vadd.s32 8, %v471_v1  ;;  %v1509_v3 = vadd.s32 4294967295, %v471_v1  ;;  %v483_v4 = vand.u32 1, %v471_v1  ;;  %v507_v5 = vadd.s32 1, %v471_v1  ;;  %s1921_s19 = scalar_lea.vmem %s2412_s0, %s1588_s16  ;;  %v2000_v37 = vld [vmem:[%s432_s10 + $0x8] sm:$0xff]  ;;  %v468_v39 = vld [vmem:[%s432_s10] sm:$0xff]  ;;  %s2051_s17 = scalar_lea.vmem %s2420_s1, %s1565_s23 }
  0x20   : > { %v1585_v10 = vld [vmem:[%s1921_s19] sm:$0xff]   ;;  %v1925_v11 = vld [vmem:[%s1921_s19 + $0xc] sm:$0xff]   ;;  %v632_v38 = vld [vmem:[%s1921_s19 + $0x8] sm:$0xf]  ;;  %s1496_s23 = sshll.u32 %s2058_s18, 6  ;;  %s2095_s10 = scalar_lea.vmem %s2397_s4, %s2079_s30 }
  0x21   : > { %v1510_v7 = vadd.s32 4294967295, %v472_v2  ;;  %v490_v8 = vand.u32 1, %v472_v2  ;;  %v508_v9 = vadd.s32 1, %v472_v2  ;;  %vm477_vm0 = vcmp.eq.s32.totalorder %v474_v6, %v1509_v3  ;;  %v1932_v14 = vld [vmem:[%s1921_s19 + $0xc] sm:$0xff]   ;;  %v633_v40 = vld [vmem:[%s1921_s19 + $0x14] sm:$0xf]  ;;  %s2152_s15 = scalar_lea.vmem %s2398_s5, %s2079_s30 }
  0x22   : > { %vm503_vm1 = vcmp.eq.s32.totalorder %v483_v4, 1  ;;  %vm509_vm2 = vcmp.eq.s32.totalorder %v474_v6, %v507_v5  ;;  %vm511_vm3 = vcmp.eq.s32.totalorder %v483_v4, 0  ;;  %v1927_v12 = vunpack.c.l.bf16 %v1585_v10  ;;  %v1943_v19 = vld [vmem:[%s1921_s19 + $0xc] sm:$0xff]   ;;  %v2061_v56 = vld [vmem:[%s2051_s17] sm:$0xff]  ;;  %s2101_s12 = scalar_lea.vmem [#allocation2], %s1496_s23 }
  0x23   : > { %v1929_v13 = vunpack.c.h.bf16 %v1585_v10  ;;  %v975_v15 = vunpack.c.l.bf16 %v1925_v11  ;;  %v979_v16 = vunpack.c.h.bf16 %v1925_v11  ;;  %vm1936_vm4 = vmand %vm509_vm2, %vm511_vm3  ;;  %vm478_vm5 = vcmp.eq.s32.totalorder %v474_v6, %v1510_v7  ;;  %v520_v34 = vld [vmem:[%s1921_s19 + $0xc] sm:$0xff]  }
  0x24   : > { %vm504_vm6 = vcmp.eq.s32.totalorder %v490_v8, 1  ;;  %vm1945_vm7 = vmand %vm477_vm0, %vm503_vm1  ;;  %vm510_vm9 = vcmp.eq.s32.totalorder %v474_v6, %v508_v9  ;;  %vm512_vm10 = vcmp.eq.s32.totalorder %v490_v8, 0  ;;  %v627_v23 = vunpack.c.l.bf16 %v1932_v14 }
  0x25   : > { %v1665_v18 = vpack.i.bf16 %v1929_v13, %v1927_v12  ;;  %v1675_v21 = vpack.i.bf16 %v979_v16, %v975_v15  ;;  %vm1953_vm8 = vmand %vm478_vm5, %vm504_vm6  ;;  %v631_v24 = vunpack.c.h.bf16 %v1932_v14  ;;  %v515_v26 = vsel %vm1936_vm4, 1.0, %v1814_v25 }
  0x26   : > { %vm514_vm11 = vmand %vm510_vm9, %vm512_vm10  ;;  %v802_v27 = vunpack.c.l.bf16 %v1943_v19  ;;  %v806_v28 = vunpack.c.h.bf16 %v1943_v19  ;;  %v517_v31 = vsel %vm1945_vm7, -1.0, %v515_v26  ;;  %v1986_v35 = vunpack.c.l.bf16 %v520_v34 }
  0x27   : > { %1666 = vrot.lane.b32.xlu1 %v1665_v18, %s2403_s20  ;;  %1656 = vrot.lane.b32.xlu0 %v1665_v18, %s2401_s21  ;;  %v516_v29 = vsel %vm514_vm11, 1.0, %v1814_v25  ;;  %v1660_v32 = vpack.i.bf16 %v631_v24, %v627_v23  ;;  %v1988_v36 = vunpack.c.h.bf16 %v520_v34  ;;  %v634_v41 = vunpack.c.l.bf16 %v632_v38 }
  0x28   : > { %1676 = vrot.lane.b32.xlu2 %v1675_v21, %s2403_s20  ;;  %v518_v30 = vsel %vm1953_vm8, -1.0, %v516_v29  ;;  %v1680_v33 = vpack.i.bf16 %v806_v28, %v802_v27  ;;  %v635_v42 = vunpack.c.l.bf16 %v633_v40  ;;  %v531_v59 = vmul.f32 %v1927_v12, %v468_v39 }
  0x29   : > { %554 = vmatpush.msra.mxu0 %v518_v30  ;;  %593 = vmatpush.msra.mxu1 %v518_v30  ;;  %v571_v60 = vmul.f32 %v1929_v13, %v468_v39  ;;  %v532_v20 = vmul.f32 %v1986_v35, %v2000_v37  ;;  %v572_v21 = vmul.f32 %v1988_v36, %v2000_v37 }
  0x2a   : > { %670 = vmatpush.msra.mxu2 %v518_v30  ;;  %731 = vmatpush.msra.mxu3 %v518_v30  ;;  %v1685_v47 = vpack.i.bf16 %v635_v42, %v634_v41 }
  0x2b   : > { %555 = vmatpush.msra.mxu0 %v517_v31  ;;  %594 = vmatpush.msra.mxu1 %v517_v31 }
  0x2c   : > { %1511 = vmatmul.msk.f32.vlgmr.msra.gmra.mxu0 %vm533_vm12, %v1927_v12  ;;  %1513 = vmatmul.msk.f32.vlgmr.msra.gmra.mxu1 %vm533_vm12, %v1929_v13 }
  0x2d   : > { %904 = vmatpush.msrb.mxu1 %v518_v30  ;;  %671 = vmatpush.msra.mxu2 %v517_v31 }
  0x2e   : > { %732 = vmatpush.msra.mxu3 %v517_v31  ;;  %843 = vmatpush.msrb.mxu0 %v518_v30 }
  0x2f   : > { %1671 = vrot.lane.b32.xlu1 %v1665_v18, %s1815_s22  ;;  %1661 = vrot.lane.b32.xlu0 %v1660_v32, %s2401_s21  ;;  %v2124_v18 = vld [vmem:[%s2051_s17 + $0x8] sm:$0xff] }
  0x30   : > { %1681 = vrot.lane.b32.xlu2 %v1680_v33, %s1815_s22  ;;  %905 = vmatpush.msrb.mxu1 %v517_v31 }
  0x31   : > { %1016 = vmatpush.msrb.mxu2 %v518_v30  ;;  %1077 = vmatpush.msrb.mxu3 %v518_v30 }
  0x32   : > { %844 = vmatpush.msrb.mxu0 %v517_v31 }
  0x33   : > { %1017 = vmatpush.msrb.mxu2 %v517_v31  ;;  %1078 = vmatpush.msrb.mxu3 %v517_v31 }
  0x34   : > { %1512 = vmatmul.msk.f32.gmra.mxu0 %vm533_vm12, %v1986_v35  ;;  %1514 = vmatmul.msk.f32.gmra.mxu1 %vm533_vm12, %v1988_v36 }
  0x37   : > { %640 = vrot.lane.b32.xlu1 %v2000_v37, %s2403_s20  ;;  %638 = vrot.lane.b32.xlu0 %v468_v39, %s2403_s20  ;;  %s2109_s20 = scalar_lea.vmem %s2421_s3, %s2079_s30  ;;  %s2165_s30 = scalar_lea.vmem [#allocation4], %s1496_s23 }
  0x38   : > { %778 = vrot.lane.b32.xlu2 %v633_v40, %s2401_s21  ;;  %s2423_s23 = smov 96   ;;  %s1223_s17 = sshll.u32 %s2165_s30, 4  ;;  %s1224_s17 = int_to_ptr.vmem [resolvable:$true] %s1223_s17 }
  0x3f   : > { %776 = vrot.lane.b32.xlu1 %v632_v38, %s2401_s21  ;;  %1686 = vrot.lane.b32.xlu0 %v1685_v47, %s2401_s21 }
  0x40   : > { %813 = vrot.lane.b32.xlu2 %v2000_v37, %s1815_s22 }
  0x47   : > { %811 = vrot.lane.b32.xlu1 %v468_v39, %s1815_s22  ;;  %984 = vrot.lane.b32.xlu0 %v468_v39, %s2401_s21 }
  0x4f   : > { %986 = vrot.lane.b32.xlu1 %v2000_v37, %s2401_s21 }
  0x82   : > { %v2020_v48 = vpop.permute.xlu2 %1676 }
  0x83   : > { %v1679_v9 = vunpack.i.h.bf16 %v2020_v48  ;;  %v1678_v10 = vunpack.i.l.bf16 %v2020_v48 }
  0x8a   : > { %v2053_v55 = vpop.permute.xlu2 %1681 }
  0x8b   : > { %v1684_v57 = vunpack.i.h.bf16 %v2053_v55  ;;  %v1683_v58 = vunpack.i.l.bf16 %v2053_v55 }
  0x99   : > { %v2008_v43 = vpop.permute.xlu1 %1666  ;;  %v2010_v44 = vpop.permute.xlu0 %1656 }
  0x9a   : > { %v1659_v45 = vunpack.i.h.bf16 %v2010_v44  ;;  %v1658_v46 = vunpack.i.l.bf16 %v2010_v44  ;;  %v1669_v61 = vunpack.i.h.bf16 %v2008_v43  ;;  %v1668_v62 = vunpack.i.l.bf16 %v2008_v43 }
  0x9c   : > { %1515 = vmatmul.msk.f32.vlgmr.msra.gmra.mxu2 %vm533_vm12, %v1658_v46  ;;  %1517 = vmatmul.msk.f32.vlgmr.msra.gmra.mxu3 %vm533_vm12, %v1659_v45 }
  0xa1   : > { %v2026_v49 = vpop.permute.xlu1 %1671  ;;  %v2028_v50 = vpop.permute.xlu0 %1661 }
  0xa2   : > { %v1674_v51 = vunpack.i.h.bf16 %v2026_v49  ;;  %v1673_v52 = vunpack.i.l.bf16 %v2026_v49  ;;  %v1664_v53 = vunpack.i.h.bf16 %v2028_v50  ;;  %v1663_v54 = vunpack.i.l.bf16 %v2028_v50 }
  0xa4   : > { %1516 = vmatmul.msk.f32.gmra.mxu2 %vm533_vm12, %v1663_v54  ;;  %1518 = vmatmul.msk.f32.gmra.mxu3 %vm533_vm12, %v1664_v53 }
  0xa5   : > { %1529 = vmatmul.msk.f32.vlgmr.msrb.gmra.mxu0 %vm533_vm12, %v1673_v52  ;;  %1531 = vmatmul.msk.f32.vlgmr.msrb.gmra.mxu1 %vm533_vm12, %v1674_v51 }
  0xa9   : > { %v557_v63 = vpop.f32.mrf.mxu0  ;;  %v596_v0 = vpop.f32.mrf.mxu1 }
  0xaa   : > { %v563_v1 = vmul.f32 %v557_v63, %v2061_v56  ;;  %v602_v2 = vmul.f32 %v596_v0, %v2061_v56  ;;  %v2146_v47 = vpop.permute.xlu1 %640  ;;  %v779_v63 = vpop.permute.xlu2 %778 }
  0xab   : > { %1524 = vst.msk [vmem:[%s2152_s15 + $0xc] sm:$0xf] %vm610_vm14, %v779_v63 }
  0xac   : > { %1543 = vmatmul.msk.f32.vlgmr.msrb.gmra.mxu2 %vm533_vm12, %v1668_v62  ;;  %1545 = vmatmul.msk.f32.vlgmr.msrb.gmra.mxu3 %vm533_vm12, %v1669_v61  ;;  %v565_v3 = vadd.f32 %v563_v1, %v531_v59  ;;  %v604_v4 = vadd.f32 %v602_v2, %v571_v60  ;;  %v527_v59 = vld [vmem:[%s1921_s19 + $0x8] sm:$0xf]  ;;  %v528_v60 = vld [vmem:[%s1921_s19 + $0x14] sm:$0xf] }
  0xad   : > { %1530 = vmatmul.msk.f32.gmra.mxu0 %vm533_vm12, %v1683_v58  ;;  %1532 = vmatmul.msk.f32.gmra.mxu1 %vm533_vm12, %v1684_v57  ;;  %v529_v0 = vunpack.c.l.bf16 %v527_v59  ;;  %v530_v1 = vunpack.c.l.bf16 %v528_v60  ;;  %617 = vst.msk [vmem:[%s2152_s15] sm:$0xf] %vm610_vm14, %v527_v59  ;;  %v807_v59 = vld [vmem:[%s1921_s19 + $0x8] sm:$0xf] }
  0xae   : > { %v567_v5 = vsel %vm533_vm12, %v565_v3, %v1927_v12  ;;  %v606_v6 = vsel %vm533_vm12, %v604_v4, %v1929_v13  ;;  %618 = vst.msk [vmem:[%s2152_s15 + $0x4] sm:$0xf] %vm610_vm14, %v528_v60  ;;  %v809_v63 = vunpack.c.l.bf16 %v807_v59 }
  0xaf   : > { %v569_v7 = vmul.f32 0.17677669, %v567_v5  ;;  %v613_v8 = vpack.c.bf16 %v606_v6, %v606_v6  ;;  %620 = vst.msk [vmem:[%s2101_s12] sm:$0xff] %vm619_vm13, %v606_v6 }
  0xb0   : > { %622 = vst.msk [vmem:[%s2165_s30] sm:$0xff] %vm619_vm13, %v529_v0  ;;  %v808_v0 = vld [vmem:[%s1921_s19 + $0x14] sm:$0xf] }
  0xb1   : > { %v608_v17 = vpack.c.bf16 %v569_v7, %v569_v7  ;;  %615 = vst.msk [vmem:[%s2095_s10] sm:$0xf] %vm610_vm14, %v613_v8  ;;  %v560_v22 = vpop.f32.mrf.mxu0  ;;  %v599_v25 = vpop.f32.mrf.mxu1 }
  0xb2   : > { %v564_v26 = vmul.f32 %v560_v22, %v2124_v18  ;;  %v603_v29 = vmul.f32 %v599_v25, %v2124_v18  ;;  %623 = vst.msk [vmem:[%s2165_s30 + $0x8] sm:$0xff] %vm619_vm13, %v530_v1  ;;  %v777_v8 = vpop.permute.xlu1 %776  ;;  %v814_v60 = vpop.permute.xlu2 %813  ;;  %v810_v1 = vunpack.c.l.bf16 %v808_v0 }
  0xb3   : > { %611 = vst.msk [vmem:[%s2109_s20] sm:$0xf] %vm610_vm14, %v608_v17 }
  0xb4   : > { %1544 = vmatmul.msk.f32.gmra.mxu2 %vm533_vm12, %v1678_v10  ;;  %1546 = vmatmul.msk.f32.gmra.mxu3 %vm533_vm12, %v1679_v9  ;;  %v566_v30 = vadd.f32 %v564_v26, %v532_v20  ;;  %v605_v31 = vadd.f32 %v603_v29, %v572_v21  ;;  %1523 = vst.msk [vmem:[%s2152_s15 + $0x8] sm:$0xf] %vm610_vm14, %v777_v8 }
  0xb6   : > { %v568_v32 = vsel %vm533_vm12, %v566_v30, %v1986_v35  ;;  %v607_v33 = vsel %vm533_vm12, %v605_v31, %v1988_v36  ;;  %v980_v30 = vld [vmem:[%s1921_s19 + $0x8] sm:$0xf]  ;;  %v2186_v31 = vld [vmem:[%s1921_s19 + $0x14] sm:$0xf]  ;;  %s2405_s19 = sshll.u32 %s1802_s27, 6 }
  0xb7   : > { %v570_v34 = vmul.f32 0.17677669, %v568_v32  ;;  %v614_v38 = vpack.c.bf16 %v607_v33, %v607_v33  ;;  %621 = vst.msk [vmem:[%s2101_s12 + $0x8] sm:$0xff] %vm619_vm13, %v607_v33 }
  0xb9   : > { %v609_v37 = vpack.c.bf16 %v570_v34, %v570_v34  ;;  %616 = vst.msk [vmem:[%s2095_s10 + $0x4] sm:$0xf] %vm610_vm14, %v614_v38  ;;  %v982_v38 = vunpack.c.l.bf16 %v980_v30 }
  0xbb   : > { %612 = vst.msk [vmem:[%s2109_s20 + $0x4] sm:$0xf] %vm610_vm14, %v609_v37  ;;  %v983_v37 = vunpack.c.l.bf16 %v2186_v31 }
 0x11f   : > { %v673_v39 = vpop.f32.mrf.mxu2  ;;  %v734_v40 = vpop.f32.mrf.mxu3 }
 0x120   : > { %v740_v4 = vmul.f32 %v734_v40, %v2061_v56  ;;  %v679_v5 = vmul.f32 %v673_v39, %v2061_v56  ;;  %v1695_v40 = vpack.i.bf16 %v983_v37, %v982_v38  ;;  %v879_v37 = vmul.f32 %v814_v60, %v806_v28 }
 0x122   : > { %v846_v41 = vpop.f32.mrf.mxu0  ;;  %v907_v42 = vpop.f32.mrf.mxu1 }
 0x123   : > { %v852_v35 = vmul.f32 %v846_v41, %v2061_v56  ;;  %v913_v36 = vmul.f32 %v907_v42, %v2061_v56 }
 0x125   : > { %917 = vrot.lane.b32.xlu0 %v913_v36, %s1815_s22  ;;  %856 = vrot.lane.b32.xlu2 %v852_v35, %s1815_s22 }
 0x127   : > { %v676_v2 = vpop.f32.mrf.mxu2  ;;  %v737_v3 = vpop.f32.mrf.mxu3 }
 0x128   : > { %v741_v21 = vmul.f32 %v737_v3, %v2124_v18  ;;  %v680_v32 = vmul.f32 %v676_v2, %v2124_v18  ;;  %v1690_v2 = vpack.i.bf16 %v810_v1, %v809_v63  ;;  %v645_v63 = vmul.f32 %v2146_v47, %v627_v23 }
 0x12a   : > { %v910_v6 = vpop.f32.mrf.mxu1  ;;  %v849_v20 = vpop.f32.mrf.mxu0 }
 0x12b   : > { %v914_v7 = vmul.f32 %v910_v6, %v2124_v18  ;;  %v853_v25 = vmul.f32 %v849_v20, %v2124_v18 }
 0x12d   : > { %744 = vrot.lane.b32.xlu0 %v740_v4, %s2422_s8  ;;  %919 = vrot.lane.b32.xlu1 %v914_v7, %s1815_s22 }
 0x12e   : > { %683 = vrot.lane.b32.xlu2 %v679_v5, %s2422_s8 }
 0x12f   : > { %v1019_v17 = vpop.f32.mrf.mxu2  ;;  %v1080_v22 = vpop.f32.mrf.mxu3 }
 0x130   : > { %v1086_v26 = vmul.f32 %v1080_v22, %v2061_v56  ;;  %v1025_v33 = vmul.f32 %v1019_v17, %v2061_v56  ;;  %v639_v56 = vpop.permute.xlu0 %638 }
 0x131   : > { %v644_v6 = vmul.f32 %v1927_v12, %v639_v56 }
 0x135   : > { %746 = vrot.lane.b32.xlu1 %v741_v21, %s2422_s8  ;;  %858 = vrot.lane.b32.xlu0 %v853_v25, %s1815_s22 }
 0x136   : > { %1090 = vrot.lane.b32.xlu2 %v1086_v26, %s2423_s23 }
 0x137   : > { %v1022_v29 = vpop.f32.mrf.mxu2  ;;  %v1083_v39 = vpop.f32.mrf.mxu3 }
 0x138   : > { %v1026_v34 = vmul.f32 %v1022_v29, %v2124_v18  ;;  %v1087_v41 = vmul.f32 %v1083_v39, %v2124_v18  ;;  %v1687_v42 = vpop.permute.xlu0 %1686  ;;  %v812_v18 = vpop.permute.xlu1 %811  ;;  %v705_v39 = vmul.f32 %v1929_v13, %v639_v56 }
 0x139   : > { %v1689_v35 = vunpack.i.h.bf16 %v1687_v42  ;;  %v1688_v36 = vunpack.i.l.bf16 %v1687_v42  ;;  %v817_v3 = vmul.f32 %v1927_v12, %v812_v18  ;;  %v878_v29 = vmul.f32 %v1929_v13, %v812_v18 }
 0x13b   : > { %1527 = vst.msk [vmem:[%s2165_s30 + $0x10] sm:$0xff] %vm619_vm13, %v1688_v36  ;;  %v818_v36 = vmul.f32 %v814_v60, %v802_v27 }
 0x13c   : > { %1528 = vst.msk [vmem:[%s2165_s30 + $0x18] sm:$0xff] %vm619_vm13, %v1689_v35 }
 0x13d   : > { %1029 = vrot.lane.b32.xlu1 %v1025_v33, %s2423_s23  ;;  %685 = vrot.lane.b32.xlu0 %v680_v32, %s2422_s8 }
 0x13e   : > { %1031 = vrot.lane.b32.xlu2 %v1026_v34, %s2423_s23 }
 0x140   : > { %v985_v17 = vpop.permute.xlu0 %984  ;;  %v987_v25 = vpop.permute.xlu1 %986 }
 0x141   : > { %v1051_v20 = vmul.f32 %v1929_v13, %v985_v17  ;;  %v991_v26 = vmul.f32 %v987_v25, %v975_v15  ;;  %v706_v15 = vmul.f32 %v2146_v47, %v631_v24  ;;  %v1052_v14 = vmul.f32 %v987_v25, %v979_v16 }
 0x145   : > { %1092 = vrot.lane.b32.xlu0 %v1087_v41, %s2423_s23  ;;  %1696 = vrot.lane.b32.xlu1 %v1695_v40, %s2422_s8 }
 0x146   : > { %949 = vrot.lane.b32.xlu2 %v807_v59, %s1815_s22 }
 0x14d   : > { %1691 = vrot.lane.b32.xlu0 %v1690_v2, %s1815_s22 }
 0x17f   : > { %v857_v4 = vpop.permute.xlu2 %856 }
 0x180   : > { %v862_v5 = vadd.f32 %v857_v4, %v817_v3 }
 0x182   : > { %866 = vrot.lane.b32.xlu1 %v862_v5, %s1815_s22 }
 0x188   : > { %v684_v7 = vpop.permute.xlu2 %683 }
 0x189   : > { %v689_v8 = vadd.f32 %v684_v7, %v644_v6 }
 0x18b   : > { %693 = vrot.lane.b32.xlu1 %v689_v8, %s2423_s23 }
 0x190   : > { %v1091_v21 = vpop.permute.xlu2 %1090 }
 0x191   : > { %v1096_v22 = vadd.f32 %v1091_v21, %v1051_v20 }
 0x193   : > { %1100 = vrot.lane.b32.xlu1 %v1096_v22, %s2422_s8 }
 0x197   : > { %v918_v32 = vpop.permute.xlu0 %917 }
 0x198   : > { %v923_v33 = vadd.f32 %v918_v32, %v878_v29  ;;  %v1032_v34 = vpop.permute.xlu2 %1031 }
 0x199   : > { %v1036_v38 = vadd.f32 %v1032_v34, %v991_v26 }
 0x19a   : > { %927 = vrot.lane.b32.xlu2 %v923_v33, %s1815_s22 }
 0x19b   : > { %1041 = vrot.lane.b32.xlu1 %v1036_v38, %s2422_s8 }
 0x19f   : > { %v745_v40 = vpop.permute.xlu0 %744  ;;  %v920_v41 = vpop.permute.xlu1 %919 }
 0x1a0   : > { %v750_v42 = vadd.f32 %v745_v40, %v705_v39  ;;  %v924_v35 = vadd.f32 %v920_v41, %v879_v37  ;;  %v950_v11 = vpop.permute.xlu2 %949 }
 0x1a1   : > { %1537 = vst.msk [vmem:[%s2152_s15 + $0x10] sm:$0xf] %vm610_vm14, %v950_v11 }
 0x1a2   : > { %754 = vrot.lane.b32.xlu2 %v750_v42, %s2423_s23  ;;  %929 = vrot.lane.b32.xlu0 %v924_v35, %s1815_s22 }
 0x1a3   : > { %1122 = vrot.lane.b32.xlu1 %v980_v30, %s2422_s8  ;;  %v990_v30 = vmul.f32 %v1927_v12, %v985_v17 }
 0x1a7   : > { %v747_v28 = vpop.permute.xlu1 %746  ;;  %v859_v59 = vpop.permute.xlu0 %858 }
 0x1a8   : > { %v751_v13 = vadd.f32 %v747_v28, %v706_v15  ;;  %v863_v56 = vadd.f32 %v859_v59, %v818_v36 }
 0x1aa   : > { %756 = vrot.lane.b32.xlu0 %v751_v13, %s2423_s23  ;;  %868 = vrot.lane.b32.xlu2 %v863_v56, %s1815_s22 }
 0x1af   : > { %v1030_v24 = vpop.permute.xlu1 %1029  ;;  %v686_v1 = vpop.permute.xlu0 %685 }
 0x1b0   : > { %v1035_v19 = vadd.f32 %v1030_v24, %v990_v30  ;;  %v690_v27 = vadd.f32 %v686_v1, %v645_v63 }
 0x1b2   : > { %1039 = vrot.lane.b32.xlu0 %v1035_v19, %s2422_s8  ;;  %695 = vrot.lane.b32.xlu2 %v690_v27, %s2423_s23 }
 0x1b7   : > { %v1093_v23 = vpop.permute.xlu0 %1092  ;;  %v1697_v47 = vpop.permute.xlu1 %1696 }
 0x1b8   : > { %v1097_v60 = vadd.f32 %v1093_v23, %v1052_v14  ;;  %v1699_v12 = vunpack.i.h.bf16 %v1697_v47  ;;  %v1698_v18 = vunpack.i.l.bf16 %v1697_v47 }
 0x1ba   : > { %951 = vrot.lane.b32.xlu0 %v808_v0, %s1815_s22  ;;  %1102 = vrot.lane.b32.xlu2 %v1097_v60, %s2422_s8  ;;  %1555 = vst.msk [vmem:[%s2165_s30 + $0x30] sm:$0xff] %vm619_vm13, %v1698_v18  ;;  %s1222_s22 = scalar_lea.hbm %s2400_s7, %s2405_s19 }
 0x1bb   : > { %1556 = vst.msk [vmem:[%s2165_s30 + $0x38] sm:$0xff] %vm619_vm13, %v1699_v12  ;;  %s1225_s23 = sshll.u32 %s1222_s22, 4  ;;  %s1720_s22 = scalar_lea.hbm %s2400_s7, 128  ;;  %s1226_s23 = int_to_ptr.hbm [resolvable:$true] %s1225_s23 }
 0x1bc   : > { %s1714_s0 = sshra.s32 %s1226_s23, 4  ;;  %s1715_s0 = int_to_ptr.hbm [resolvable:$true] %s1714_s0 }
 0x1bd   : > { %s1716_s1 = scalar_lea.hbm %s1715_s0, 64  ;;  %p1721_p1 = scmp.lt.s32.totalorder %s1715_s0, %s2400_s7 }
 0x1be   : > { %p1717_p12 = scmp.ne.s32.totalorder %s1715_s0, %s1716_s1  ;;  %p1722_p2 = scmp.lt.s32.totalorder %s1720_s22, %s1716_s1 }
 0x1bf   : > { %v1692_v16 = vpop.permute.xlu0 %1691 }
 0x1c0   : > { %v1694_v0 = vunpack.i.h.bf16 %v1692_v16  ;;  %v1693_v2 = vunpack.i.l.bf16 %v1692_v16  ;;  %p1718_p13 = pnand %p1717_p12, %p1898_p4  ;;  %p1723_p3 = por %p1722_p2, %p1721_p1 }
 0x1c2   : > { %1124 = vrot.lane.b32.xlu2 %v2186_v31, %s2422_s8  ;;  %1541 = vst.msk [vmem:[%s2165_s30 + $0x20] sm:$0xff] %vm619_vm13, %v1693_v2  ;;  %s1178_s8 = scalar_lea.sflag [#allocation5], %s2058_s18  ;;  %p1719_p0 = pneg %p1718_p13 }
 0x1c3   : > { %1542 = vst.msk [vmem:[%s2165_s30 + $0x28] sm:$0xff] %vm619_vm13, %v1694_v0 }
 0x1c4   : > { %p1724_p5 = pnand %p1723_p3, %p1719_p0 }
 0x1c6   : > { %1727 = shalt.err (!%p1724_p5)
}
 0x1c7   : > { %s1816_s30 = smov 128   ;;  %s1817_s3 = smov 8  }
 0x1c8   : > { %1590 = dma.vmem_to_hbm [thread:$0]  (%p1898_p4), %s1224_s17, 1024, %s1226_s23, %s1178_s8, %s1816_s30, %s1816_s30, %s1817_s3  }
 0x1c9   : > { %s2424_s0 = sshll.u32 %s1802_s27, 6  ;;  %s1204_s17 = sshll.u32 %s2101_s12, 4  ;;  %s1205_s17 = int_to_ptr.vmem [resolvable:$true] %s1204_s17 }
 0x1ca   : > { %s1203_s19 = scalar_lea.hbm %s2399_s6, %s2424_s0  ;;  %s1173_s27 = scalar_lea.sflag [#allocation3], %s2058_s18 }
 0x1cb   : > { %s1206_s23 = sshll.u32 %s1203_s19, 4  ;;  %s1748_s0 = scalar_lea.hbm %s2399_s6, 128  ;;  %s1207_s23 = int_to_ptr.hbm [resolvable:$true] %s1206_s23 }
 0x1cc   : > { %s1742_s8 = sshra.s32 %s1207_s23, 4  ;;  %s1743_s8 = int_to_ptr.hbm [resolvable:$true] %s1742_s8 }
 0x1cd   : > { %s1744_s16 = scalar_lea.hbm %s1743_s8, 64  ;;  %p1749_p10 = scmp.lt.s32.totalorder %s1743_s8, %s2399_s6 }
 0x1ce   : > { %p1745_p6 = scmp.ne.s32.totalorder %s1743_s8, %s1744_s16  ;;  %p1750_p11 = scmp.lt.s32.totalorder %s1748_s0, %s1744_s16 }
 0x1d0   : > { %p1746_p7 = pnand %p1745_p6, %p1898_p4  ;;  %p1751_p12 = por %p1750_p11, %p1749_p10 }
 0x1d2   : > { %p1747_p9 = pneg %p1746_p7 }
 0x1d4   : > { %p1752_p13 = pnand %p1751_p12, %p1747_p9 }
 0x1f4   : > { %v867_v31 = vpop.permute.xlu1 %866  ;;  %v928_v3 = vpop.permute.xlu2 %927 }
 0x1f5   : > { %v874_v4 = vsel %vm533_vm12, %v867_v31, %v1673_v52  ;;  %v935_v5 = vsel %vm533_vm12, %v928_v3, %v1674_v51 }
 0x1f6   : > { %v876_v6 = vmul.f32 0.17677669, %v874_v4  ;;  %v942_v7 = vpack.c.bf16 %v935_v5, %v935_v5  ;;  %1539 = vst.msk [vmem:[%s2101_s12 + $0x20] sm:$0xff] %vm619_vm13, %v935_v5 }
 0x1f8   : > { %v937_v8 = vpack.c.bf16 %v876_v6, %v876_v6  ;;  %1535 = vst.msk [vmem:[%s2095_s10 + $0x10] sm:$0xf] %vm610_vm14, %v942_v7 }
 0x1fa   : > { %1533 = vst.msk [vmem:[%s2109_s20 + $0x10] sm:$0xf] %vm610_vm14, %v937_v8 }
 0x1fc   : > { %v755_v17 = vpop.permute.xlu2 %754 }
 0x1fd   : > { %v694_v20 = vpop.permute.xlu1 %693  ;;  %v762_v52 = vsel %vm533_vm12, %v755_v17, %v1659_v45 }
 0x1fe   : > { %v701_v49 = vsel %vm533_vm12, %v694_v20, %v1658_v46  ;;  %v769_v51 = vpack.c.bf16 %v762_v52, %v762_v52  ;;  %1525 = vst.msk [vmem:[%s2101_s12 + $0x10] sm:$0xff] %vm619_vm13, %v762_v52 }
 0x1ff   : > { %v703_v21 = vmul.f32 0.17677669, %v701_v49 }
 0x200   : > { %1521 = vst.msk [vmem:[%s2095_s10 + $0x8] sm:$0xf] %vm610_vm14, %v769_v51 }
 0x201   : > { %v764_v22 = vpack.c.bf16 %v703_v21, %v703_v21 }
 0x203   : > { %1519 = vst.msk [vmem:[%s2109_s20 + $0x8] sm:$0xf] %vm610_vm14, %v764_v22 }
 0x204   : > { %v869_v25 = vpop.permute.xlu2 %868 }
 0x205   : > { %v1101_v26 = vpop.permute.xlu1 %1100  ;;  %v875_v45 = vsel %vm533_vm12, %v869_v25, %v1683_v58 }
 0x206   : > { %v1108_v44 = vsel %vm533_vm12, %v1101_v26, %v1669_v61  ;;  %v877_v46 = vmul.f32 0.17677669, %v875_v45 }
 0x207   : > { %v1115_v29 = vpack.c.bf16 %v1108_v44, %v1108_v44  ;;  %1553 = vst.msk [vmem:[%s2101_s12 + $0x30] sm:$0xff] %vm619_vm13, %v1108_v44 }
 0x208   : > { %v938_v32 = vpack.c.bf16 %v877_v46, %v877_v46 }
 0x209   : > { %1549 = vst.msk [vmem:[%s2095_s10 + $0x18] sm:$0xf] %vm610_vm14, %v1115_v29 }
 0x20a   : > { %1534 = vst.msk [vmem:[%s2109_s20 + $0x14] sm:$0xf] %vm610_vm14, %v938_v32 }
 0x20c   : > { %v696_v33 = vpop.permute.xlu2 %695 }
 0x20d   : > { %v1042_v34 = vpop.permute.xlu1 %1041  ;;  %v702_v58 = vsel %vm533_vm12, %v696_v33, %v1663_v54 }
 0x20e   : > { %v1048_v61 = vsel %vm533_vm12, %v1042_v34, %v1678_v10  ;;  %v704_v38 = vmul.f32 0.17677669, %v702_v58 }
 0x20f   : > { %v1050_v37 = vmul.f32 0.17677669, %v1048_v61 }
 0x210   : > { %v765_v39 = vpack.c.bf16 %v704_v38, %v704_v38 }
 0x211   : > { %v1111_v40 = vpack.c.bf16 %v1050_v37, %v1050_v37 }
 0x212   : > { %1520 = vst.msk [vmem:[%s2109_s20 + $0xc] sm:$0xf] %vm610_vm14, %v765_v39 }
 0x213   : > { %1548 = vst.msk [vmem:[%s2109_s20 + $0x1c] sm:$0xf] %vm610_vm14, %v1111_v40 }
 0x214   : > { %v1103_v41 = vpop.permute.xlu2 %1102  ;;  %v930_v42 = vpop.permute.xlu0 %929 }
 0x215   : > { %v1109_v54 = vsel %vm533_vm12, %v1103_v41, %v1679_v9  ;;  %v936_v10 = vsel %vm533_vm12, %v930_v42, %v1684_v57  ;;  %v1123_v48 = vpop.permute.xlu1 %1122 }
 0x216   : > { %v1116_v35 = vpack.c.bf16 %v1109_v54, %v1109_v54  ;;  %1554 = vst.msk [vmem:[%s2101_s12 + $0x38] sm:$0xff] %vm619_vm13, %v1109_v54  ;;  %v943_v15 = vpack.c.bf16 %v936_v10, %v936_v10 }
 0x217   : > { %1540 = vst.msk [vmem:[%s2101_s12 + $0x28] sm:$0xff] %vm619_vm13, %v936_v10 }
 0x218   : > { %1550 = vst.msk [vmem:[%s2095_s10 + $0x1c] sm:$0xf] %vm610_vm14, %v1116_v35 }
 0x219   : > { %1536 = vst.msk [vmem:[%s2095_s10 + $0x14] sm:$0xf] %vm610_vm14, %v943_v15 }
 0x21a   : > { %1551 = vst.msk [vmem:[%s2152_s15 + $0x18] sm:$0xf] %vm610_vm14, %v1123_v48 }
 0x21c   : > { %v757_v55 = vpop.permute.xlu0 %756  ;;  %v1125_v57 = vpop.permute.xlu2 %1124 }
 0x21d   : > { %v763_v9 = vsel %vm533_vm12, %v757_v55, %v1664_v53  ;;  %1552 = vst.msk [vmem:[%s2152_s15 + $0x1c] sm:$0xf] %vm610_vm14, %v1125_v57 }
 0x21e   : > { %v770_v36 = vpack.c.bf16 %v763_v9, %v763_v9  ;;  %1526 = vst.msk [vmem:[%s2101_s12 + $0x18] sm:$0xff] %vm619_vm13, %v763_v9 }
 0x21f   : > { %1755 = shalt.err (!%p1752_p13)
}
 0x220   : > { %1589 = dma.vmem_to_hbm [thread:$0]  (%p1898_p4), %s1205_s17, 1024, %s1207_s23, %s1173_s27, %s1816_s30, %s1816_s30, %s1817_s3  }
 0x221   : > { %1522 = vst.msk [vmem:[%s2095_s10 + $0xc] sm:$0xf] %vm610_vm14, %v770_v36 }
 0x224   : > { %v1040_v50 = vpop.permute.xlu0 %1039 }
 0x225   : > { %v1047_v53 = vsel %vm533_vm12, %v1040_v50, %v1668_v62 }
 0x226   : > { %v1049_v28 = vmul.f32 0.17677669, %v1047_v53 }
 0x228   : > { %v1110_v59 = vpack.c.bf16 %v1049_v28, %v1049_v28 }
 0x22a   : > { %1547 = vst.msk [vmem:[%s2109_s20 + $0x18] sm:$0xf] %vm610_vm14, %v1110_v59 }
 0x22c   : > { %v952_v13 = vpop.permute.xlu0 %951 }
 0x22d   : > { %1538 = vst.msk [vmem:[%s2152_s15 + $0x14] sm:$0xf] %vm610_vm14, %v952_v13 }
 0x22e PF: > { %p1600_p0 = scmp.ge.s32.totalorder %s1810_s29, 2  ;;  %s1276_s3 = sand.u32 1, %s1790_s24  }
 0x22f   : > { %s1277_s11 = scalar_lea.sflag [#allocation3], %s1276_s3 }
 0x230   : > { %p1594_p4 = pnand %p1600_p0, %p1905_p8 }
 0x232   : > { %p1595_p1 = pneg %p1594_p4 }
 0x234   : > { %1781 = dma.done.wait (%p1595_p1), %s1277_s11, 1024  }
 0x235   : > { %1783 = vsyncadd (%p1595_p1), %s1277_s11, 4294966272  ;;  %s1287_s18 = scalar_lea.sflag [#allocation5], %s1276_s3 }
 0x236   : > { %1785 = dma.done.wait (%p1595_p1), %s1287_s18, 1024  }
 0x237   : > { %1787 = vsyncadd (%p1595_p1), %s1287_s18, 4294966272  ;;  %s24_s29 = sadd.s32 1, %s1810_s29   ;;  %s2425_s24 = smov %s1794_s25 }
 0x238   : > { %p21_p2 = scmp.ge.s32.totalorder %s24_s29, 4   ;;  %s2426_s25 = smov %s1798_s26 }
 0x239   : > { %s2427_s26 = smov %s1911_s14  ;;  %s2428_s27 = smov %s1806_s28 }
 0x23a   : > { %s2429_s28 = smov %s2431_s9  ;;  %23 = sbr.rel (!%p21_p2) target bundleno = 11 (0xb), region = 141 }
 0x23f   :  { %1293 = vsyncpa [#allocation3], 1 }
 0x240   :  { %1295 = vsyncpa [#allocation3 + $0x1], 1 }
 0x241   :  { %1296 = vsyncpa [#allocation5], 1 }
 0x242   :  { %1298 = vsyncpa [#allocation5 + $0x1], 1 }

// kernel: block_forward.11
= control target key start
LH: loop header
LB: loop body
LE: loop exit
PB: predicated region body
PF: predicated region fallthrough
CT: control target
= control target key end

     0   :  { %s269_s1 = inlined_call_operand.vmem [shape: bf16[128,128], index: 1, kind: input, shape index: {}]   ;;  %s270_s0 = inlined_call_operand.vmem [shape: bf16[32,128], index: 0, kind: input, shape index: {}]   ;;  %s271_s2 = inlined_call_operand.vmem [shape: bf16[32,128], index: 2, kind: output, shape index: {}]  }
   0x1   :  { %v198_v0 = vld [vmem:[%s269_s1 + $0x38] sm:$0xff]  ;;  %v197_v1 = vld [vmem:[%s269_s1 + $0x30] sm:$0xff]  ;;  %v196_v2 = vld [vmem:[%s269_s1 + $0x28] sm:$0xff] }
   0x2   :  { %103 = vmatpush.bf16.msra.mxu0 %v198_v0  ;;  %210 = vmatpush.bf16.msra.mxu1 %v198_v0  ;;  %v195_v3 = vld [vmem:[%s269_s1 + $0x20] sm:$0xff]  ;;  %v194_v4 = vld [vmem:[%s269_s1 + $0x18] sm:$0xff]  ;;  %v193_v5 = vld [vmem:[%s269_s1 + $0x10] sm:$0xff] }
   0x3   :  { %v192_v6 = vld [vmem:[%s269_s1 + $0x8] sm:$0xff]  ;;  %v191_v7 = vld [vmem:[%s269_s1] sm:$0xff] }
   0x4   :  { %v189_v8 = vld [vmem:[%s270_s0] sm:$0xff]  ;;  %v190_v9 = vld [vmem:[%s270_s0 + $0x8] sm:$0xff] }
   0x6   :  { %104 = vmatpush.bf16.msra.mxu0 %v197_v1  ;;  %211 = vmatpush.bf16.msra.mxu1 %v197_v1 }
   0xa   :  { %105 = vmatpush.bf16.msra.mxu0 %v196_v2  ;;  %212 = vmatpush.bf16.msra.mxu1 %v196_v2 }
   0xe   :  { %106 = vmatpush.bf16.msra.mxu0 %v195_v3  ;;  %213 = vmatpush.bf16.msra.mxu1 %v195_v3 }
  0x12   :  { %107 = vmatpush.bf16.msra.mxu0 %v194_v4  ;;  %214 = vmatpush.bf16.msra.mxu1 %v194_v4 }
  0x16   :  { %108 = vmatpush.bf16.msra.mxu0 %v193_v5  ;;  %215 = vmatpush.bf16.msra.mxu1 %v193_v5 }
  0x1a   :  { %109 = vmatpush.bf16.msra.mxu0 %v192_v6  ;;  %216 = vmatpush.bf16.msra.mxu1 %v192_v6 }
  0x1e   :  { %110 = vmatpush.bf16.msra.mxu0 %v191_v7  ;;  %217 = vmatpush.bf16.msra.mxu1 %v191_v7 }
  0x21   :  { %111 = vmatmul.bf16.vlgmr.msra.gmra.mxu0 %v189_v8  ;;  %116 = vmatmul.bf16.vlgmr.msra.gmra.mxu1 %v190_v9 }
  0x9e   :  { %v112_v10 = vpop.f32.mrf.mxu0  ;;  %v117_v11 = vpop.f32.mrf.mxu1 }
  0xa6   :  { %v114_v12 = vpop.f32.mrf.mxu0  ;;  %v119_v13 = vpop.f32.mrf.mxu1 }
  0xa7   :  { %v202_v14 = vpack.c.bf16 %v114_v12, %v112_v10  ;;  %v207_v15 = vpack.c.bf16 %v119_v13, %v117_v11 }
  0xa9   :  { %203 = vst [vmem:[%s271_s2] sm:$0xff] %v202_v14  }
  0xaa   :  { %209 = vst [vmem:[%s271_s2 + $0x8] sm:$0xff] %v207_v15  }

// kernel: block_forward.13
= control target key start
LH: loop header
LB: loop body
LE: loop exit
PB: predicated region body
PF: predicated region fallthrough
CT: control target
= control target key end

     0   :  { %s918_s0 = inlined_call_operand.vmem [shape: bf16[32,512], index: 0, kind: input, shape index: {}]   ;;  %s919_s1 = inlined_call_operand.vmem [shape: bf16[512,128], index: 1, kind: input, shape index: {}]   ;;  %s920_s2 = inlined_call_operand.vmem [shape: f32[1,128], index: 2, kind: input, shape index: {}]   ;;  %s921_s3 = inlined_call_operand.vmem [shape: bf16[32,128], index: 3, kind: input, shape index: {}]   ;;  %s922_s4 = inlined_call_operand.vmem [shape: f32[32,128], index: 4, kind: input, shape index: {}]   ;;  %s923_s5 = inlined_call_operand.hbm [shape: f32[32,128], index: 5, kind: output, shape index: {}]  }
   0x1   :  { %v653_v0 = vld [vmem:[%s919_s1 + $0x38] sm:$0xff]  ;;  %v652_v4 = vld [vmem:[%s919_s1 + $0x30] sm:$0xff]  ;;  %v651_v8 = vld [vmem:[%s919_s1 + $0x28] sm:$0xff] }
   0x2   :  { %v661_v1 = vld [vmem:[%s919_s1 + $0x78] sm:$0xff]  ;;  %337 = vmatpush.bf16.msra.mxu0 %v653_v0  ;;  %v660_v5 = vld [vmem:[%s919_s1 + $0x70] sm:$0xff]  ;;  %v659_v9 = vld [vmem:[%s919_s1 + $0x68] sm:$0xff] }
   0x3   :  { %v669_v2 = vld [vmem:[%s919_s1 + $0xb8] sm:$0xff]  ;;  %356 = vmatpush.bf16.msra.mxu1 %v661_v1  ;;  %v668_v6 = vld [vmem:[%s919_s1 + $0xb0] sm:$0xff]  ;;  %v667_v10 = vld [vmem:[%s919_s1 + $0xa8] sm:$0xff] }
   0x4   :  { %v677_v3 = vld [vmem:[%s919_s1 + $0xf8] sm:$0xff]  ;;  %375 = vmatpush.bf16.msra.mxu2 %v669_v2  ;;  %v676_v7 = vld [vmem:[%s919_s1 + $0xf0] sm:$0xff]  ;;  %v675_v11 = vld [vmem:[%s919_s1 + $0xe8] sm:$0xff] }
   0x5   :  { %394 = vmatpush.bf16.msra.mxu3 %v677_v3  ;;  %v650_v12 = vld [vmem:[%s919_s1 + $0x20] sm:$0xff]  ;;  %v649_v16 = vld [vmem:[%s919_s1 + $0x18] sm:$0xff] }
   0x6   :  { %338 = vmatpush.bf16.msra.mxu0 %v652_v4  ;;  %v658_v13 = vld [vmem:[%s919_s1 + $0x60] sm:$0xff]  ;;  %v657_v17 = vld [vmem:[%s919_s1 + $0x58] sm:$0xff] }
   0x7   :  { %357 = vmatpush.bf16.msra.mxu1 %v660_v5  ;;  %v666_v14 = vld [vmem:[%s919_s1 + $0xa0] sm:$0xff] }
   0x8   :  { %376 = vmatpush.bf16.msra.mxu2 %v668_v6  ;;  %v674_v15 = vld [vmem:[%s919_s1 + $0xe0] sm:$0xff] }
   0x9   :  { %395 = vmatpush.bf16.msra.mxu3 %v676_v7 }
   0xa   :  { %339 = vmatpush.bf16.msra.mxu0 %v651_v8 }
   0xb   :  { %358 = vmatpush.bf16.msra.mxu1 %v659_v9 }
   0xc   :  { %377 = vmatpush.bf16.msra.mxu2 %v667_v10 }
   0xd   :  { %396 = vmatpush.bf16.msra.mxu3 %v675_v11 }
   0xe   :  { %340 = vmatpush.bf16.msra.mxu0 %v650_v12 }
   0xf   :  { %359 = vmatpush.bf16.msra.mxu1 %v658_v13 }
  0x10   :  { %10 = vsyncpa [#allocation4], 0  ;;  %378 = vmatpush.bf16.msra.mxu2 %v666_v14  ;;  %v665_v18 = vld [vmem:[%s919_s1 + $0x98] sm:$0xff]  ;;  %v648_v20 = vld [vmem:[%s919_s1 + $0x10] sm:$0xff]  ;;  %s466_s25 = sshll.u32 %s923_s5, 4  ;;  %s718_s28 = smov 128   ;;  %s467_s25 = int_to_ptr.hbm [resolvable:$true] %s466_s25 }
  0x11   :  { %397 = vmatpush.bf16.msra.mxu3 %v674_v15  ;;  %v673_v19 = vld [vmem:[%s919_s1 + $0xd8] sm:$0xff]  ;;  %v656_v21 = vld [vmem:[%s919_s1 + $0x50] sm:$0xff]  ;;  %v647_v24 = vld [vmem:[%s919_s1 + $0x8] sm:$0xff]  ;;  %s719_s29 = smov 8  }
  0x12   :  { %341 = vmatpush.bf16.msra.mxu0 %v649_v16  ;;  %v664_v22 = vld [vmem:[%s919_s1 + $0x90] sm:$0xff]  ;;  %v655_v25 = vld [vmem:[%s919_s1 + $0x48] sm:$0xff]  ;;  %v646_v28 = vld [vmem:[%s919_s1] sm:$0xff] }
  0x13   :  { %360 = vmatpush.bf16.msra.mxu1 %v657_v17  ;;  %v672_v23 = vld [vmem:[%s919_s1 + $0xd0] sm:$0xff]  ;;  %v663_v26 = vld [vmem:[%s919_s1 + $0x88] sm:$0xff]  ;;  %v654_v29 = vld [vmem:[%s919_s1 + $0x40] sm:$0xff] }
  0x14   :  { %379 = vmatpush.bf16.msra.mxu2 %v665_v18  ;;  %v671_v27 = vld [vmem:[%s919_s1 + $0xc8] sm:$0xff]  ;;  %v662_v30 = vld [vmem:[%s919_s1 + $0x80] sm:$0xff]  ;;  %v640_v33 = vld [vmem:[%s918_s0 + $0xc] sm:$0xf0] }
  0x15   :  { %398 = vmatpush.bf16.msra.mxu3 %v673_v19  ;;  %v670_v31 = vld [vmem:[%s919_s1 + $0xc0] sm:$0xff]  ;;  %v482_v35 = vld [vmem:[%s918_s0 + $0x10] sm:$0xf0]  ;;  %v488_v36 = vld [vmem:[%s918_s0 + $0x8] sm:$0xf] }
  0x16   :  { %342 = vmatpush.bf16.msra.mxu0 %v648_v20  ;;  %v480_v32 = vld [vmem:[%s918_s0] sm:$0xf]  ;;  %v638_v34 = vld [vmem:[%s918_s0 + $0x4] sm:$0xf]  ;;  %v641_v37 = vld [vmem:[%s918_s0 + $0x14] sm:$0xf0] }
  0x17   :  { %361 = vmatpush.bf16.msra.mxu1 %v656_v21  ;;  %v639_v38 = vld [vmem:[%s918_s0 + $0xc] sm:$0xf]  ;;  %v490_v39 = vld [vmem:[%s918_s0 + $0x18] sm:$0xf0]  ;;  %v481_v40 = vor.u32 %v640_v33, %v480_v32  ;;  %v485_v41 = vor.u32 %v638_v34, %v482_v35  ;;  %v489_v42 = vor.u32 %v641_v37, %v488_v36  ;;  %v496_v44 = vld [vmem:[%s918_s0 + $0x20] sm:$0xf] }
  0x18   :  { %380 = vmatpush.bf16.msra.mxu2 %v664_v22  ;;  %v493_v43 = vor.u32 %v639_v38, %v490_v39  ;;  %v644_v45 = vld [vmem:[%s918_s0 + $0x2c] sm:$0xf0]  ;;  %v642_v46 = vld [vmem:[%s918_s0 + $0x24] sm:$0xf]  ;;  %v498_v47 = vld [vmem:[%s918_s0 + $0x30] sm:$0xf0] }
  0x19   :  { %399 = vmatpush.bf16.msra.mxu3 %v672_v23  ;;  %v504_v48 = vld [vmem:[%s918_s0 + $0x28] sm:$0xf]  ;;  %v645_v49 = vld [vmem:[%s918_s0 + $0x34] sm:$0xf0]  ;;  %v643_v50 = vld [vmem:[%s918_s0 + $0x2c] sm:$0xf]  ;;  %v497_v52 = vor.u32 %v644_v45, %v496_v44  ;;  %v501_v53 = vor.u32 %v642_v46, %v498_v47 }
  0x1a   :  { %343 = vmatpush.bf16.msra.mxu0 %v647_v24  ;;  %v506_v51 = vld [vmem:[%s918_s0 + $0x38] sm:$0xf0]  ;;  %v505_v54 = vor.u32 %v645_v49, %v504_v48  ;;  %v679_v61 = vld [vmem:[%s921_s3] sm:$0xff]   ;;  %v449_v18 = vld [vmem:[%s922_s4 + $0x8] sm:$0xff] }
  0x1b   :  { %362 = vmatpush.bf16.msra.mxu1 %v655_v25  ;;  %v509_v55 = vor.u32 %v643_v50, %v506_v51  ;;  %v690_v63 = vld [vmem:[%s920_s2] ss:$0 sm:$0xff]  ;;  %v680_v3 = vunpack.c.l.bf16 %v679_v61  ;;  %v681_v15 = vunpack.c.h.bf16 %v679_v61  ;;  %v686_v22 = vld [vmem:[%s921_s3 + $0x8] sm:$0xff]   ;;  %s717_s3 = smov [#allocation3]  }
  0x1c   :  { %381 = vmatpush.bf16.msra.mxu2 %v663_v26  ;;  %v448_v5 = vld [vmem:[%s922_s4] sm:$0xff]  ;;  %v684_v26 = vunpack.c.l.bf16 %v686_v22  ;;  %v685_v38 = vunpack.c.h.bf16 %v686_v22  ;;  %s464_s22 = sshll.u32 %s717_s3, 4  ;;  %s465_s22 = int_to_ptr.vmem [resolvable:$true] %s464_s22 }
  0x1d   :  { %400 = vmatpush.bf16.msra.mxu3 %v671_v27 }
  0x1e   :  { %344 = vmatpush.bf16.msra.mxu0 %v646_v28 }
  0x1f   :  { %363 = vmatpush.bf16.msra.mxu1 %v654_v29 }
  0x20   :  { %382 = vmatpush.bf16.msra.mxu2 %v662_v30  ;;  %v450_v30 = vld [vmem:[%s922_s4 + $0x10] sm:$0xff] }
  0x21   :  { %401 = vmatpush.bf16.msra.mxu3 %v670_v31  ;;  %345 = vmatmul.bf16.vlgmr.msra.gmra.mxu0 %v481_v40  ;;  %v451_v40 = vld [vmem:[%s922_s4 + $0x18] sm:$0xff] }
  0x22   :  { %364 = vmatmul.bf16.vlgmr.msra.gmra.mxu1 %v485_v41 }
  0x23   :  { %383 = vmatmul.bf16.vlgmr.msra.gmra.mxu2 %v489_v42 }
  0x24   :  { %402 = vmatmul.bf16.vlgmr.msra.gmra.mxu3 %v493_v43 }
  0x31   :  { %350 = vmatmul.bf16.gmra.mxu0 %v497_v52 }
  0x32   :  { %369 = vmatmul.bf16.gmra.mxu1 %v501_v53 }
  0x33   :  { %388 = vmatmul.bf16.gmra.mxu2 %v505_v54 }
  0x34   :  { %407 = vmatmul.bf16.gmra.mxu3 %v509_v55 }
  0x9e   :  { %v346_v56 = vpop.f32.mrf.mxu0 }
  0x9f   :  { %v365_v57 = vpop.f32.mrf.mxu1 }
  0xa0   :  { %v366_v58 = vadd.f32 %v365_v57, %v346_v56 }
  0xa6   :  { %v384_v59 = vpop.f32.mrf.mxu2  ;;  %v348_v0 = vpop.f32.mrf.mxu0 }
  0xa7   :  { %v403_v60 = vpop.f32.mrf.mxu3  ;;  %v385_v62 = vadd.f32 %v384_v59, %v366_v58  ;;  %v367_v1 = vpop.f32.mrf.mxu1 }
  0xa8   :  { %v368_v7 = vadd.f32 %v367_v1, %v348_v0 }
  0xa9   :  { %v404_v2 = vadd.f32 %v403_v60, %v385_v62 }
  0xab   :  { %v432_v4 = vadd.f32 %v690_v63, %v404_v2 }
  0xad   :  { %v444_v6 = vadd.f32 %v680_v3, %v432_v4 }
  0xae   :  { %v386_v8 = vpop.f32.mrf.mxu2  ;;  %v351_v12 = vpop.f32.mrf.mxu0 }
  0xaf   :  { %v405_v9 = vpop.f32.mrf.mxu3  ;;  %v452_v10 = vadd.f32 %v448_v5, %v444_v6  ;;  %v387_v11 = vadd.f32 %v386_v8, %v368_v7  ;;  %v370_v13 = vpop.f32.mrf.mxu1 }
  0xb0   :  { %v371_v17 = vadd.f32 %v370_v13, %v351_v12 }
  0xb1   :  { %456 = vst [vmem:[#allocation3] sm:$0xff] %v452_v10  ;;  %v406_v14 = vadd.f32 %v405_v9, %v387_v11 }
  0xb3   :  { %v433_v16 = vadd.f32 %v690_v63, %v406_v14 }
  0xb5   :  { %v445_v19 = vadd.f32 %v681_v15, %v433_v16 }
  0xb6   :  { %v389_v20 = vpop.f32.mrf.mxu2  ;;  %v353_v27 = vpop.f32.mrf.mxu0 }
  0xb7   :  { %v408_v21 = vpop.f32.mrf.mxu3  ;;  %v453_v23 = vadd.f32 %v449_v18, %v445_v19  ;;  %v390_v24 = vadd.f32 %v389_v20, %v371_v17  ;;  %v372_v28 = vpop.f32.mrf.mxu1 }
  0xb8   :  { %v373_v32 = vadd.f32 %v372_v28, %v353_v27 }
  0xb9   :  { %457 = vst [vmem:[#allocation3 + $0x8] sm:$0xff] %v453_v23  ;;  %v409_v25 = vadd.f32 %v408_v21, %v390_v24 }
  0xbb   :  { %v434_v29 = vadd.f32 %v690_v63, %v409_v25 }
  0xbd   :  { %v446_v31 = vadd.f32 %v684_v26, %v434_v29 }
  0xbe   :  { %v391_v33 = vpop.f32.mrf.mxu2 }
  0xbf   :  { %v454_v34 = vadd.f32 %v450_v30, %v446_v31  ;;  %v392_v35 = vadd.f32 %v391_v33, %v373_v32  ;;  %v410_v36 = vpop.f32.mrf.mxu3 }
  0xc1   :  { %458 = vst [vmem:[#allocation3 + $0x10] sm:$0xff] %v454_v34  ;;  %v411_v37 = vadd.f32 %v410_v36, %v392_v35 }
  0xc3   :  { %v435_v39 = vadd.f32 %v690_v63, %v411_v37 }
  0xc5   :  { %v447_v41 = vadd.f32 %v685_v38, %v435_v39 }
  0xc7   :  { %v455_v42 = vadd.f32 %v451_v40, %v447_v41 }
  0xc9   :  { %459 = vst [vmem:[#allocation3 + $0x18] sm:$0xff] %v455_v42 }
  0xca   :  { %472 = dma.vmem_to_hbm [thread:$0]  %s465_s22, 512, %s467_s25, [#allocation4], %s718_s28, %s718_s28, %s719_s29  }
  0xcb   :  { %715 = dma.done.wait [#allocation4], 512  }
  0xcc   :  { %716 = vsyncadd [#allocation4], 4294966784 }
  0xcd   :  { %477 = vsyncpa [#allocation4], 1 }

// kernel: block_forward.12
= control target key start
LH: loop header
LB: loop body
LE: loop exit
PB: predicated region body
PF: predicated region fallthrough
CT: control target
= control target key end

     0   :  { %s1130_s1 = inlined_call_operand.vmem [shape: bf16[128,512], index: 1, kind: input, shape index: {}]   ;;  %s1131_s0 = inlined_call_operand.vmem [shape: bf16[32,128], index: 0, kind: input, shape index: {}]   ;;  %s1132_s2 = inlined_call_operand.vmem [shape: f32[1,512], index: 2, kind: input, shape index: {}]   ;;  %s1133_s3 = inlined_call_operand.vmem [shape: bf16[32,512], index: 3, kind: output, shape index: {}]  }
   0x1   :  { %v697_v0 = vld [vmem:[%s1130_s1 + $0xe0] sm:$0xf]  ;;  %v743_v1 = vld [vmem:[%s1130_s1 + $0xec] sm:$0xf0]  ;;  %v741_v2 = vld [vmem:[%s1130_s1 + $0xe4] sm:$0xf] }
   0x2   :  { %v698_v3 = vor.u32 %v743_v1, %v697_v0  ;;  %v699_v4 = vld [vmem:[%s1130_s1 + $0xf0] sm:$0xf0]  ;;  %v705_v5 = vld [vmem:[%s1130_s1 + $0xe8] sm:$0xf]  ;;  %v744_v6 = vld [vmem:[%s1130_s1 + $0xf4] sm:$0xf0] }
   0x3   :  { %v702_v7 = vor.u32 %v741_v2, %v699_v4  ;;  %v706_v8 = vor.u32 %v744_v6, %v705_v5  ;;  %v742_v9 = vld [vmem:[%s1130_s1 + $0xec] sm:$0xf]  ;;  %v707_v10 = vld [vmem:[%s1130_s1 + $0xf8] sm:$0xf0]  ;;  %v681_v11 = vld [vmem:[%s1130_s1 + $0xc0] sm:$0xf] }
   0x4   :  { %258 = vmatpush.bf16.msra.mxu0 %v698_v3  ;;  %v710_v12 = vor.u32 %v742_v9, %v707_v10  ;;  %v739_v13 = vld [vmem:[%s1130_s1 + $0xcc] sm:$0xf0]  ;;  %v737_v14 = vld [vmem:[%s1130_s1 + $0xc4] sm:$0xf]  ;;  %v683_v15 = vld [vmem:[%s1130_s1 + $0xd0] sm:$0xf0] }
   0x5   :  { %277 = vmatpush.bf16.msra.mxu1 %v702_v7  ;;  %296 = vmatpush.bf16.msra.mxu2 %v706_v8  ;;  %v682_v16 = vor.u32 %v739_v13, %v681_v11  ;;  %v686_v17 = vor.u32 %v737_v14, %v683_v15  ;;  %v689_v18 = vld [vmem:[%s1130_s1 + $0xc8] sm:$0xf]  ;;  %v740_v19 = vld [vmem:[%s1130_s1 + $0xd4] sm:$0xf0]  ;;  %v738_v20 = vld [vmem:[%s1130_s1 + $0xcc] sm:$0xf] }
   0x6   :  { %315 = vmatpush.bf16.msra.mxu3 %v710_v12  ;;  %v690_v21 = vor.u32 %v740_v19, %v689_v18  ;;  %v691_v22 = vld [vmem:[%s1130_s1 + $0xd8] sm:$0xf0]  ;;  %v665_v23 = vld [vmem:[%s1130_s1 + $0xa0] sm:$0xf]  ;;  %v735_v24 = vld [vmem:[%s1130_s1 + $0xac] sm:$0xf0] }
   0x7   :  { %v694_v25 = vor.u32 %v738_v20, %v691_v22  ;;  %v733_v26 = vld [vmem:[%s1130_s1 + $0xa4] sm:$0xf]  ;;  %v667_v27 = vld [vmem:[%s1130_s1 + $0xb0] sm:$0xf0]  ;;  %v673_v28 = vld [vmem:[%s1130_s1 + $0xa8] sm:$0xf]  ;;  %v666_v29 = vor.u32 %v735_v24, %v665_v23 }
   0x8   :  { %259 = vmatpush.bf16.msra.mxu0 %v682_v16  ;;  %v736_v30 = vld [vmem:[%s1130_s1 + $0xb4] sm:$0xf0]  ;;  %v734_v31 = vld [vmem:[%s1130_s1 + $0xac] sm:$0xf]  ;;  %v675_v32 = vld [vmem:[%s1130_s1 + $0xb8] sm:$0xf0]  ;;  %v670_v33 = vor.u32 %v733_v26, %v667_v27 }
   0x9   :  { %278 = vmatpush.bf16.msra.mxu1 %v686_v17  ;;  %297 = vmatpush.bf16.msra.mxu2 %v690_v21  ;;  %v674_v34 = vor.u32 %v736_v30, %v673_v28  ;;  %v649_v35 = vld [vmem:[%s1130_s1 + $0x80] sm:$0xf]  ;;  %v731_v36 = vld [vmem:[%s1130_s1 + $0x8c] sm:$0xf0]  ;;  %v729_v37 = vld [vmem:[%s1130_s1 + $0x84] sm:$0xf]  ;;  %v678_v38 = vor.u32 %v734_v31, %v675_v32 }
   0xa   :  { %316 = vmatpush.bf16.msra.mxu3 %v694_v25  ;;  %v651_v39 = vld [vmem:[%s1130_s1 + $0x90] sm:$0xf0]  ;;  %v657_v40 = vld [vmem:[%s1130_s1 + $0x88] sm:$0xf]  ;;  %v732_v41 = vld [vmem:[%s1130_s1 + $0x94] sm:$0xf0]  ;;  %v650_v44 = vor.u32 %v731_v36, %v649_v35 }
   0xb   :  { %v730_v42 = vld [vmem:[%s1130_s1 + $0x8c] sm:$0xf]  ;;  %v659_v43 = vld [vmem:[%s1130_s1 + $0x98] sm:$0xf0]  ;;  %v654_v45 = vor.u32 %v729_v37, %v651_v39  ;;  %v658_v46 = vor.u32 %v732_v41, %v657_v40  ;;  %v633_v47 = vld [vmem:[%s1130_s1 + $0x60] sm:$0xf] }
   0xc   :  { %260 = vmatpush.bf16.msra.mxu0 %v666_v29  ;;  %v727_v48 = vld [vmem:[%s1130_s1 + $0x6c] sm:$0xf0]  ;;  %v725_v49 = vld [vmem:[%s1130_s1 + $0x64] sm:$0xf]  ;;  %v662_v50 = vor.u32 %v730_v42, %v659_v43  ;;  %v635_v51 = vld [vmem:[%s1130_s1 + $0x70] sm:$0xf0] }
   0xd   :  { %279 = vmatpush.bf16.msra.mxu1 %v670_v33  ;;  %298 = vmatpush.bf16.msra.mxu2 %v674_v34  ;;  %v641_v52 = vld [vmem:[%s1130_s1 + $0x68] sm:$0xf]  ;;  %v728_v53 = vld [vmem:[%s1130_s1 + $0x74] sm:$0xf0]  ;;  %v726_v54 = vld [vmem:[%s1130_s1 + $0x6c] sm:$0xf]  ;;  %v634_v56 = vor.u32 %v727_v48, %v633_v47  ;;  %v638_v57 = vor.u32 %v725_v49, %v635_v51 }
   0xe   :  { %317 = vmatpush.bf16.msra.mxu3 %v678_v38  ;;  %v643_v55 = vld [vmem:[%s1130_s1 + $0x78] sm:$0xf0]  ;;  %v642_v58 = vor.u32 %v728_v53, %v641_v52  ;;  %v617_v59 = vld [vmem:[%s1130_s1 + $0x40] sm:$0xf]  ;;  %v723_v60 = vld [vmem:[%s1130_s1 + $0x4c] sm:$0xf0] }
   0xf   :  { %v721_v61 = vld [vmem:[%s1130_s1 + $0x44] sm:$0xf]  ;;  %v646_v62 = vor.u32 %v726_v54, %v643_v55  ;;  %v619_v63 = vld [vmem:[%s1130_s1 + $0x50] sm:$0xf0]  ;;  %v625_v0 = vld [vmem:[%s1130_s1 + $0x48] sm:$0xf]  ;;  %v618_v4 = vor.u32 %v723_v60, %v617_v59 }
  0x10   :  { %261 = vmatpush.bf16.msra.mxu0 %v650_v44  ;;  %v724_v1 = vld [vmem:[%s1130_s1 + $0x54] sm:$0xf0]  ;;  %v722_v2 = vld [vmem:[%s1130_s1 + $0x4c] sm:$0xf]  ;;  %v627_v3 = vld [vmem:[%s1130_s1 + $0x58] sm:$0xf0]  ;;  %v622_v5 = vor.u32 %v721_v61, %v619_v63 }
  0x11   :  { %280 = vmatpush.bf16.msra.mxu1 %v654_v45  ;;  %299 = vmatpush.bf16.msra.mxu2 %v658_v46  ;;  %v626_v6 = vor.u32 %v724_v1, %v625_v0  ;;  %v601_v7 = vld [vmem:[%s1130_s1 + $0x20] sm:$0xf]  ;;  %v719_v8 = vld [vmem:[%s1130_s1 + $0x2c] sm:$0xf0]  ;;  %v717_v9 = vld [vmem:[%s1130_s1 + $0x24] sm:$0xf]  ;;  %v630_v10 = vor.u32 %v722_v2, %v627_v3 }
  0x12   :  { %318 = vmatpush.bf16.msra.mxu3 %v662_v50  ;;  %v603_v11 = vld [vmem:[%s1130_s1 + $0x30] sm:$0xf0]  ;;  %v609_v12 = vld [vmem:[%s1130_s1 + $0x28] sm:$0xf]  ;;  %v720_v13 = vld [vmem:[%s1130_s1 + $0x34] sm:$0xf0]  ;;  %v602_v16 = vor.u32 %v719_v8, %v601_v7 }
  0x13   :  { %v718_v14 = vld [vmem:[%s1130_s1 + $0x2c] sm:$0xf]  ;;  %v611_v15 = vld [vmem:[%s1130_s1 + $0x38] sm:$0xf0]  ;;  %v606_v17 = vor.u32 %v717_v9, %v603_v11  ;;  %v610_v18 = vor.u32 %v720_v13, %v609_v12  ;;  %v585_v19 = vld [vmem:[%s1130_s1] sm:$0xf] }
  0x14   :  { %262 = vmatpush.bf16.msra.mxu0 %v634_v56  ;;  %v715_v20 = vld [vmem:[%s1130_s1 + $0xc] sm:$0xf0]  ;;  %v713_v21 = vld [vmem:[%s1130_s1 + $0x4] sm:$0xf]  ;;  %v614_v22 = vor.u32 %v718_v14, %v611_v15  ;;  %v587_v23 = vld [vmem:[%s1130_s1 + $0x10] sm:$0xf0] }
  0x15   :  { %281 = vmatpush.bf16.msra.mxu1 %v638_v57  ;;  %300 = vmatpush.bf16.msra.mxu2 %v642_v58  ;;  %v593_v24 = vld [vmem:[%s1130_s1 + $0x8] sm:$0xf]  ;;  %v716_v25 = vld [vmem:[%s1130_s1 + $0x14] sm:$0xf0]  ;;  %v714_v26 = vld [vmem:[%s1130_s1 + $0xc] sm:$0xf]  ;;  %v586_v28 = vor.u32 %v715_v20, %v585_v19  ;;  %v590_v29 = vor.u32 %v713_v21, %v587_v23 }
  0x16   :  { %319 = vmatpush.bf16.msra.mxu3 %v646_v62  ;;  %v595_v27 = vld [vmem:[%s1130_s1 + $0x18] sm:$0xf0]  ;;  %v594_v30 = vor.u32 %v716_v25, %v593_v24  ;;  %v711_v32 = vld [vmem:[%s1131_s0] sm:$0xff]  ;;  %v712_v33 = vld [vmem:[%s1131_s0 + $0x8] sm:$0xff] }
  0x17   :  { %v598_v31 = vor.u32 %v714_v26, %v595_v27  ;;  %v385_v34 = vld [vmem:[%s1132_s2] sm:$0xf] }
  0x18   :  { %263 = vmatpush.bf16.msra.mxu0 %v618_v4  ;;  %v998_v35 = vperm.slane %v385_v34, 0  ;;  %v1000_v36 = vperm.slane %v385_v34, 1  ;;  %v1004_v43 = vperm.slane %v385_v34, 2  ;;  %v1006_v45 = vperm.slane %v385_v34, 3 }
  0x19   :  { %282 = vmatpush.bf16.msra.mxu1 %v622_v5  ;;  %301 = vmatpush.bf16.msra.mxu2 %v626_v6 }
  0x1a   :  { %320 = vmatpush.bf16.msra.mxu3 %v630_v10 }
  0x1c   :  { %264 = vmatpush.bf16.msra.mxu0 %v602_v16 }
  0x1d   :  { %283 = vmatpush.bf16.msra.mxu1 %v606_v17  ;;  %302 = vmatpush.bf16.msra.mxu2 %v610_v18 }
  0x1e   :  { %321 = vmatpush.bf16.msra.mxu3 %v614_v22 }
  0x20   :  { %265 = vmatpush.bf16.msra.mxu0 %v586_v28 }
  0x21   :  { %284 = vmatpush.bf16.msra.mxu1 %v590_v29  ;;  %303 = vmatpush.bf16.msra.mxu2 %v594_v30 }
  0x22   :  { %322 = vmatpush.bf16.msra.mxu3 %v598_v31 }
  0x23   :  { %266 = vmatmul.bf16.vlgmr.msra.gmra.mxu0 %v711_v32 }
  0x24   :  { %285 = vmatmul.bf16.vlgmr.msra.gmra.mxu1 %v711_v32  ;;  %304 = vmatmul.bf16.vlgmr.msra.gmra.mxu2 %v711_v32 }
  0x25   :  { %323 = vmatmul.bf16.vlgmr.msra.gmra.mxu3 %v711_v32 }
  0x33   :  { %271 = vmatmul.bf16.gmra.mxu0 %v712_v33 }
  0x34   :  { %290 = vmatmul.bf16.gmra.mxu1 %v712_v33  ;;  %309 = vmatmul.bf16.gmra.mxu2 %v712_v33 }
  0x35   :  { %328 = vmatmul.bf16.gmra.mxu3 %v712_v33 }
  0xa0   :  { %v267_v37 = vpop.f32.mrf.mxu0 }
  0xa1   :  { %v395_v38 = vadd.f32 %v998_v35, %v267_v37  ;;  %v286_v39 = vpop.f32.mrf.mxu1 }
  0xa2   :  { %v396_v40 = vadd.f32 %v1000_v36, %v286_v39 }
  0xa3   :  { %v427_v41 = vmul.f32 0.044715, %v395_v38  ;;  %v411_v13 = vmul.f32 0.5, %v395_v38 }
  0xa4   :  { %v428_v42 = vmul.f32 0.044715, %v396_v40  ;;  %v412_v17 = vmul.f32 0.5, %v396_v40 }
  0xa5   :  { %v443_v44 = vmul.f32 %v427_v41, %v395_v38 }
  0xa6   :  { %v444_v46 = vmul.f32 %v428_v42, %v396_v40 }
  0xa7   :  { %v459_v47 = vmul.f32 %v443_v44, %v395_v38  ;;  %v305_v48 = vpop.f32.mrf.mxu2 }
  0xa8   :  { %v460_v49 = vmul.f32 %v444_v46, %v396_v40  ;;  %v397_v50 = vadd.f32 %v1004_v43, %v305_v48  ;;  %v324_v51 = vpop.f32.mrf.mxu3  ;;  %v269_v52 = vpop.f32.mrf.mxu0 }
  0xa9   :  { %v475_v53 = vadd.f32 %v459_v47, %v395_v38  ;;  %v1010_v54 = vadd.f32 %v1006_v45, %v324_v51  ;;  %v1013_v55 = vadd.f32 %v998_v35, %v269_v52  ;;  %v288_v56 = vpop.f32.mrf.mxu1 }
  0xaa   :  { %v476_v57 = vadd.f32 %v460_v49, %v396_v40  ;;  %v429_v58 = vmul.f32 0.044715, %v397_v50  ;;  %v1016_v59 = vadd.f32 %v1000_v36, %v288_v56  ;;  %v413_v42 = vmul.f32 0.5, %v397_v50 }
  0xab   :  { %v491_v60 = vmul.f32 0.7978846, %v475_v53  ;;  %v430_v61 = vmul.f32 0.044715, %v1010_v54  ;;  %v431_v0 = vmul.f32 0.044715, %v1013_v55 }
  0xac   :  { %v492_v62 = vmul.f32 0.7978846, %v476_v57  ;;  %v445_v63 = vmul.f32 %v429_v58, %v397_v50  ;;  %v432_v2 = vmul.f32 0.044715, %v1016_v59  ;;  %v414_v51 = vmul.f32 0.5, %v1010_v54 }
  0xad   :  { %745 = vtanh.f32 %v491_v60  ;;  %v446_v1 = vmul.f32 %v430_v61, %v1010_v54  ;;  %v447_v4 = vmul.f32 %v431_v0, %v1013_v55  ;;  %v415_v57 = vmul.f32 0.5, %v1013_v55 }
  0xae   :  { %747 = vtanh.f32 %v492_v62  ;;  %v461_v3 = vmul.f32 %v445_v63, %v397_v50  ;;  %v448_v6 = vmul.f32 %v432_v2, %v1016_v59 }
  0xaf   :  { %v462_v5 = vmul.f32 %v446_v1, %v1010_v54  ;;  %v307_v7 = vpop.f32.mrf.mxu2  ;;  %v463_v9 = vmul.f32 %v447_v4, %v1013_v55 }
  0xb0   :  { %v477_v8 = vadd.f32 %v461_v3, %v397_v50  ;;  %v1027_v10 = vadd.f32 %v1004_v43, %v307_v7  ;;  %v326_v11 = vpop.f32.mrf.mxu3  ;;  %v272_v12 = vpop.f32.mrf.mxu0  ;;  %v464_v15 = vmul.f32 %v448_v6, %v1016_v59 }
  0xb1   :  { %v478_v14 = vadd.f32 %v462_v5, %v1010_v54  ;;  %v1032_v16 = vadd.f32 %v1006_v45, %v326_v11  ;;  %v479_v19 = vadd.f32 %v463_v9, %v1013_v55  ;;  %v1039_v25 = vadd.f32 %v998_v35, %v272_v12  ;;  %v291_v33 = vpop.f32.mrf.mxu1 }
  0xb2   :  { %v493_v18 = vmul.f32 0.7978846, %v477_v8  ;;  %v433_v20 = vmul.f32 0.044715, %v1027_v10  ;;  %v480_v23 = vadd.f32 %v464_v15, %v1016_v59  ;;  %v1048_v46 = vadd.f32 %v1000_v36, %v291_v33 }
  0xb3   :  { %v746_v21 = vpop.eup %745  ;;  %v494_v22 = vmul.f32 0.7978846, %v478_v14  ;;  %v434_v24 = vmul.f32 0.044715, %v1032_v16  ;;  %v495_v28 = vmul.f32 0.7978846, %v479_v19 }
  0xb4   :  { %v748_v26 = vpop.eup %747  ;;  %v523_v27 = vadd.f32 1.0, %v746_v21  ;;  %749 = vtanh.f32 %v493_v18  ;;  %v449_v29 = vmul.f32 %v433_v20, %v1027_v10  ;;  %v496_v31 = vmul.f32 0.7978846, %v480_v23 }
  0xb5   :  { %v524_v30 = vadd.f32 1.0, %v748_v26  ;;  %751 = vtanh.f32 %v494_v22  ;;  %v450_v32 = vmul.f32 %v434_v24, %v1032_v16  ;;  %v435_v40 = vmul.f32 0.044715, %v1039_v25 }
  0xb6   :  { %v539_v34 = vmul.f32 %v523_v27, %v411_v13  ;;  %753 = vtanh.f32 %v495_v28  ;;  %v465_v37 = vmul.f32 %v449_v29, %v1027_v10  ;;  %v436_v58 = vmul.f32 0.044715, %v1048_v46 }
  0xb7   :  { %v540_v38 = vmul.f32 %v524_v30, %v412_v17  ;;  %755 = vtanh.f32 %v496_v31  ;;  %v466_v39 = vmul.f32 %v450_v32, %v1032_v16  ;;  %v310_v41 = vpop.f32.mrf.mxu2  ;;  %v451_v53 = vmul.f32 %v435_v40, %v1039_v25 }
  0xb8   :  { %v481_v44 = vadd.f32 %v465_v37, %v1027_v10  ;;  %v1051_v47 = vadd.f32 %v1004_v43, %v310_v41  ;;  %v329_v48 = vpop.f32.mrf.mxu3  ;;  %v416_v55 = vmul.f32 0.5, %v1016_v59  ;;  %v452_v3 = vmul.f32 %v436_v58, %v1048_v46  ;;  %v274_v4 = vpop.f32.mrf.mxu0 }
  0xb9   :  { %v555_v49 = vpack.c.bf16 %v540_v38, %v539_v34  ;;  %v482_v52 = vadd.f32 %v466_v39, %v1032_v16  ;;  %v1059_v60 = vadd.f32 %v1006_v45, %v329_v48  ;;  %v467_v63 = vmul.f32 %v451_v53, %v1039_v25  ;;  %v293_v18 = vpop.f32.mrf.mxu1 }
  0xba   :  { %v750_v56 = vpop.eup %749  ;;  %v497_v50 = vmul.f32 0.7978846, %v481_v44  ;;  %v437_v0 = vmul.f32 0.044715, %v1051_v47  ;;  %v468_v12 = vmul.f32 %v452_v3, %v1048_v46  ;;  %v1073_v17 = vadd.f32 %v998_v35, %v274_v4 }
  0xbb   :  { %v752_v61 = vpop.eup %751  ;;  %563 = vst [vmem:[%s1133_s3] sm:$0xff] %v555_v49  ;;  %v525_v62 = vadd.f32 1.0, %v750_v56  ;;  %v498_v54 = vmul.f32 0.7978846, %v482_v52  ;;  %v483_v8 = vadd.f32 %v467_v63, %v1039_v25  ;;  %v438_v59 = vmul.f32 0.044715, %v1059_v60 }
  0xbc   :  { %v754_v1 = vpop.eup %753  ;;  %v526_v2 = vadd.f32 1.0, %v752_v61  ;;  %757 = vtanh.f32 %v497_v50  ;;  %v453_v13 = vmul.f32 %v437_v0, %v1051_v47  ;;  %v484_v21 = vadd.f32 %v468_v12, %v1048_v46 }
  0xbd   :  { %v756_v5 = vpop.eup %755  ;;  %v541_v6 = vmul.f32 %v525_v62, %v413_v42  ;;  %v527_v7 = vadd.f32 1.0, %v754_v1  ;;  %759 = vtanh.f32 %v498_v54  ;;  %v499_v15 = vmul.f32 0.7978846, %v483_v8 }
  0xbe   :  { %v542_v9 = vmul.f32 %v526_v2, %v414_v51  ;;  %v528_v11 = vadd.f32 1.0, %v756_v5  ;;  %v469_v22 = vmul.f32 %v453_v13, %v1051_v47  ;;  %v417_v24 = vmul.f32 0.5, %v1027_v10 }
  0xbf   :  { %v543_v14 = vmul.f32 %v527_v7, %v415_v57  ;;  %v312_v23 = vpop.f32.mrf.mxu2  ;;  %761 = vtanh.f32 %v499_v15  ;;  %v454_v26 = vmul.f32 %v438_v59, %v1059_v60  ;;  %v439_v27 = vmul.f32 0.044715, %v1073_v17 }
  0xc0   :  { %v556_v19 = vpack.c.bf16 %v542_v9, %v541_v6  ;;  %v544_v20 = vmul.f32 %v528_v11, %v416_v55  ;;  %v500_v29 = vmul.f32 0.7978846, %v484_v21  ;;  %v485_v30 = vadd.f32 %v469_v22, %v1051_v47 }
  0xc1   :  { %v1085_v31 = vadd.f32 %v1000_v36, %v293_v18  ;;  %v470_v10 = vmul.f32 %v454_v26, %v1059_v60  ;;  %v455_v34 = vmul.f32 %v439_v27, %v1073_v17  ;;  %v1090_v37 = vadd.f32 %v1004_v43, %v312_v23  ;;  %v331_v36 = vpop.f32.mrf.mxu3 }
  0xc2   :  { %v758_v28 = vpop.eup %757  ;;  %564 = vst [vmem:[%s1133_s3 + $0x8] sm:$0xff] %v556_v19  ;;  %v557_v35 = vpack.c.bf16 %v544_v20, %v543_v14  ;;  %v418_v38 = vmul.f32 0.5, %v1032_v16  ;;  %763 = vtanh.f32 %v500_v29  ;;  %v501_v40 = vmul.f32 0.7978846, %v485_v30 }
  0xc3   :  { %v760_v32 = vpop.eup %759  ;;  %v529_v33 = vadd.f32 1.0, %v758_v28  ;;  %v486_v42 = vadd.f32 %v470_v10, %v1059_v60  ;;  %v471_v44 = vmul.f32 %v455_v34, %v1073_v17  ;;  %v440_v48 = vmul.f32 0.044715, %v1085_v31 }
  0xc4   :  { %565 = vst [vmem:[%s1133_s3 + $0x10] sm:$0xff] %v557_v35  ;;  %v530_v39 = vadd.f32 1.0, %v760_v32  ;;  %765 = vtanh.f32 %v501_v40  ;;  %v441_v43 = vmul.f32 0.044715, %v1090_v37  ;;  %v410_v56 = vadd.f32 %v1006_v45, %v331_v36 }
  0xc5   :  { %v545_v41 = vmul.f32 %v529_v33, %v417_v24  ;;  %v762_v51 = vpop.eup %761  ;;  %v502_v52 = vmul.f32 0.7978846, %v486_v42  ;;  %v487_v53 = vadd.f32 %v471_v44, %v1073_v17  ;;  %v456_v16 = vmul.f32 %v440_v48, %v1085_v31 }
  0xc6   :  { %v546_v49 = vmul.f32 %v530_v39, %v418_v38  ;;  %v531_v50 = vadd.f32 1.0, %v762_v51  ;;  %v457_v58 = vmul.f32 %v441_v43, %v1090_v37  ;;  %v419_v61 = vmul.f32 0.5, %v1039_v25 }
  0xc7   :  { %767 = vtanh.f32 %v502_v52  ;;  %v503_v62 = vmul.f32 0.7978846, %v487_v53  ;;  %v472_v54 = vmul.f32 %v456_v16, %v1085_v31  ;;  %v420_v0 = vmul.f32 0.5, %v1048_v46 }
  0xc8   :  { %v558_v57 = vpack.c.bf16 %v546_v49, %v545_v41  ;;  %v764_v63 = vpop.eup %763  ;;  %v473_v1 = vmul.f32 %v457_v58, %v1090_v37  ;;  %v442_v45 = vmul.f32 0.044715, %v410_v56  ;;  %v547_v2 = vmul.f32 %v531_v50, %v419_v61 }
  0xc9   :  { %v532_v55 = vadd.f32 1.0, %v764_v63  ;;  %769 = vtanh.f32 %v503_v62  ;;  %v488_v3 = vadd.f32 %v472_v54, %v1085_v31  ;;  %v421_v9 = vmul.f32 0.5, %v1051_v47 }
  0xca   :  { %566 = vst [vmem:[%s1133_s3 + $0x18] sm:$0xff] %v558_v57  ;;  %v766_v25 = vpop.eup %765  ;;  %v489_v4 = vadd.f32 %v473_v1, %v1090_v37  ;;  %v458_v5 = vmul.f32 %v442_v45, %v410_v56  ;;  %v422_v14 = vmul.f32 0.5, %v1059_v60  ;;  %v423_v23 = vmul.f32 0.5, %v1073_v17 }
  0xcb   :  { %v548_v6 = vmul.f32 %v532_v55, %v420_v0  ;;  %v533_v7 = vadd.f32 1.0, %v766_v25  ;;  %v504_v8 = vmul.f32 0.7978846, %v488_v3  ;;  %v424_v27 = vmul.f32 0.5, %v1085_v31 }
  0xcc   :  { %v505_v11 = vmul.f32 0.7978846, %v489_v4  ;;  %v474_v12 = vmul.f32 %v458_v5, %v410_v56  ;;  %v425_v30 = vmul.f32 0.5, %v1090_v37  ;;  %v426_v34 = vmul.f32 0.5, %v410_v56 }
  0xcd   :  { %v768_v46 = vpop.eup %767  ;;  %v559_v13 = vpack.c.bf16 %v548_v6, %v547_v2  ;;  %771 = vtanh.f32 %v504_v8  ;;  %v549_v15 = vmul.f32 %v533_v7, %v421_v9 }
  0xce   :  { %v534_v59 = vadd.f32 1.0, %v768_v46  ;;  %773 = vtanh.f32 %v505_v11  ;;  %v490_v18 = vadd.f32 %v474_v12, %v410_v56 }
  0xcf   :  { %v770_v19 = vpop.eup %769  ;;  %567 = vst [vmem:[%s1133_s3 + $0x20] sm:$0xff] %v559_v13 }
  0xd0   :  { %v550_v20 = vmul.f32 %v534_v59, %v422_v14  ;;  %v535_v21 = vadd.f32 1.0, %v770_v19  ;;  %v506_v22 = vmul.f32 0.7978846, %v490_v18 }
  0xd2   :  { %v560_v47 = vpack.c.bf16 %v550_v20, %v549_v15  ;;  %775 = vtanh.f32 %v506_v22  ;;  %v551_v60 = vmul.f32 %v535_v21, %v423_v23 }
  0xd3   :  { %v772_v24 = vpop.eup %771 }
  0xd4   :  { %v774_v26 = vpop.eup %773  ;;  %568 = vst [vmem:[%s1133_s3 + $0x28] sm:$0xff] %v560_v47  ;;  %v536_v28 = vadd.f32 1.0, %v772_v24 }
  0xd5   :  { %v537_v35 = vadd.f32 1.0, %v774_v26 }
  0xd6   :  { %v552_v29 = vmul.f32 %v536_v28, %v424_v27 }
  0xd7   :  { %v553_v10 = vmul.f32 %v537_v35, %v425_v30 }
  0xd8   :  { %v776_v32 = vpop.eup %775  ;;  %v561_v33 = vpack.c.bf16 %v552_v29, %v551_v60 }
  0xd9   :  { %v538_v17 = vadd.f32 1.0, %v776_v32 }
  0xda   :  { %569 = vst [vmem:[%s1133_s3 + $0x30] sm:$0xff] %v561_v33 }
  0xdb   :  { %v554_v38 = vmul.f32 %v538_v17, %v426_v34 }
  0xdd   :  { %v562_v39 = vpack.c.bf16 %v554_v38, %v553_v10 }
  0xdf   :  { %570 = vst [vmem:[%s1133_s3 + $0x38] sm:$0xff] %v562_v39 }

</bundles_post_ra>
